<compile_context>
chip_gen: v7x
topology: tpu7x:2x2x1
jax: 0.10.0
libtpu: 0.0.40
codegen_flags: <defaults>
</compile_context>

<pallas_src>
import functools

import jax
import jax.numpy as jnp
from jax.experimental import pallas as pl
from jax.experimental.pallas import tpu as pltpu


# 48 MiB scoped VMEM: covers tn=2048 tiles with headroom, safe on v7x (64 MiB
# physical) and well under v5e/v6e's 128 MiB.
_VMEM_LIMIT = 48 * 1024 * 1024


def _full_spec(shape):
    return pl.BlockSpec(shape, lambda *_: (0,) * len(shape))


# ----------------------------------------------------------------------------
# Fused point trunk:
#   out[b] = max_over_points( [relu]( relu(relu(x@W1 + s1) @ W2 + s2) @ W3 + s3 ) )
# grid = (B, num_point_tiles); running max accumulated directly in the
# VMEM-resident output block (its index is constant across the tile axis).
# ----------------------------------------------------------------------------
def _trunk_kernel(x_ref, w1_ref, s1_ref, w2_ref, s2_ref, w3_ref, s3_ref,
                  o_ref, *, relu3):
    t = pl.program_id(1)

    x = x_ref[0]                                                       # (TN, 3) f32
    w1 = w1_ref[0]                                                     # (3, 64) f32
    # Layer 1 (Conv1d 3->64) on the VPU as 3 broadcast-FMAs: a K=3/8 f32 MXU
    # matmul is nearly all idle passes, while the VPU has slack here (the
    # kernel is MXU-bound on conv2/conv3).
    h = (x[:, 0:1] * w1[0:1, :]
         + x[:, 1:2] * w1[1:2, :]
         + x[:, 2:3] * w1[2:3, :])                                     # (TN, 64)
    h = jnp.maximum(h + s1_ref[...], 0.0)
    h = jnp.dot(h.astype(jnp.bfloat16), w2_ref[...],
                preferred_element_type=jnp.float32)                    # (TN, 128)
    h = jnp.maximum(h + s2_ref[...], 0.0)
    h = jnp.dot(h.astype(jnp.bfloat16), w3_ref[...],
                preferred_element_type=jnp.float32)                    # (TN, 1024)
    h = h + s3_ref[...]
    if relu3:
        h = jnp.maximum(h, 0.0)

    # Cross-sublane (points) max inside the tile.
    tile_max = jnp.max(h, axis=0, keepdims=True)                       # (1, 1024)

    @pl.when(t == 0)
    def _init():
        o_ref[...] = tile_max.reshape(o_ref.shape)

    @pl.when(t > 0)
    def _accum():
        o_ref[...] = jnp.maximum(o_ref[...], tile_max.reshape(o_ref.shape))


def fused_point_trunk(x_pts, w1, s1, w2, s2, w3, s3, *, relu3, tn):
    """x_pts: (B, N_pad, 3) f32; w1: (B or 1, 3, 64) f32; w2/w3: bf16. -> (B, 1024) f32."""
    b, n_pad, cin = x_pts.shape
    assert cin == 3 and n_pad % tn == 0 and tn % 8 == 0
    n_tiles = n_pad // tn
    cout = w3.shape[1]
    per_batch_w1 = (w1.shape[0] == b)
    w1_map = (lambda i, t: (i, 0, 0)) if per_batch_w1 else (lambda i, t: (0, 0, 0))

    flops = 2 * b * n_pad * (cin * 64 + 64 * 128 + 128 * cout)
    bytes_accessed = (x_pts.size * 4 + w1.size * 4 + w2.size * 2 + w3.size * 2
                      + (s1.size + s2.size + s3.size) * 4 + b * cout * 4)

    out = pl.pallas_call(
        functools.partial(_trunk_kernel, relu3=relu3),
        out_shape=jax.ShapeDtypeStruct((b, 1, cout), jnp.float32),
        grid=(b, n_tiles),
        in_specs=[
            pl.BlockSpec((1, tn, cin), lambda i, t: (i, t, 0)),
            pl.BlockSpec((1, cin, 64), w1_map),
            pl.BlockSpec((1, 64), lambda i, t: (0, 0)),
            pl.BlockSpec((64, 128), lambda i, t: (0, 0)),
            pl.BlockSpec((1, 128), lambda i, t: (0, 0)),
            pl.BlockSpec((128, cout), lambda i, t: (0, 0)),
            pl.BlockSpec((1, cout), lambda i, t: (0, 0)),
        ],
        out_specs=pl.BlockSpec((1, 1, cout), lambda i, t: (i, 0, 0)),
        compiler_params=pltpu.CompilerParams(
            dimension_semantics=("parallel", "arbitrary"),
            vmem_limit_bytes=_VMEM_LIMIT),
        cost_estimate=pl.CostEstimate(flops=int(flops), transcendentals=0,
                                      bytes_accessed=int(bytes_accessed)),
    )(x_pts, w1, s1, w2, s2, w3, s3)
    return out[:, 0, :]


# ----------------------------------------------------------------------------
# Fused STN head: fc1 -> relu -> fc2 -> relu -> fc3 (+bias), lane-dense padded output.
# ----------------------------------------------------------------------------
def _stn_head_kernel(g_ref, w1_ref, s1_ref, w2_ref, s2_ref, w3_ref, s3_ref, o_ref):
    g = g_ref[...]                                                     # (B, 1024) f32
    h = jnp.dot(g.astype(jnp.bfloat16), w1_ref[...],
                preferred_element_type=jnp.float32)
    h = jnp.maximum(h + s1_ref[...], 0.0)                              # (B, 512)
    h = jnp.dot(h.astype(jnp.bfloat16), w2_ref[...],
                preferred_element_type=jnp.float32)
    h = jnp.maximum(h + s2_ref[...], 0.0)                              # (B, 256)
    h = jnp.dot(h.astype(jnp.bfloat16), w3_ref[...],
                preferred_element_type=jnp.float32)                    # (B, 128)
    o_ref[...] = h + s3_ref[...]


def stn_head(g, w1, s1, w2, s2, w3, s3):
    b, c = g.shape
    out_c = w3.shape[1]
    return pl.pallas_call(
        _stn_head_kernel,
        out_shape=jax.ShapeDtypeStruct((b, out_c), jnp.float32),
        grid=(1,),
        in_specs=[
            _full_spec((b, c)),
            _full_spec(w1.shape), _full_spec(s1.shape),
            _full_spec(w2.shape), _full_spec(s2.shape),
            _full_spec(w3.shape), _full_spec(s3.shape),
        ],
        out_specs=_full_spec((b, out_c)),
        compiler_params=pltpu.CompilerParams(
            dimension_semantics=("arbitrary",),
            vmem_limit_bytes=_VMEM_LIMIT),
    )(g, w1, s1, w2, s2, w3, s3)


# ----------------------------------------------------------------------------
# Deterministic parameter init + BN folding (scale folded into weights host-side)
# ----------------------------------------------------------------------------
def _dense_init(key, cin, cout, scale=0.1):
    kw, kb = jax.random.split(key)
    w = jax.random.normal(kw, (cin, cout), jnp.float32) * scale
    b = jax.random.normal(kb, (cout,), jnp.float32) * scale
    return w, b


def _fold_bn(w, b, eps=1e-5):
    """Inference-mode BN (gamma=1, beta=0, mean=0, var=1) folded into (W*scale, shift)."""
    cout = w.shape[1]
    scale = 1.0 / jnp.sqrt(jnp.ones((cout,), jnp.float32) + eps)
    return w * scale[None, :], (scale * b).reshape(1, cout)


def init_pointnetfeat_params(key):
    keys = jax.random.split(key, 9)
    stn = {}

    w, b = _dense_init(keys[0], 3, 64)
    w, s = _fold_bn(w, b)
    stn["w1"] = w[None]                                    # (1, 3, 64) f32
    stn["s1"] = s
    w, b = _dense_init(keys[1], 64, 128)
    w, s = _fold_bn(w, b)
    stn["w2"], stn["s2"] = w.astype(jnp.bfloat16), s
    w, b = _dense_init(keys[2], 128, 1024)
    w, s = _fold_bn(w, b)
    stn["w3"], stn["s3"] = w.astype(jnp.bfloat16), s

    w, b = _dense_init(keys[3], 1024, 512)
    w, s = _fold_bn(w, b)
    stn["wf1"], stn["sf1"] = w.astype(jnp.bfloat16), s
    w, b = _dense_init(keys[4], 512, 256)
    w, s = _fold_bn(w, b)
    stn["wf2"], stn["sf2"] = w.astype(jnp.bfloat16), s
    w, b = _dense_init(keys[5], 256, 9)                    # fc3: bias only, no BN
    stn["wf3"] = jnp.pad(w, ((0, 0), (0, 119))).astype(jnp.bfloat16)   # (256, 128) lane-dense
    stn["sf3"] = jnp.pad(b.reshape(1, 9), ((0, 0), (0, 119)))          # f32, negligible size

    p = {"stn": stn}
    w, b = _dense_init(keys[6], 3, 64)
    w, s = _fold_bn(w, b)
    p["w1"], p["s1"] = w, s                                # (3, 64); trans folded at runtime
    w, b = _dense_init(keys[7], 64, 128)
    w, s = _fold_bn(w, b)
    p["w2"], p["s2"] = w.astype(jnp.bfloat16), s
    w, b = _dense_init(keys[8], 128, 1024)
    w, s = _fold_bn(w, b)
    p["w3"], p["s3"] = w.astype(jnp.bfloat16), s
    return p


# ----------------------------------------------------------------------------
# Forward pass (glue in plain JAX, all heavy compute in the two fused kernels)
# ----------------------------------------------------------------------------
def _pad_points(x_bnc, tn):
    """(B, N, 3) -> (B, N_pad, 3): pad points to a multiple of tn by replicating
    the last point (max-invariant)."""
    b, n, c = x_bnc.shape
    n_extra = (-n) % tn
    if n_extra:
        x_bnc = jnp.concatenate(
            [x_bnc, jnp.broadcast_to(x_bnc[:, n - 1:n, :], (b, n_extra, c))], axis=1)
    return x_bnc


def pointnetfeat_forward(x_bcn, p, *, tn=2048):
    """x_bcn: (B, 3, N), exactly like the PyTorch module input.
    Returns (global_feat (B, 1024), trans (B, 3, 3), trans_feat=None)."""
    b, c, n = x_bcn.shape
    assert c == 3 and n >= 1
    # Point-tile size: as large as the (padded) point count, capped at the
    # requested tn, always a multiple of 8 (sublane alignment).
    tn = min(tn, max(8, ((n + 7) // 8) * 8))
    tn = max(8, (tn // 8) * 8)
    x_bnc = jnp.transpose(x_bcn, (0, 2, 1))                              # (B, N, 3)
    x_pts = _pad_points(x_bnc, tn)                                       # (B, Np, 3)

    sp = p["stn"]
    # STN3d trunk: fused c1 -> c2 -> c3(+relu) -> max.
    g = fused_point_trunk(x_pts, sp["w1"], sp["s1"], sp["w2"], sp["s2"],
                          sp["w3"], sp["s3"], relu3=True, tn=tn)         # (B, 1024)
    # STN3d head: fused fc1 -> fc2 -> fc3, 128-lane padded output.
    head = stn_head(g, sp["wf1"], sp["sf1"], sp["wf2"], sp["sf2"],
                    sp["wf3"], sp["sf3"])                                # (B, 128)
    iden = jnp.eye(3, dtype=jnp.float32).reshape(1, 9)
    trans = (head[:, :9] + iden).reshape(b, 3, 3)

    # Fold the per-batch 3x3 transform into conv1's BN-scaled weight:
    #   (x @ trans) @ W1 == x @ (trans @ W1)   (tiny einsum in plain JAX).
    w1_eff = jnp.einsum("bij,jk->bik", trans, p["w1"])                   # (B, 3, 64)

    # Main trunk: fused c1 -> c2 -> c3 (BN, no relu) -> max.
    gfeat = fused_point_trunk(x_pts, w1_eff, p["s1"], p["w2"], p["s2"],
                              p["w3"], p["s3"], relu3=False, tn=tn)      # (B, 1024)
    # global_feat=True, feature_transform=False (module defaults).
    return gfeat, trans, None


# ----------------------------------------------------------------------------
# Plain-JAX reference of the same folded-BN inference graph (for a sanity check)
# ----------------------------------------------------------------------------
def reference_forward(x_bcn, p):
    x = jnp.transpose(x_bcn, (0, 2, 1))
    sp = p["stn"]

    def trunk(xin, w1, s1, w2, s2, w3, s3, relu3):
        h = jnp.maximum(xin @ w1 + s1, 0.0)
        h = jnp.maximum(h @ w2.astype(jnp.float32) + s2, 0.0)
        h = h @ w3.astype(jnp.float32) + s3
        if relu3:
            h = jnp.maximum(h, 0.0)
        return jnp.max(h, axis=1)

    g = trunk(x, sp["w1"][0], sp["s1"], sp["w2"], sp["s2"],
              sp["w3"], sp["s3"], True)
    h = jnp.maximum(g @ sp["wf1"].astype(jnp.float32) + sp["sf1"], 0.0)
    h = jnp.maximum(h @ sp["wf2"].astype(jnp.float32) + sp["sf2"], 0.0)
    h = h @ sp["wf3"][:, :9].astype(jnp.float32) + sp["sf3"][:, :9]
    trans = (h + jnp.eye(3, dtype=jnp.float32).reshape(1, 9)).reshape(-1, 3, 3)
    xt = jnp.einsum("bnc,bcd->bnd", x, trans)
    gfeat = trunk(xt, p["w1"], p["s1"], p["w2"], p["s2"], p["w3"], p["s3"], False)
    return gfeat, trans


# ----------------------------------------------------------------------------
if __name__ == "__main__":
    key = jax.random.PRNGKey(0)
    kx, kp = jax.random.split(key)

    B, C, N = 2, 3, 256                     # small: batch=2, 3 coords, 256 points
    x = jax.random.normal(kx, (B, C, N), dtype=jnp.float32)
    params = init_pointnetfeat_params(kp)

    # tn=128 here so the (batch, point-tile) grid has 2 reduction steps and the
    # running-max accumulation path is exercised; production default is tn=2048.
    fwd = jax.jit(functools.partial(pointnetfeat_forward, tn=128))
    global_feat, trans, trans_feat = fwd(x, params)
    jax.block_until_ready((global_feat, trans))

    assert global_feat.shape == (B, 1024)
    assert trans.shape == (B, 3, 3)
    assert trans_feat is None

    # Loose numerical check vs the plain-JAX reference (kernel uses bf16 MXU inputs).
    ref_g, ref_t = reference_forward(x, params)
    assert jnp.allclose(trans, ref_t, rtol=5e-2, atol=5e-2)
    assert jnp.allclose(global_feat, ref_g, rtol=5e-2, atol=5e-2)

    print("KERNEL_OK")
</pallas_src>

<mosaic_0001>
module attributes {stable_mosaic.version = 11 : i64} {
  func.func @_trunk_kernel(%arg0: i32, %arg1: i32, %arg2: memref<1x128x3xf32, #tpu.memory_space<vmem>>, %arg3: memref<1x3x64xf32, #tpu.memory_space<vmem>>, %arg4: memref<1x64xf32, #tpu.memory_space<vmem>>, %arg5: memref<64x128xbf16, #tpu.memory_space<vmem>>, %arg6: memref<1x128xf32, #tpu.memory_space<vmem>>, %arg7: memref<128x1024xbf16, #tpu.memory_space<vmem>>, %arg8: memref<1x1024xf32, #tpu.memory_space<vmem>>, %arg9: memref<1x1x1024xf32, #tpu.memory_space<vmem>>) attributes {dimension_semantics = [#tpu.dimension_semantics<parallel>, #tpu.dimension_semantics<arbitrary>], iteration_bounds = array<i64: 2, 2>, scalar_prefetch = 0 : i64, scratch_operands = 0 : i64, tpu.core_type = #tpu.core_type<tc>, window_params = [{transform_indices = @transform_0, window_bounds = array<i64: 1, 128, 3>}, {pipeline_mode = #tpu.pipeline_mode<synchronous>, transform_indices = @transform_1, window_bounds = array<i64: 1, 3, 64>}, {pipeline_mode = #tpu.pipeline_mode<synchronous>, transform_indices = @transform_2, window_bounds = array<i64: 1, 64>}, {pipeline_mode = #tpu.pipeline_mode<synchronous>, transform_indices = @transform_3, window_bounds = array<i64: 64, 128>}, {pipeline_mode = #tpu.pipeline_mode<synchronous>, transform_indices = @transform_4, window_bounds = array<i64: 1, 128>}, {pipeline_mode = #tpu.pipeline_mode<synchronous>, transform_indices = @transform_5, window_bounds = array<i64: 128, 1024>}, {pipeline_mode = #tpu.pipeline_mode<synchronous>, transform_indices = @transform_6, window_bounds = array<i64: 1, 1024>}, {transform_indices = @transform_7, window_bounds = array<i64: 1, 1, 1024>}]} {
    %c0 = arith.constant 0 : index
    %c0_0 = arith.constant 0 : index
    %c0_1 = arith.constant 0 : index
    %0 = vector.load %arg2[%c0, %c0_0, %c0_1] : memref<1x128x3xf32, #tpu.memory_space<vmem>>, vector<1x128x3xf32>
    %1 = vector.shape_cast %0 : vector<1x128x3xf32> to vector<128x3xf32>
    %c0_2 = arith.constant 0 : index
    %c0_3 = arith.constant 0 : index
    %c0_4 = arith.constant 0 : index
    %2 = vector.load %arg3[%c0_2, %c0_3, %c0_4] : memref<1x3x64xf32, #tpu.memory_space<vmem>>, vector<1x3x64xf32>
    %3 = vector.shape_cast %2 : vector<1x3x64xf32> to vector<3x64xf32>
    %4 = vector.extract_strided_slice %1 {offsets = [0, 0], sizes = [128, 1], strides = [1, 1]} : vector<128x3xf32> to vector<128x1xf32>
    %5 = vector.extract_strided_slice %3 {offsets = [0, 0], sizes = [1, 64], strides = [1, 1]} : vector<3x64xf32> to vector<1x64xf32>
    %6 = vector.broadcast %4 : vector<128x1xf32> to vector<128x64xf32>
    %7 = vector.broadcast %5 : vector<1x64xf32> to vector<128x64xf32>
    %8 = arith.mulf %6, %7 : vector<128x64xf32>
    %9 = vector.extract_strided_slice %1 {offsets = [0, 1], sizes = [128, 1], strides = [1, 1]} : vector<128x3xf32> to vector<128x1xf32>
    %10 = vector.extract_strided_slice %3 {offsets = [1, 0], sizes = [1, 64], strides = [1, 1]} : vector<3x64xf32> to vector<1x64xf32>
    %11 = vector.broadcast %9 : vector<128x1xf32> to vector<128x64xf32>
    %12 = vector.broadcast %10 : vector<1x64xf32> to vector<128x64xf32>
    %13 = arith.mulf %11, %12 : vector<128x64xf32>
    %14 = arith.addf %8, %13 : vector<128x64xf32>
    %15 = vector.extract_strided_slice %1 {offsets = [0, 2], sizes = [128, 1], strides = [1, 1]} : vector<128x3xf32> to vector<128x1xf32>
    %16 = vector.extract_strided_slice %3 {offsets = [2, 0], sizes = [1, 64], strides = [1, 1]} : vector<3x64xf32> to vector<1x64xf32>
    %17 = vector.broadcast %15 : vector<128x1xf32> to vector<128x64xf32>
    %18 = vector.broadcast %16 : vector<1x64xf32> to vector<128x64xf32>
    %19 = arith.mulf %17, %18 : vector<128x64xf32>
    %20 = arith.addf %14, %19 : vector<128x64xf32>
    %c0_5 = arith.constant 0 : index
    %c0_6 = arith.constant 0 : index
    %21 = vector.load %arg4[%c0_5, %c0_6] : memref<1x64xf32, #tpu.memory_space<vmem>>, vector<1x64xf32>
    %22 = vector.broadcast %21 : vector<1x64xf32> to vector<128x64xf32>
    %23 = arith.addf %20, %22 : vector<128x64xf32>
    %cst = arith.constant 0.000000e+00 : f32
    %24 = vector.broadcast %cst : f32 to vector<128x64xf32>
    %25 = arith.maximumf %23, %24 : vector<128x64xf32>
    %26 = arith.truncf %25 : vector<128x64xf32> to vector<128x64xbf16>
    %c0_7 = arith.constant 0 : index
    %c0_8 = arith.constant 0 : index
    %27 = vector.load %arg5[%c0_7, %c0_8] : memref<64x128xbf16, #tpu.memory_space<vmem>>, vector<64x128xbf16>
    %cst_9 = arith.constant dense<0.000000e+00> : vector<128x128xf32>
    %28 = tpu.matmul %26, %27, %cst_9 {dimension_numbers = #tpu.dot_dimension_numbers<[1], [0], [0], [1], [0, 0, 1, 1], [], []>} : vector<128x64xbf16>, vector<64x128xbf16>, vector<128x128xf32> -> vector<128x128xf32>
    %c0_10 = arith.constant 0 : index
    %c0_11 = arith.constant 0 : index
    %29 = vector.load %arg6[%c0_10, %c0_11] : memref<1x128xf32, #tpu.memory_space<vmem>>, vector<1x128xf32>
    %30 = vector.broadcast %29 : vector<1x128xf32> to vector<128x128xf32>
    %31 = arith.addf %28, %30 : vector<128x128xf32>
    %cst_12 = arith.constant 0.000000e+00 : f32
    %32 = vector.broadcast %cst_12 : f32 to vector<128x128xf32>
    %33 = arith.maximumf %31, %32 : vector<128x128xf32>
    %34 = arith.truncf %33 : vector<128x128xf32> to vector<128x128xbf16>
    %c0_13 = arith.constant 0 : index
    %c0_14 = arith.constant 0 : index
    %35 = vector.load %arg7[%c0_13, %c0_14] : memref<128x1024xbf16, #tpu.memory_space<vmem>>, vector<128x1024xbf16>
    %cst_15 = arith.constant dense<0.000000e+00> : vector<128x1024xf32>
    %36 = tpu.matmul %34, %35, %cst_15 {dimension_numbers = #tpu.dot_dimension_numbers<[1], [0], [0], [1], [0, 0, 1, 1], [], []>} : vector<128x128xbf16>, vector<128x1024xbf16>, vector<128x1024xf32> -> vector<128x1024xf32>
    %c0_16 = arith.constant 0 : index
    %c0_17 = arith.constant 0 : index
    %37 = vector.load %arg8[%c0_16, %c0_17] : memref<1x1024xf32, #tpu.memory_space<vmem>>, vector<1x1024xf32>
    %38 = vector.broadcast %37 : vector<1x1024xf32> to vector<128x1024xf32>
    %39 = arith.addf %36, %38 : vector<128x1024xf32>
    %cst_18 = arith.constant 0.000000e+00 : f32
    %40 = vector.broadcast %cst_18 : f32 to vector<128x1024xf32>
    %41 = arith.maximumf %39, %40 : vector<128x1024xf32>
    %cst_19 = arith.constant dense<0xFF800000> : vector<1024xf32>
    %42 = vector.multi_reduction <maximumf>, %41, %cst_19 [0] : vector<128x1024xf32> to vector<1024xf32>
    %43 = vector.shape_cast %42 : vector<1024xf32> to vector<1x1024xf32>
    %c0_i32 = arith.constant 0 : i32
    %44 = arith.cmpi eq, %arg1, %c0_i32 : i32
    %45 = arith.extui %44 : i1 to i32
    %c0_i32_20 = arith.constant 0 : i32
    %46 = arith.cmpi ne, %45, %c0_i32_20 : i32
    scf.if %46 {
      %50 = vector.shape_cast %43 : vector<1x1024xf32> to vector<1x1x1024xf32>
      %c0_23 = arith.constant 0 : index
      %c0_24 = arith.constant 0 : index
      %c0_25 = arith.constant 0 : index
      %51 = vector.load %arg9[%c0_23, %c0_24, %c0_25] : memref<1x1x1024xf32, #tpu.memory_space<vmem>>, vector<1x1x1024xf32>
      tpu.vector_store %arg9[%c0_23, %c0_24, %c0_25], %50 {strides = array<i32>} : memref<1x1x1024xf32, #tpu.memory_space<vmem>>, vector<1x1x1024xf32>,
    } else {
    }
    %c0_i32_21 = arith.constant 0 : i32
    %47 = arith.cmpi sgt, %arg1, %c0_i32_21 : i32
    %48 = arith.extui %47 : i1 to i32
    %c0_i32_22 = arith.constant 0 : i32
    %49 = arith.cmpi ne, %48, %c0_i32_22 : i32
    scf.if %49 {
      %c0_23 = arith.constant 0 : index
      %c0_24 = arith.constant 0 : index
      %c0_25 = arith.constant 0 : index
      %50 = vector.load %arg9[%c0_23, %c0_24, %c0_25] : memref<1x1x1024xf32, #tpu.memory_space<vmem>>, vector<1x1x1024xf32>
      %51 = vector.shape_cast %43 : vector<1x1024xf32> to vector<1x1x1024xf32>
      %52 = arith.maximumf %50, %51 : vector<1x1x1024xf32>
      %c0_26 = arith.constant 0 : index
      %c0_27 = arith.constant 0 : index
      %c0_28 = arith.constant 0 : index
      %53 = vector.load %arg9[%c0_26, %c0_27, %c0_28] : memref<1x1x1024xf32, #tpu.memory_space<vmem>>, vector<1x1x1024xf32>
      tpu.vector_store %arg9[%c0_26, %c0_27, %c0_28], %52 {strides = array<i32>} : memref<1x1x1024xf32, #tpu.memory_space<vmem>>, vector<1x1x1024xf32>,
    } else {
    }
    return
  }
  func.func @transform_0(%arg0: i32, %arg1: i32) -> (i32, i32, i32) {
    %c0_i32 = arith.constant 0 : i32
    %c0_i32_0 = arith.constant 0 : i32
    return %arg0, %arg1, %c0_i32 : i32, i32, i32
  }
  func.func @transform_1(%arg0: i32, %arg1: i32) -> (i32, i32, i32) {
    %c0_i32 = arith.constant 0 : i32
    %c0_i32_0 = arith.constant 0 : i32
    %c0_i32_1 = arith.constant 0 : i32
    %c0_i32_2 = arith.constant 0 : i32
    return %c0_i32, %c0_i32_0, %c0_i32_1 : i32, i32, i32
  }
  func.func @transform_2(%arg0: i32, %arg1: i32) -> (i32, i32) {
    %c0_i32 = arith.constant 0 : i32
    %c0_i32_0 = arith.constant 0 : i32
    %c0_i32_1 = arith.constant 0 : i32
    return %c0_i32, %c0_i32_0 : i32, i32
  }
  func.func @transform_3(%arg0: i32, %arg1: i32) -> (i32, i32) {
    %c0_i32 = arith.constant 0 : i32
    %c0_i32_0 = arith.constant 0 : i32
    %c0_i32_1 = arith.constant 0 : i32
    return %c0_i32, %c0_i32_0 : i32, i32
  }
  func.func @transform_4(%arg0: i32, %arg1: i32) -> (i32, i32) {
    %c0_i32 = arith.constant 0 : i32
    %c0_i32_0 = arith.constant 0 : i32
    %c0_i32_1 = arith.constant 0 : i32
    return %c0_i32, %c0_i32_0 : i32, i32
  }
  func.func @transform_5(%arg0: i32, %arg1: i32) -> (i32, i32) {
    %c0_i32 = arith.constant 0 : i32
    %c0_i32_0 = arith.constant 0 : i32
    %c0_i32_1 = arith.constant 0 : i32
    return %c0_i32, %c0_i32_0 : i32, i32
  }
  func.func @transform_6(%arg0: i32, %arg1: i32) -> (i32, i32) {
    %c0_i32 = arith.constant 0 : i32
    %c0_i32_0 = arith.constant 0 : i32
    %c0_i32_1 = arith.constant 0 : i32
    return %c0_i32, %c0_i32_0 : i32, i32
  }
  func.func @transform_7(%arg0: i32, %arg1: i32) -> (i32, i32, i32) {
    %c0_i32 = arith.constant 0 : i32
    %c0_i32_0 = arith.constant 0 : i32
    %c0_i32_1 = arith.constant 0 : i32
    return %arg0, %c0_i32, %c0_i32_0 : i32, i32, i32
  }
}

module attributes {stable_mosaic.version = 11 : i64} {
  func.func @_stn_head_kernel(%arg0: i32, %arg1: memref<2x1024xf32, #tpu.memory_space<vmem>>, %arg2: memref<1024x512xbf16, #tpu.memory_space<vmem>>, %arg3: memref<1x512xf32, #tpu.memory_space<vmem>>, %arg4: memref<512x256xbf16, #tpu.memory_space<vmem>>, %arg5: memref<1x256xf32, #tpu.memory_space<vmem>>, %arg6: memref<256x128xbf16, #tpu.memory_space<vmem>>, %arg7: memref<1x128xf32, #tpu.memory_space<vmem>>, %arg8: memref<2x128xf32, #tpu.memory_space<vmem>>) attributes {dimension_semantics = [#tpu.dimension_semantics<arbitrary>], iteration_bounds = array<i64: 1>, scalar_prefetch = 0 : i64, scratch_operands = 0 : i64, tpu.core_type = #tpu.core_type<tc>, window_params = [{pipeline_mode = #tpu.pipeline_mode<synchronous>, transform_indices = @transform_0, window_bounds = array<i64: 2, 1024>}, {pipeline_mode = #tpu.pipeline_mode<synchronous>, transform_indices = @transform_1, window_bounds = array<i64: 1024, 512>}, {pipeline_mode = #tpu.pipeline_mode<synchronous>, transform_indices = @transform_2, window_bounds = array<i64: 1, 512>}, {pipeline_mode = #tpu.pipeline_mode<synchronous>, transform_indices = @transform_3, window_bounds = array<i64: 512, 256>}, {pipeline_mode = #tpu.pipeline_mode<synchronous>, transform_indices = @transform_4, window_bounds = array<i64: 1, 256>}, {pipeline_mode = #tpu.pipeline_mode<synchronous>, transform_indices = @transform_5, window_bounds = array<i64: 256, 128>}, {pipeline_mode = #tpu.pipeline_mode<synchronous>, transform_indices = @transform_6, window_bounds = array<i64: 1, 128>}, {pipeline_mode = #tpu.pipeline_mode<synchronous>, transform_indices = @transform_7, window_bounds = array<i64: 2, 128>}]} {
    %c0 = arith.constant 0 : index
    %c0_0 = arith.constant 0 : index
    %0 = vector.load %arg1[%c0, %c0_0] : memref<2x1024xf32, #tpu.memory_space<vmem>>, vector<2x1024xf32>
    %1 = arith.truncf %0 : vector<2x1024xf32> to vector<2x1024xbf16>
    %c0_1 = arith.constant 0 : index
    %c0_2 = arith.constant 0 : index
    %2 = vector.load %arg2[%c0_1, %c0_2] : memref<1024x512xbf16, #tpu.memory_space<vmem>>, vector<1024x512xbf16>
    %cst = arith.constant dense<0.000000e+00> : vector<2x512xf32>
    %3 = tpu.matmul %1, %2, %cst {dimension_numbers = #tpu.dot_dimension_numbers<[1], [0], [0], [1], [0, 0, 1, 1], [], []>} : vector<2x1024xbf16>, vector<1024x512xbf16>, vector<2x512xf32> -> vector<2x512xf32>
    %c0_3 = arith.constant 0 : index
    %c0_4 = arith.constant 0 : index
    %4 = vector.load %arg3[%c0_3, %c0_4] : memref<1x512xf32, #tpu.memory_space<vmem>>, vector<1x512xf32>
    %5 = vector.broadcast %4 : vector<1x512xf32> to vector<2x512xf32>
    %6 = arith.addf %3, %5 : vector<2x512xf32>
    %cst_5 = arith.constant 0.000000e+00 : f32
    %7 = vector.broadcast %cst_5 : f32 to vector<2x512xf32>
    %8 = arith.maximumf %6, %7 : vector<2x512xf32>
    %9 = arith.truncf %8 : vector<2x512xf32> to vector<2x512xbf16>
    %c0_6 = arith.constant 0 : index
    %c0_7 = arith.constant 0 : index
    %10 = vector.load %arg4[%c0_6, %c0_7] : memref<512x256xbf16, #tpu.memory_space<vmem>>, vector<512x256xbf16>
    %cst_8 = arith.constant dense<0.000000e+00> : vector<2x256xf32>
    %11 = tpu.matmul %9, %10, %cst_8 {dimension_numbers = #tpu.dot_dimension_numbers<[1], [0], [0], [1], [0, 0, 1, 1], [], []>} : vector<2x512xbf16>, vector<512x256xbf16>, vector<2x256xf32> -> vector<2x256xf32>
    %c0_9 = arith.constant 0 : index
    %c0_10 = arith.constant 0 : index
    %12 = vector.load %arg5[%c0_9, %c0_10] : memref<1x256xf32, #tpu.memory_space<vmem>>, vector<1x256xf32>
    %13 = vector.broadcast %12 : vector<1x256xf32> to vector<2x256xf32>
    %14 = arith.addf %11, %13 : vector<2x256xf32>
    %cst_11 = arith.constant 0.000000e+00 : f32
    %15 = vector.broadcast %cst_11 : f32 to vector<2x256xf32>
    %16 = arith.maximumf %14, %15 : vector<2x256xf32>
    %17 = arith.truncf %16 : vector<2x256xf32> to vector<2x256xbf16>
    %c0_12 = arith.constant 0 : index
    %c0_13 = arith.constant 0 : index
    %18 = vector.load %arg6[%c0_12, %c0_13] : memref<256x128xbf16, #tpu.memory_space<vmem>>, vector<256x128xbf16>
    %cst_14 = arith.constant dense<0.000000e+00> : vector<2x128xf32>
    %19 = tpu.matmul %17, %18, %cst_14 {dimension_numbers = #tpu.dot_dimension_numbers<[1], [0], [0], [1], [0, 0, 1, 1], [], []>} : vector<2x256xbf16>, vector<256x128xbf16>, vector<2x128xf32> -> vector<2x128xf32>
    %c0_15 = arith.constant 0 : index
    %c0_16 = arith.constant 0 : index
    %20 = vector.load %arg7[%c0_15, %c0_16] : memref<1x128xf32, #tpu.memory_space<vmem>>, vector<1x128xf32>
    %21 = vector.broadcast %20 : vector<1x128xf32> to vector<2x128xf32>
    %22 = arith.addf %19, %21 : vector<2x128xf32>
    %c0_17 = arith.constant 0 : index
    %c0_18 = arith.constant 0 : index
    %23 = vector.load %arg8[%c0_17, %c0_18] : memref<2x128xf32, #tpu.memory_space<vmem>>, vector<2x128xf32>
    tpu.vector_store %arg8[%c0_17, %c0_18], %22 {strides = array<i32>} : memref<2x128xf32, #tpu.memory_space<vmem>>, vector<2x128xf32>,
    return
  }
  func.func @transform_0(%arg0: i32) -> (i32, i32) {
    %c0_i32 = arith.constant 0 : i32
    %c0_i32_0 = arith.constant 0 : i32
    %c0_i32_1 = arith.constant 0 : i32
    return %c0_i32, %c0_i32_0 : i32, i32
  }
  func.func @transform_1(%arg0: i32) -> (i32, i32) {
    %c0_i32 = arith.constant 0 : i32
    %c0_i32_0 = arith.constant 0 : i32
    %c0_i32_1 = arith.constant 0 : i32
    return %c0_i32, %c0_i32_0 : i32, i32
  }
  func.func @transform_2(%arg0: i32) -> (i32, i32) {
    %c0_i32 = arith.constant 0 : i32
    %c0_i32_0 = arith.constant 0 : i32
    %c0_i32_1 = arith.constant 0 : i32
    return %c0_i32, %c0_i32_0 : i32, i32
  }
  func.func @transform_3(%arg0: i32) -> (i32, i32) {
    %c0_i32 = arith.constant 0 : i32
    %c0_i32_0 = arith.constant 0 : i32
    %c0_i32_1 = arith.constant 0 : i32
    return %c0_i32, %c0_i32_0 : i32, i32
  }
  func.func @transform_4(%arg0: i32) -> (i32, i32) {
    %c0_i32 = arith.constant 0 : i32
    %c0_i32_0 = arith.constant 0 : i32
    %c0_i32_1 = arith.constant 0 : i32
    return %c0_i32, %c0_i32_0 : i32, i32
  }
  func.func @transform_5(%arg0: i32) -> (i32, i32) {
    %c0_i32 = arith.constant 0 : i32
    %c0_i32_0 = arith.constant 0 : i32
    %c0_i32_1 = arith.constant 0 : i32
    return %c0_i32, %c0_i32_0 : i32, i32
  }
  func.func @transform_6(%arg0: i32) -> (i32, i32) {
    %c0_i32 = arith.constant 0 : i32
    %c0_i32_0 = arith.constant 0 : i32
    %c0_i32_1 = arith.constant 0 : i32
    return %c0_i32, %c0_i32_0 : i32, i32
  }
  func.func @transform_7(%arg0: i32) -> (i32, i32) {
    %c0_i32 = arith.constant 0 : i32
    %c0_i32_0 = arith.constant 0 : i32
    %c0_i32_1 = arith.constant 0 : i32
    return %c0_i32, %c0_i32_0 : i32, i32
  }
}

module attributes {stable_mosaic.version = 11 : i64} {
  func.func @_trunk_kernel(%arg0: i32, %arg1: i32, %arg2: memref<1x128x3xf32, #tpu.memory_space<vmem>>, %arg3: memref<1x3x64xf32, #tpu.memory_space<vmem>>, %arg4: memref<1x64xf32, #tpu.memory_space<vmem>>, %arg5: memref<64x128xbf16, #tpu.memory_space<vmem>>, %arg6: memref<1x128xf32, #tpu.memory_space<vmem>>, %arg7: memref<128x1024xbf16, #tpu.memory_space<vmem>>, %arg8: memref<1x1024xf32, #tpu.memory_space<vmem>>, %arg9: memref<1x1x1024xf32, #tpu.memory_space<vmem>>) attributes {dimension_semantics = [#tpu.dimension_semantics<parallel>, #tpu.dimension_semantics<arbitrary>], iteration_bounds = array<i64: 2, 2>, scalar_prefetch = 0 : i64, scratch_operands = 0 : i64, tpu.core_type = #tpu.core_type<tc>, window_params = [{transform_indices = @transform_0, window_bounds = array<i64: 1, 128, 3>}, {transform_indices = @transform_1, window_bounds = array<i64: 1, 3, 64>}, {pipeline_mode = #tpu.pipeline_mode<synchronous>, transform_indices = @transform_2, window_bounds = array<i64: 1, 64>}, {pipeline_mode = #tpu.pipeline_mode<synchronous>, transform_indices = @transform_3, window_bounds = array<i64: 64, 128>}, {pipeline_mode = #tpu.pipeline_mode<synchronous>, transform_indices = @transform_4, window_bounds = array<i64: 1, 128>}, {pipeline_mode = #tpu.pipeline_mode<synchronous>, transform_indices = @transform_5, window_bounds = array<i64: 128, 1024>}, {pipeline_mode = #tpu.pipeline_mode<synchronous>, transform_indices = @transform_6, window_bounds = array<i64: 1, 1024>}, {transform_indices = @transform_7, window_bounds = array<i64: 1, 1, 1024>}]} {
    %c0 = arith.constant 0 : index
    %c0_0 = arith.constant 0 : index
    %c0_1 = arith.constant 0 : index
    %0 = vector.load %arg2[%c0, %c0_0, %c0_1] : memref<1x128x3xf32, #tpu.memory_space<vmem>>, vector<1x128x3xf32>
    %1 = vector.shape_cast %0 : vector<1x128x3xf32> to vector<128x3xf32>
    %c0_2 = arith.constant 0 : index
    %c0_3 = arith.constant 0 : index
    %c0_4 = arith.constant 0 : index
    %2 = vector.load %arg3[%c0_2, %c0_3, %c0_4] : memref<1x3x64xf32, #tpu.memory_space<vmem>>, vector<1x3x64xf32>
    %3 = vector.shape_cast %2 : vector<1x3x64xf32> to vector<3x64xf32>
    %4 = vector.extract_strided_slice %1 {offsets = [0, 0], sizes = [128, 1], strides = [1, 1]} : vector<128x3xf32> to vector<128x1xf32>
    %5 = vector.extract_strided_slice %3 {offsets = [0, 0], sizes = [1, 64], strides = [1, 1]} : vector<3x64xf32> to vector<1x64xf32>
    %6 = vector.broadcast %4 : vector<128x1xf32> to vector<128x64xf32>
    %7 = vector.broadcast %5 : vector<1x64xf32> to vector<128x64xf32>
    %8 = arith.mulf %6, %7 : vector<128x64xf32>
    %9 = vector.extract_strided_slice %1 {offsets = [0, 1], sizes = [128, 1], strides = [1, 1]} : vector<128x3xf32> to vector<128x1xf32>
    %10 = vector.extract_strided_slice %3 {offsets = [1, 0], sizes = [1, 64], strides = [1, 1]} : vector<3x64xf32> to vector<1x64xf32>
    %11 = vector.broadcast %9 : vector<128x1xf32> to vector<128x64xf32>
    %12 = vector.broadcast %10 : vector<1x64xf32> to vector<128x64xf32>
    %13 = arith.mulf %11, %12 : vector<128x64xf32>
    %14 = arith.addf %8, %13 : vector<128x64xf32>
    %15 = vector.extract_strided_slice %1 {offsets = [0, 2], sizes = [128, 1], strides = [1, 1]} : vector<128x3xf32> to vector<128x1xf32>
    %16 = vector.extract_strided_slice %3 {offsets = [2, 0], sizes = [1, 64], strides = [1, 1]} : vector<3x64xf32> to vector<1x64xf32>
    %17 = vector.broadcast %15 : vector<128x1xf32> to vector<128x64xf32>
    %18 = vector.broadcast %16 : vector<1x64xf32> to vector<128x64xf32>
    %19 = arith.mulf %17, %18 : vector<128x64xf32>
    %20 = arith.addf %14, %19 : vector<128x64xf32>
    %c0_5 = arith.constant 0 : index
    %c0_6 = arith.constant 0 : index
    %21 = vector.load %arg4[%c0_5, %c0_6] : memref<1x64xf32, #tpu.memory_space<vmem>>, vector<1x64xf32>
    %22 = vector.broadcast %21 : vector<1x64xf32> to vector<128x64xf32>
    %23 = arith.addf %20, %22 : vector<128x64xf32>
    %cst = arith.constant 0.000000e+00 : f32
    %24 = vector.broadcast %cst : f32 to vector<128x64xf32>
    %25 = arith.maximumf %23, %24 : vector<128x64xf32>
    %26 = arith.truncf %25 : vector<128x64xf32> to vector<128x64xbf16>
    %c0_7 = arith.constant 0 : index
    %c0_8 = arith.constant 0 : index
    %27 = vector.load %arg5[%c0_7, %c0_8] : memref<64x128xbf16, #tpu.memory_space<vmem>>, vector<64x128xbf16>
    %cst_9 = arith.constant dense<0.000000e+00> : vector<128x128xf32>
    %28 = tpu.matmul %26, %27, %cst_9 {dimension_numbers = #tpu.dot_dimension_numbers<[1], [0], [0], [1], [0, 0, 1, 1], [], []>} : vector<128x64xbf16>, vector<64x128xbf16>, vector<128x128xf32> -> vector<128x128xf32>
    %c0_10 = arith.constant 0 : index
    %c0_11 = arith.constant 0 : index
    %29 = vector.load %arg6[%c0_10, %c0_11] : memref<1x128xf32, #tpu.memory_space<vmem>>, vector<1x128xf32>
    %30 = vector.broadcast %29 : vector<1x128xf32> to vector<128x128xf32>
    %31 = arith.addf %28, %30 : vector<128x128xf32>
    %cst_12 = arith.constant 0.000000e+00 : f32
    %32 = vector.broadcast %cst_12 : f32 to vector<128x128xf32>
    %33 = arith.maximumf %31, %32 : vector<128x128xf32>
    %34 = arith.truncf %33 : vector<128x128xf32> to vector<128x128xbf16>
    %c0_13 = arith.constant 0 : index
    %c0_14 = arith.constant 0 : index
    %35 = vector.load %arg7[%c0_13, %c0_14] : memref<128x1024xbf16, #tpu.memory_space<vmem>>, vector<128x1024xbf16>
    %cst_15 = arith.constant dense<0.000000e+00> : vector<128x1024xf32>
    %36 = tpu.matmul %34, %35, %cst_15 {dimension_numbers = #tpu.dot_dimension_numbers<[1], [0], [0], [1], [0, 0, 1, 1], [], []>} : vector<128x128xbf16>, vector<128x1024xbf16>, vector<128x1024xf32> -> vector<128x1024xf32>
    %c0_16 = arith.constant 0 : index
    %c0_17 = arith.constant 0 : index
    %37 = vector.load %arg8[%c0_16, %c0_17] : memref<1x1024xf32, #tpu.memory_space<vmem>>, vector<1x1024xf32>
    %38 = vector.broadcast %37 : vector<1x1024xf32> to vector<128x1024xf32>
    %39 = arith.addf %36, %38 : vector<128x1024xf32>
    %cst_18 = arith.constant dense<0xFF800000> : vector<1024xf32>
    %40 = vector.multi_reduction <maximumf>, %39, %cst_18 [0] : vector<128x1024xf32> to vector<1024xf32>
    %41 = vector.shape_cast %40 : vector<1024xf32> to vector<1x1024xf32>
    %c0_i32 = arith.constant 0 : i32
    %42 = arith.cmpi eq, %arg1, %c0_i32 : i32
    %43 = arith.extui %42 : i1 to i32
    %c0_i32_19 = arith.constant 0 : i32
    %44 = arith.cmpi ne, %43, %c0_i32_19 : i32
    scf.if %44 {
      %48 = vector.shape_cast %41 : vector<1x1024xf32> to vector<1x1x1024xf32>
      %c0_22 = arith.constant 0 : index
      %c0_23 = arith.constant 0 : index
      %c0_24 = arith.constant 0 : index
      %49 = vector.load %arg9[%c0_22, %c0_23, %c0_24] : memref<1x1x1024xf32, #tpu.memory_space<vmem>>, vector<1x1x1024xf32>
      tpu.vector_store %arg9[%c0_22, %c0_23, %c0_24], %48 {strides = array<i32>} : memref<1x1x1024xf32, #tpu.memory_space<vmem>>, vector<1x1x1024xf32>,
    } else {
    }
    %c0_i32_20 = arith.constant 0 : i32
    %45 = arith.cmpi sgt, %arg1, %c0_i32_20 : i32
    %46 = arith.extui %45 : i1 to i32
    %c0_i32_21 = arith.constant 0 : i32
    %47 = arith.cmpi ne, %46, %c0_i32_21 : i32
    scf.if %47 {
      %c0_22 = arith.constant 0 : index
      %c0_23 = arith.constant 0 : index
      %c0_24 = arith.constant 0 : index
      %48 = vector.load %arg9[%c0_22, %c0_23, %c0_24] : memref<1x1x1024xf32, #tpu.memory_space<vmem>>, vector<1x1x1024xf32>
      %49 = vector.shape_cast %41 : vector<1x1024xf32> to vector<1x1x1024xf32>
      %50 = arith.maximumf %48, %49 : vector<1x1x1024xf32>
      %c0_25 = arith.constant 0 : index
      %c0_26 = arith.constant 0 : index
      %c0_27 = arith.constant 0 : index
      %51 = vector.load %arg9[%c0_25, %c0_26, %c0_27] : memref<1x1x1024xf32, #tpu.memory_space<vmem>>, vector<1x1x1024xf32>
      tpu.vector_store %arg9[%c0_25, %c0_26, %c0_27], %50 {strides = array<i32>} : memref<1x1x1024xf32, #tpu.memory_space<vmem>>, vector<1x1x1024xf32>,
    } else {
    }
    return
  }
  func.func @transform_0(%arg0: i32, %arg1: i32) -> (i32, i32, i32) {
    %c0_i32 = arith.constant 0 : i32
    %c0_i32_0 = arith.constant 0 : i32
    return %arg0, %arg1, %c0_i32 : i32, i32, i32
  }
  func.func @transform_1(%arg0: i32, %arg1: i32) -> (i32, i32, i32) {
    %c0_i32 = arith.constant 0 : i32
    %c0_i32_0 = arith.constant 0 : i32
    %c0_i32_1 = arith.constant 0 : i32
    return %arg0, %c0_i32, %c0_i32_0 : i32, i32, i32
  }
  func.func @transform_2(%arg0: i32, %arg1: i32) -> (i32, i32) {
    %c0_i32 = arith.constant 0 : i32
    %c0_i32_0 = arith.constant 0 : i32
    %c0_i32_1 = arith.constant 0 : i32
    return %c0_i32, %c0_i32_0 : i32, i32
  }
  func.func @transform_3(%arg0: i32, %arg1: i32) -> (i32, i32) {
    %c0_i32 = arith.constant 0 : i32
    %c0_i32_0 = arith.constant 0 : i32
    %c0_i32_1 = arith.constant 0 : i32
    return %c0_i32, %c0_i32_0 : i32, i32
  }
  func.func @transform_4(%arg0: i32, %arg1: i32) -> (i32, i32) {
    %c0_i32 = arith.constant 0 : i32
    %c0_i32_0 = arith.constant 0 : i32
    %c0_i32_1 = arith.constant 0 : i32
    return %c0_i32, %c0_i32_0 : i32, i32
  }
  func.func @transform_5(%arg0: i32, %arg1: i32) -> (i32, i32) {
    %c0_i32 = arith.constant 0 : i32
    %c0_i32_0 = arith.constant 0 : i32
    %c0_i32_1 = arith.constant 0 : i32
    return %c0_i32, %c0_i32_0 : i32, i32
  }
  func.func @transform_6(%arg0: i32, %arg1: i32) -> (i32, i32) {
    %c0_i32 = arith.constant 0 : i32
    %c0_i32_0 = arith.constant 0 : i32
    %c0_i32_1 = arith.constant 0 : i32
    return %c0_i32, %c0_i32_0 : i32, i32
  }
  func.func @transform_7(%arg0: i32, %arg1: i32) -> (i32, i32, i32) {
    %c0_i32 = arith.constant 0 : i32
    %c0_i32_0 = arith.constant 0 : i32
    %c0_i32_1 = arith.constant 0 : i32
    return %arg0, %c0_i32, %c0_i32_0 : i32, i32, i32
  }
}

</mosaic_0001>

<bundles_post_ra>
// kernel: pointnetfeat_forward.5
= control target key start
LH: loop header
LB: loop body
LE: loop exit
PB: predicated region body
PF: predicated region fallthrough
CT: control target
= control target key end

     0   :  { %s2431_s24 = smov 0   ;;  %s2433_s25 = smov 0   ;;  %s3191_s0 = inlined_call_operand.vmem [shape: f32[2,256,3], index: 0, kind: input, shape index: {}]   ;;  %s3192_s1 = inlined_call_operand.vmem [shape: f32[2,3,64], index: 1, kind: input, shape index: {}]   ;;  %s3193_s2 = inlined_call_operand.vmem [shape: f32[1,64], index: 2, kind: input, shape index: {}]   ;;  %s3194_s3 = inlined_call_operand.vmem [shape: bf16[64,128], index: 3, kind: input, shape index: {}]   ;;  %s3195_s4 = inlined_call_operand.vmem [shape: f32[1,128], index: 4, kind: input, shape index: {}]   ;;  %s3196_s5 = inlined_call_operand.vmem [shape: bf16[128,1024], index: 5, kind: input, shape index: {}]   ;;  %s3197_s6 = inlined_call_operand.vmem [shape: f32[1,1024], index: 6, kind: input, shape index: {}]   ;;  %s3198_s7 = inlined_call_operand.vmem [shape: f32[2,1,1024], index: 7, kind: output, shape index: {}]  }
   0x1   :  { %s2435_s26 = smov 0   ;;  %s2437_s27 = smov 0  }
   0x2   :  { %s2439_s28 = smov 0  }
   0x3 LB: > { %s26_s29 = sadd.s32 1, %s2376_s26  ;;  %s29_s30 = sadd.s32 1, %s2380_s27  ;;  %s2384_s28 = sphi %s2439_s28, %s17_s28   ;;  %s2380_s27 = sphi %s2437_s27, %s3202_s27   ;;  %s2376_s26 = sphi %s2435_s26, %s3201_s26   ;;  %s2372_s25 = sphi %s2433_s25, %s3200_s25   ;;  %s2368_s24 = sphi %s2431_s24, %s3199_s24  }
   0x4   : > { %p27_p0 = scmp.ge.s32.totalorder %s26_s29, 2  ;;  %p2132_p1 = scmp.ge.s32.totalorder %s2384_s28, 1 }
   0x5   : > { %p265_p2 = scmp.lt.s32.totalorder %s2384_s28, 5 }
   0x6   : > { %s3204_s29 = smov (%p27_p0, %s26_s29), 0  ;;  %s3206_s30 = smov (!%p27_p0, %s29_s30), %s2380_s27 }
   0x7   : > { %p266_p3 = pnand %p2132_p1, %p265_p2  ;;  %p31_p4 = scmp.ge.s32.totalorder %s3206_s30, 2 }
   0x8   : > { %s2133_s8 = sshll.u32 (!%p266_p3), %s2368_s24, 4  ;;  %p305_p5 = scmp.lt.s32.totalorder (!%p266_p3), %s2372_s25, 1  ;;  %v2386_v0 = vmov (!%p266_p3), 1   ;;  %v2387_v1 = vmov (!%p266_p3), 0   ;;  %v2388_v7 = vmov (!%p266_p3), 2   ;;  %v2342_v9 = vld [vmem:[%s3194_s3] sm:$0xff] (!%p266_p3)   ;;  %v420_v25 = vlaneseq (!%p266_p3) }
   0x9   : > { %s3208_s30 = smov (%p31_p4, %s3206_s30), 0  ;;  %269 = sbr.rel (%p266_p3) target bundleno = 852 (0x354), region = 48 }
   0xa   : > { %2318 = vset.pattern.permute.xlu1 (!%p266_p3), %v2386_v0  ;;  %2317 = vset.pattern.permute.xlu0 (!%p266_p3), %v2387_v1  ;;  %p307_p6 = scmp.lt.s32.totalorder (!%p266_p3), %s2133_s8, 31  ;;  %v2343_v10 = vld [vmem:[%s3194_s3 + $0x8] sm:$0xff] (!%p266_p3)   ;;  %v2344_v12 = vld [vmem:[%s3194_s3 + $0x10] sm:$0xff] (!%p266_p3)   ;;  %v2345_v14 = vld [vmem:[%s3194_s3 + $0x18] sm:$0xff] (!%p266_p3)   ;;  %v2533_v28 = vshrl.u32 (!%p266_p3), %v420_v25, 7  ;;  %vm726_vm0 = vcmask (!%p266_p3), 523264  }
   0xb   : > { %1330 = vmatprep.mubr.bf16.mxu1 (!%p266_p3), %v2387_v1  ;;  %2232 = vmatprep.subr.bf16.mxu0 (!%p266_p3), %v2342_v9  ;;  %v872_v36 = vld [vmem:[%s3196_s5] sm:$0xff] (!%p266_p3)  ;;  %v2550_v38 = vld [vmem:[%s3196_s5 + $0x8] sm:$0xff] (!%p266_p3)  ;;  %p2216_p7 = scmp.ne.s32.totalorder (!%p266_p3), %s2368_s24, 0 }
   0xc   : > { %2233 = vmatpush3.bf16.msra.mxu0 (!%p266_p3), %v2342_v9  ;;  %v422_v31 = vsub.s32 (!%p266_p3), 0, %v2533_v28  ;;  %v506_v32 = vsub.s32 (!%p266_p3), 1, %v2533_v28  ;;  %v606_v34 = vsub.s32 (!%p266_p3), 2, %v2533_v28  ;;  %v876_v37 = vld [vmem:[%s3196_s5 + $0x20] sm:$0xff] (!%p266_p3)  ;;  %v2555_v41 = vld [vmem:[%s3196_s5 + $0x28] sm:$0xff] (!%p266_p3) }
   0xd   : > { %2234 = vmatprep.subr.bf16.mxu0 (!%p266_p3), %v2343_v10  ;;  %v2153_v40 = vcombine.high (!%p266_p3), %v872_v36, %v876_v37  ;;  %v2152_v42 = vcombine.low (!%p266_p3), %v872_v36, %v876_v37  ;;  %v880_v43 = vld [vmem:[%s3196_s5 + $0x40] sm:$0xff] (!%p266_p3)  ;;  %v2155_v47 = vcombine.high (!%p266_p3), %v2550_v38, %v2555_v41 }
   0xe   : > { %v884_v44 = vld [vmem:[%s3196_s5 + $0x60] sm:$0xff] (!%p266_p3) }
   0xf   : > { %v2161_v48 = vcombine.high (!%p266_p3), %v880_v43, %v884_v44  ;;  %v888_v49 = vld [vmem:[%s3196_s5 + $0x80] sm:$0xff] (!%p266_p3)  ;;  %1298 = vmatprep.subr.bf16.mxu1 (!%p266_p3), %v2153_v40  ;;  %v2160_v53 = vcombine.low (!%p266_p3), %v880_v43, %v884_v44  ;;  %v881_v44 = vld [vmem:[%s3196_s5 + $0x48] sm:$0xff] (!%p266_p3) }
  0x10   : > { %s3210_s25 = smov (!%p305_p5, %s2372_s25), 1  ;;  %s3212_s8 = smov (!%p307_p6, %s2133_s8), 31  ;;  %2235 = vmatpush3.bf16.msra.mxu0 %v2343_v10  ;;  %v892_v50 = vld [vmem:[%s3196_s5 + $0xa0] sm:$0xff]  ;;  %1299 = vmatpush1.bf16.msra.mxu1 %v2152_v42 }
  0x11   : > { %s2134_s9 = sshll.u32 %s3210_s25, 5  ;;  %s2137_s12 = sshll.u32 %s3210_s25, 3  ;;  %2236 = vmatprep.subr.bf16.mxu0 %v2344_v12  ;;  %1300 = vmatprep.subr.bf16.mxu1 %v2161_v48  ;;  %v2169_v56 = vcombine.high %v888_v49, %v892_v50  ;;  %v896_v60 = vld [vmem:[%s3196_s5 + $0xc0] sm:$0xff] }
  0x12   : > { %s310_s10 = sadd.s32 %s2134_s9, %s3212_s8  ;;  %s2479_s18 = scalar_lea.vmem %s3198_s7, %s2137_s12  ;;  %v900_v61 = vld [vmem:[%s3196_s5 + $0xe0] sm:$0xff] }
  0x13   : > { %s2135_s11 = sshll.u32 %s310_s10, 3  ;;  %v908_v9 = vld [vmem:[%s3196_s5 + $0x120] sm:$0xff] }
  0x14   : > { %s2474_s15 = scalar_lea.vmem %s3191_s0, %s2135_s11  ;;  %2237 = vmatpush3.bf16.msra.mxu0 %v2344_v12  ;;  %s2136_s11 = sshll.u32 %s3210_s25, 2  ;;  %1301 = vmatpush1.bf16.msra.mxu1 %v2160_v53 }
  0x15   : > { %v323_v2 = vld [vmem:[%s2474_s15] sm:$0xff]  ;;  %v324_v3 = vld [vmem:[%s2474_s15 + $0x8] sm:$0xff]  ;;  %v325_v4 = vld [vmem:[%s2474_s15 + $0x10] sm:$0xff]  ;;  %2238 = vmatprep.subr.bf16.mxu0 %v2345_v14  ;;  %s317_s14 = scalar_lea.vmem %s3192_s1, %s2136_s11  ;;  %1302 = vmatprep.subr.bf16.mxu1 %v2169_v56 }
  0x16   : > { %441 = vperm.xlu1 %2318, %v323_v2   ;;  %342 = vperm.xlu0 %2317, %v323_v2   ;;  %v326_v5 = vld [vmem:[%s2474_s15 + $0x18] sm:$0xff]  ;;  %v328_v6 = vld [vmem:[%s2474_s15 + $0x28] sm:$0xff]  ;;  %v329_v8 = vld [vmem:[%s2474_s15 + $0x30] sm:$0xff] }
  0x17   : > { %v327_v11 = vld [vmem:[%s2474_s15 + $0x20] sm:$0xff]  ;;  %v330_v13 = vld [vmem:[%s2474_s15 + $0x38] sm:$0xff]  ;;  %v332_v15 = vld [vmem:[%s2474_s15 + $0x48] sm:$0xff] }
  0x18   : > { %2239 = vmatpush3.bf16.msra.mxu0 %v2345_v14  ;;  %v333_v16 = vld [vmem:[%s2474_s15 + $0x50] sm:$0xff]  ;;  %v335_v17 = vld [vmem:[%s2474_s15 + $0x60] sm:$0xff]  ;;  %v336_v18 = vld [vmem:[%s2474_s15 + $0x68] sm:$0xff] }
  0x19   : > { %v331_v19 = vld [vmem:[%s2474_s15 + $0x40] sm:$0xff]  ;;  %v337_v20 = vld [vmem:[%s2474_s15 + $0x70] sm:$0xff]  ;;  %v334_v21 = vld [vmem:[%s2474_s15 + $0x58] sm:$0xff]  ;;  %1411 = vmatprep.subr.bf16.mxu0 %v2155_v47 }
  0x1a   : > { %445 = vperm.xlu1 %2318, %v324_v3   ;;  %347 = vperm.xlu0 %2317, %v324_v3   ;;  %v338_v22 = vld [vmem:[%s2474_s15 + $0x78] sm:$0xff]  ;;  %v339_v33 = vld [vmem:[%s317_s14] sm:$0x7]  ;;  %v885_v47 = vld [vmem:[%s3196_s5 + $0x68] sm:$0xff] }
  0x1b   : > { %v2565_v45 = vrot.slane %v339_v33, %v422_v31  ;;  %v2569_v46 = vrot.slane %v339_v33, %v506_v32  ;;  %v2581_v51 = vrot.slane %v339_v33, %v606_v34 }
  0x1e   : > { %2319 = vset.pattern.permute.xlu1 %v2387_v1  ;;  %352 = vperm.xlu0 %2317, %v325_v4  }
  0x1f   : > { %357 = vperm.xlu1 %2319, %v326_v5  }
  0x22   : > { %2320 = vset.pattern.permute.xlu0 %v2386_v0 }
  0x23   : > { %2321 = vset.pattern.permute.xlu1 %v2386_v0  ;;  %449 = vperm.xlu0 %2320, %v325_v4  }
  0x24   : > { %453 = vperm.xlu1 %2321, %v326_v5  }
  0x27   : > { %461 = vperm.xlu0 %2320, %v328_v6  }
  0x28   : > { %2322 = vset.pattern.permute.xlu1 %v2388_v7 }
  0x29   : > { %541 = vperm.xlu1 %2322, %v323_v2  }
  0x2b   : > { %465 = vperm.xlu0 %2320, %v329_v8  }
  0x2d   : > { %549 = vperm.xlu1 %2322, %v325_v4  }
  0x2f   : > { %2326 = vset.pattern.permute.xlu0 %v2388_v7 }
  0x30   : > { %545 = vperm.xlu0 %2326, %v324_v3   ;;  %v2177_v3 = vcombine.high %v896_v60, %v900_v61 }
  0x31   : > { %553 = vperm.xlu1 %2322, %v326_v5  }
  0x34   : > { %557 = vperm.xlu0 %2326, %v327_v11  }
  0x35   : > { %2323 = vset.pattern.permute.xlu1 %v2387_v1 }
  0x36   : > { %367 = vperm.xlu1 %2323, %v328_v6  }
  0x38   : > { %569 = vperm.xlu0 %2326, %v330_v13  }
  0x3a   : > { %2324 = vset.pattern.permute.xlu1 %v2386_v0 }
  0x3b   : > { %457 = vperm.xlu1 %2324, %v327_v11  }
  0x3c   : > { %577 = vperm.xlu0 %2326, %v332_v15  }
  0x3f   : > { %2325 = vset.pattern.permute.xlu1 %v2387_v1 }
  0x40   : > { %372 = vperm.xlu1 %2325, %v329_v8   ;;  %2334 = vset.pattern.permute.xlu0 %v2387_v1 }
  0x41   : > { %362 = vperm.xlu0 %2334, %v327_v11  }
  0x44   : > { %377 = vperm.xlu1 %2325, %v330_v13  }
  0x45   : > { %387 = vperm.xlu0 %2334, %v332_v15  }
  0x48   : > { %2327 = vset.pattern.permute.xlu1 %v2386_v0 }
  0x49   : > { %469 = vperm.xlu1 %2327, %v330_v13   ;;  %392 = vperm.xlu0 %2334, %v333_v16   ;;  %v2176_v13 = vcombine.low %v896_v60, %v900_v61  ;;  %v893_v60 = vld [vmem:[%s3196_s5 + $0xa8] sm:$0xff] }
  0x4d   : > { %2328 = vset.pattern.permute.xlu1 %v2388_v7  ;;  %402 = vperm.xlu0 %2334, %v335_v17  }
  0x4e   : > { %561 = vperm.xlu1 %2328, %v328_v6  }
  0x51   : > { %2335 = vset.pattern.permute.xlu0 %v2386_v0 }
  0x52   : > { %565 = vperm.xlu1 %2328, %v329_v8   ;;  %481 = vperm.xlu0 %2335, %v333_v16   ;;  %v904_v8 = vld [vmem:[%s3196_s5 + $0x100] sm:$0xff] }
  0x56   : > { %2329 = vset.pattern.permute.xlu1 %v2387_v1  ;;  %493 = vperm.xlu0 %2335, %v336_v18  }
  0x57   : > { %382 = vperm.xlu1 %2329, %v331_v19  }
  0x5a   : > { %497 = vperm.xlu0 %2335, %v337_v20  }
  0x5b   : > { %2330 = vset.pattern.permute.xlu1 %v2386_v0 }
  0x5c   : > { %473 = vperm.xlu1 %2330, %v331_v19  }
  0x5e   : > { %2340 = vset.pattern.permute.xlu0 %v2388_v7 }
  0x5f   : > { %589 = vperm.xlu0 %2340, %v335_v17  }
  0x60   : > { %477 = vperm.xlu1 %2330, %v332_v15   ;;  %v2612_v15 = vld [vmem:[%s3193_s2] ss:$0 sm:$0xff] }
  0x63   : > { %601 = vperm.xlu0 %2340, %v338_v22  }
  0x64   : > { %2331 = vset.pattern.permute.xlu1 %v2387_v1 }
  0x65   : > { %397 = vperm.xlu1 %2331, %v334_v21  }
  0x69   : > { %2332 = vset.pattern.permute.xlu1 %v2386_v0 }
  0x6a   : > { %485 = vperm.xlu1 %2332, %v334_v21  }
  0x6e   : > { %2333 = vset.pattern.permute.xlu1 %v2388_v7 }
  0x6f   : > { %573 = vperm.xlu1 %2333, %v331_v19  }
  0x73   : > { %581 = vperm.xlu1 %2333, %v333_v16  }
  0x77   : > { %585 = vperm.xlu1 %2333, %v334_v21  }
  0x7b   : > { %2336 = vset.pattern.permute.xlu1 %v2387_v1 }
  0x7c   : > { %407 = vperm.xlu1 %2336, %v336_v18  }
  0x80   : > { %2337 = vset.pattern.permute.xlu1 %v2386_v0 }
  0x81   : > { %489 = vperm.xlu1 %2337, %v335_v17  }
  0x85   : > { %2338 = vset.pattern.permute.xlu1 %v2387_v1 }
  0x86   : > { %412 = vperm.xlu1 %2338, %v337_v20  }
  0x8a   : > { %417 = vperm.xlu1 %2338, %v338_v22  }
  0x8e   : > { %2339 = vset.pattern.permute.xlu1 %v2386_v0  ;;  %v2168_v0 = vcombine.low %v888_v49, %v892_v50 }
  0x8f   : > { %501 = vperm.xlu1 %2339, %v338_v22   ;;  %v912_v22 = vld [vmem:[%s3196_s5 + $0x140] sm:$0xff] }
  0x90   : > { %1303 = vmatpush1.bf16.msra.mxu1 %v2168_v0  ;;  %v901_v0 = vld [vmem:[%s3196_s5 + $0xe8] sm:$0xff] }
  0x91   : > { %1304 = vmatprep.subr.bf16.mxu1 %v2177_v3 }
  0x93   : > { %2341 = vset.pattern.permute.xlu1 %v2388_v7 }
  0x94   : > { %593 = vperm.xlu1 %2341, %v336_v18   ;;  %v2185_v18 = vcombine.high %v904_v8, %v908_v9  ;;  %1305 = vmatpush1.bf16.msra.mxu1 %v2176_v13  ;;  %v913_v13 = vld [vmem:[%s3196_s5 + $0x148] sm:$0xff] }
  0x95   : > { %v442_v23 = vpop.permute.xlu1 %441  ;;  %v343_v24 = vpop.permute.xlu0 %342 }
  0x96   : > { %v508_v57 = vmul.f32 %v2569_v46, %v442_v23  ;;  %v424_v58 = vmul.f32 %v2565_v45, %v343_v24  ;;  %v916_v23 = vld [vmem:[%s3196_s5 + $0x160] sm:$0xff]  ;;  %1306 = vmatprep.subr.bf16.mxu1 %v2185_v18 }
  0x97   : > { %v2193_v36 = vcombine.high %v912_v22, %v916_v23  ;;  %v2192_v48 = vcombine.low %v912_v22, %v916_v23 }
  0x98   : > { %597 = vperm.xlu1 %2341, %v337_v20   ;;  %v524_v4 = vadd.f32 %v508_v57, %v424_v58  ;;  %v2163_v57 = vcombine.high %v881_v44, %v885_v47 }
  0x99   : > { %v446_v26 = vpop.permute.xlu1 %445  ;;  %v348_v27 = vpop.permute.xlu0 %347 }
  0x9a   : > { %v509_v5 = vmul.f32 %v2569_v46, %v446_v26  ;;  %v425_v6 = vmul.f32 %v2565_v45, %v348_v27 }
  0x9c   : > { %v525_v19 = vadd.f32 %v509_v5, %v425_v6  ;;  %v905_v6 = vld [vmem:[%s3196_s5 + $0x108] sm:$0xff] }
  0x9d   : > { %v353_v29 = vpop.permute.xlu0 %352 }
  0x9e   : > { %v358_v30 = vpop.permute.xlu1 %357  ;;  %v426_v54 = vmul.f32 %v2565_v45, %v353_v29  ;;  %v2184_v29 = vcombine.low %v904_v8, %v908_v9 }
  0x9f   : > { %v427_v14 = vmul.f32 %v2565_v45, %v358_v30 }
  0xa0   : > { %1307 = vmatpush1.bf16.msra.mxu1 %v2184_v29 }
  0xa1   : > { %1308 = vmatprep.subr.bf16.mxu1 %v2193_v36 }
  0xa2   : > { %v450_v35 = vpop.permute.xlu0 %449 }
  0xa3   : > { %v454_v39 = vpop.permute.xlu1 %453  ;;  %v510_v55 = vmul.f32 %v2569_v46, %v450_v35 }
  0xa4   : > { %v511_v10 = vmul.f32 %v2569_v46, %v454_v39  ;;  %1309 = vmatpush1.bf16.msra.mxu1 %v2192_v48 }
  0xa5   : > { %v526_v2 = vadd.f32 %v510_v55, %v426_v54  ;;  %v2154_v55 = vcombine.low %v2550_v38, %v2555_v41  ;;  %v2162_v38 = vcombine.low %v881_v44, %v885_v47 }
  0xa6   : > { %v2583_v52 = vpop.permute.xlu0 %461  ;;  %v527_v24 = vadd.f32 %v511_v10, %v427_v14  ;;  %v917_v14 = vld [vmem:[%s3196_s5 + $0x168] sm:$0xff] }
  0xa7   : > { %v513_v22 = vmul.f32 %v2569_v46, %v2583_v52  ;;  %v2194_v29 = vcombine.low %v913_v13, %v917_v14 }
  0xa8   : > { %v542_v59 = vpop.permute.xlu1 %541 }
  0xa9   : > { %v608_v62 = vmul.f32 %v2581_v51, %v542_v59  ;;  %v889_v59 = vld [vmem:[%s3196_s5 + $0x88] sm:$0xff] }
  0xaa   : > { %v2596_v63 = vpop.permute.xlu0 %465  ;;  %v2171_v41 = vcombine.high %v889_v59, %v893_v60  ;;  %v2170_v3 = vcombine.low %v889_v59, %v893_v60 }
  0xab   : > { %v624_v12 = vadd.f32 %v608_v62, %v524_v4  ;;  %v897_v62 = vld [vmem:[%s3196_s5 + $0xc8] sm:$0xff] }
  0xac   : > { %v550_v7 = vpop.permute.xlu1 %549  ;;  %v2179_v5 = vcombine.high %v897_v62, %v901_v0  ;;  %v2178_v10 = vcombine.low %v897_v62, %v901_v0 }
  0xad   : > { %v610_v11 = vmul.f32 %v2581_v51, %v550_v7  ;;  %v647_v27 = vadd.f32 %v2612_v15, %v624_v12  ;;  %v909_v7 = vld [vmem:[%s3196_s5 + $0x128] sm:$0xff] }
  0xaf   : > { %v626_v16 = vadd.f32 %v610_v11, %v526_v2  ;;  %v546_v17 = vpop.permute.xlu0 %545  ;;  %v663_v42 = vmax.f32 %v647_v27, 0.0  ;;  %v2187_v11 = vcombine.high %v905_v6, %v909_v7 }
  0xb0   : > { %v609_v20 = vmul.f32 %v2581_v51, %v546_v17  ;;  %v554_v21 = vpop.permute.xlu1 %553 }
  0xb1   : > { %v611_v25 = vmul.f32 %v2581_v51, %v554_v21  ;;  %v649_v30 = vadd.f32 %v2612_v15, %v626_v16  ;;  %v2195_v21 = vcombine.high %v913_v13, %v917_v14 }
  0xb2   : > { %v625_v26 = vadd.f32 %v609_v20, %v525_v19  ;;  %v2186_v19 = vcombine.low %v905_v6, %v909_v7 }
  0xb3   : > { %v627_v33 = vadd.f32 %v611_v25, %v527_v24  ;;  %v558_v35 = vpop.permute.xlu0 %557  ;;  %v665_v49 = vmax.f32 %v649_v30, 0.0 }
  0xb4   : > { %v648_v37 = vadd.f32 %v2612_v15, %v625_v26  ;;  %v612_v16 = vmul.f32 %v2581_v51, %v558_v35 }
  0xb5   : > { %v650_v39 = vadd.f32 %v2612_v15, %v627_v33  ;;  %v368_v40 = vpop.permute.xlu1 %367  ;;  %v514_v33 = vmul.f32 %v2569_v46, %v2596_v63 }
  0xb6   : > { %v664_v43 = vmax.f32 %v648_v37, 0.0  ;;  %v429_v23 = vmul.f32 %v2565_v45, %v368_v40 }
  0xb7   : > { %v666_v50 = vmax.f32 %v650_v39, 0.0  ;;  %v570_v53 = vpop.permute.xlu0 %569 }
  0xb8   : > { %v679_v54 = vpack.c.bf16 %v664_v43, %v663_v42  ;;  %v615_v25 = vmul.f32 %v2581_v51, %v570_v53  ;;  %v529_v35 = vadd.f32 %v513_v22, %v429_v23 }
  0xb9   : > { %v680_v56 = vpack.c.bf16 %v666_v50, %v665_v49 }
  0xba   : > { %v458_v58 = vpop.permute.xlu1 %457  ;;  %2240 = vmatprep.mubr.msk.bf16.mxu0 %vm726_vm0, %v679_v54 }
  0xbb   : > { %2241 = vmatmul.mubr.msk.bf16.vlgmr.msra.gmra.mrb[0].mxu0 %vm726_vm0, %v680_v56  ;;  %v2642_v61 = vpop.permute.xlu0 %577  ;;  %v512_v12 = vmul.f32 %v2569_v46, %v458_v58 }
  0xbc   : > { %1412 = vmatpush1.bf16.msra.mxu0 %v2154_v55 }
  0xbd   : > { %1413 = vmatprep.subr.bf16.mxu0 %v2163_v57 }
  0xbf   : > { %v373_v2 = vpop.permute.xlu1 %372 }
  0xc0   : > { %1414 = vmatpush1.bf16.msra.mxu0 %v2162_v38  ;;  %v363_v4 = vpop.permute.xlu0 %362  ;;  %v430_v36 = vmul.f32 %v2565_v45, %v373_v2 }
  0xc1   : > { %1415 = vmatprep.subr.bf16.mxu0 %v2171_v41  ;;  %v428_v9 = vmul.f32 %v2565_v45, %v363_v4  ;;  %v617_v4 = vmul.f32 %v2581_v51, %v2642_v61 }
  0xc2   : > { %v530_v43 = vadd.f32 %v514_v33, %v430_v36 }
  0xc3   : > { %v378_v8 = vpop.permute.xlu1 %377  ;;  %v528_v17 = vadd.f32 %v512_v12, %v428_v9 }
  0xc4   : > { %1416 = vmatpush1.bf16.msra.mxu0 %v2170_v3  ;;  %v431_v24 = vmul.f32 %v2565_v45, %v378_v8  ;;  %v388_v59 = vpop.permute.xlu0 %387 }
  0xc5   : > { %1417 = vmatprep.subr.bf16.mxu0 %v2179_v5  ;;  %v628_v26 = vadd.f32 %v612_v16, %v528_v17  ;;  %v433_v3 = vmul.f32 %v2565_v45, %v388_v59 }
  0xc7   : > { %v651_v37 = vadd.f32 %v2612_v15, %v628_v26 }
  0xc8   : > { %v470_v18 = vpop.permute.xlu1 %469  ;;  %1418 = vmatpush1.bf16.msra.mxu0 %v2178_v10  ;;  %v393_v38 = vpop.permute.xlu0 %392 }
  0xc9   : > { %v515_v20 = vmul.f32 %v2569_v46, %v470_v18  ;;  %1419 = vmatprep.subr.bf16.mxu0 %v2187_v11  ;;  %v667_v48 = vmax.f32 %v651_v37, 0.0  ;;  %v434_v11 = vmul.f32 %v2565_v45, %v393_v38  ;;  %v925_v38 = vld [vmem:[%s3196_s5 + $0x1a8] sm:$0xff] }
  0xcb   : > { %v531_v27 = vadd.f32 %v515_v20, %v431_v24 }
  0xcc   : > { %1420 = vmatpush1.bf16.msra.mxu0 %v2186_v19  ;;  %v403_v0 = vpop.permute.xlu0 %402 }
  0xcd   : > { %v562_v30 = vpop.permute.xlu1 %561  ;;  %1421 = vmatprep.subr.bf16.mxu0 %v2195_v21  ;;  %v631_v39 = vadd.f32 %v615_v25, %v531_v27 }
  0xce   : > { %v613_v52 = vmul.f32 %v2581_v51, %v562_v30 }
  0xcf   : > { %v654_v49 = vadd.f32 %v2612_v15, %v631_v39 }
  0xd0   : > { %v629_v40 = vadd.f32 %v613_v52, %v529_v35  ;;  %1422 = vmatpush1.bf16.msra.mxu0 %v2194_v29 }
  0xd1   : > { %v566_v42 = vpop.permute.xlu1 %565  ;;  %v670_v56 = vmax.f32 %v654_v49, 0.0  ;;  %v482_v7 = vpop.permute.xlu0 %481 }
  0xd2   : > { %v652_v44 = vadd.f32 %v2612_v15, %v629_v40  ;;  %v614_v47 = vmul.f32 %v2581_v51, %v566_v42  ;;  %v518_v12 = vmul.f32 %v2569_v46, %v482_v7  ;;  %v928_v7 = vld [vmem:[%s3196_s5 + $0x1c0] sm:$0xff] }
  0xd4   : > { %v668_v63 = vmax.f32 %v652_v44, 0.0  ;;  %v630_v50 = vadd.f32 %v614_v47, %v530_v43  ;;  %v534_v61 = vadd.f32 %v518_v12, %v434_v11 }
  0xd5   : > { %v494_v43 = vpop.permute.xlu0 %493 }
  0xd6   : > { %v681_v53 = vpack.c.bf16 %v668_v63, %v667_v48  ;;  %v653_v54 = vadd.f32 %v2612_v15, %v630_v50  ;;  %v383_v55 = vpop.permute.xlu1 %382 }
  0xd7   : > { %v432_v9 = vmul.f32 %v2565_v45, %v383_v55  ;;  %v924_v55 = vld [vmem:[%s3196_s5 + $0x1a0] sm:$0xff] }
  0xd8   : > { %v669_v57 = vmax.f32 %v653_v54, 0.0  ;;  %2244 = vmatprep.mubr.msk.bf16.mxu0 %vm726_vm0, %v681_v53  ;;  %v436_v53 = vmul.f32 %v2565_v45, %v403_v0  ;;  %v920_v54 = vld [vmem:[%s3196_s5 + $0x180] sm:$0xff] }
  0xd9   : > { %v498_v47 = vpop.permute.xlu0 %497 }
  0xda   : > { %v682_v58 = vpack.c.bf16 %v670_v56, %v669_v57  ;;  %v921_v56 = vld [vmem:[%s3196_s5 + $0x188] sm:$0xff] }
  0xdb   : > { %v474_v60 = vpop.permute.xlu1 %473  ;;  %v2202_v0 = vcombine.low %v921_v56, %v925_v38 }
  0xdc   : > { %2245 = vmatmul.mubr.msk.bf16.gmra.mrb[4].mxu0 %vm726_vm0, %v682_v58  ;;  %v516_v8 = vmul.f32 %v2569_v46, %v474_v60  ;;  %v2201_v60 = vcombine.high %v920_v54, %v924_v55 }
  0xde   : > { %v532_v14 = vadd.f32 %v516_v8, %v432_v9  ;;  %v590_v50 = vpop.permute.xlu0 %589  ;;  %1310 = vmatprep.subr.bf16.mxu1 %v2201_v60  ;;  %v932_v8 = vld [vmem:[%s3196_s5 + $0x1e0] sm:$0xff]  ;;  %v929_v9 = vld [vmem:[%s3196_s5 + $0x1c8] sm:$0xff] }
  0xdf   : > { %v478_v41 = vpop.permute.xlu1 %477  ;;  %v620_v58 = vmul.f32 %v2581_v51, %v590_v50 }
  0xe0   : > { %v517_v2 = vmul.f32 %v2569_v46, %v478_v41 }
  0xe2   : > { %v533_v5 = vadd.f32 %v517_v2, %v433_v3  ;;  %v2203_v2 = vcombine.high %v921_v56, %v925_v38  ;;  %v2200_v3 = vcombine.low %v920_v54, %v924_v55  ;;  %v882_v38 = vld [vmem:[%s3196_s5 + $0x50] sm:$0xff] }
  0xe4   : > { %v398_v62 = vpop.permute.xlu1 %397  ;;  %v633_v10 = vadd.f32 %v617_v4, %v533_v5  ;;  %v521_v4 = vmul.f32 %v2569_v46, %v494_v43  ;;  %1423 = vmatprep.subr.bf16.mxu0 %v2203_v2  ;;  %1311 = vmatpush1.bf16.msra.mxu1 %v2200_v3  ;;  %v883_v2 = vld [vmem:[%s3196_s5 + $0x58] sm:$0xff] }
  0xe5   : > { %v435_v24 = vmul.f32 %v2565_v45, %v398_v62  ;;  %v602_v62 = vpop.permute.xlu0 %601  ;;  %1424 = vmatpush1.bf16.msra.mxu0 %v2202_v0  ;;  %v886_v0 = vld [vmem:[%s3196_s5 + $0x70] sm:$0xff]  ;;  %v887_v3 = vld [vmem:[%s3196_s5 + $0x78] sm:$0xff] }
  0xe6   : > { %v656_v17 = vadd.f32 %v2612_v15, %v633_v10  ;;  %v623_v12 = vmul.f32 %v2581_v51, %v602_v62 }
  0xe8   : > { %v672_v23 = vmax.f32 %v656_v17, 0.0 }
  0xe9   : > { %v486_v6 = vpop.permute.xlu1 %485 }
  0xea   : > { %v519_v20 = vmul.f32 %v2569_v46, %v486_v6 }
  0xec   : > { %v535_v29 = vadd.f32 %v519_v20, %v435_v24  ;;  %v522_v20 = vmul.f32 %v2569_v46, %v498_v47  ;;  %v879_v47 = vld [vmem:[%s3196_s5 + $0x38] sm:$0xff] }
  0xee   : > { %v574_v13 = vpop.permute.xlu1 %573 }
  0xef   : > { %v616_v16 = vmul.f32 %v2581_v51, %v574_v13  ;;  %v2209_v13 = vcombine.high %v928_v7, %v932_v8 }
  0xf1   : > { %v632_v18 = vadd.f32 %v616_v16, %v532_v14  ;;  %v933_v14 = vld [vmem:[%s3196_s5 + $0x1e8] sm:$0xff]  ;;  %1312 = vmatprep.subr.bf16.mxu1 %v2209_v13  ;;  %v2164_v13 = vcombine.low %v882_v38, %v886_v0 }
  0xf2   : > { %v582_v19 = vpop.permute.xlu1 %581  ;;  %v2210_v17 = vcombine.low %v929_v9, %v933_v14 }
  0xf3   : > { %v655_v21 = vadd.f32 %v2612_v15, %v632_v18  ;;  %v618_v22 = vmul.f32 %v2581_v51, %v582_v19  ;;  %v2211_v18 = vcombine.high %v929_v9, %v933_v14  ;;  %v2789_v9 = vcombine.high %v883_v2, %v887_v3 }
  0xf4   : > { %v2805_v14 = vcombine.low %v883_v2, %v887_v3 }
  0xf5   : > { %v671_v25 = vmax.f32 %v655_v21, 0.0  ;;  %v634_v26 = vadd.f32 %v618_v22, %v534_v61  ;;  %v2208_v61 = vcombine.low %v928_v7, %v932_v8  ;;  %1425 = vmatprep.subr.bf16.mxu0 %v2211_v18  ;;  %v2165_v7 = vcombine.high %v882_v38, %v886_v0  ;;  %v890_v8 = vld [vmem:[%s3196_s5 + $0x90] sm:$0xff] }
  0xf6   : > { %v586_v27 = vpop.permute.xlu1 %585  ;;  %1426 = vmatpush1.bf16.msra.mxu0 %v2210_v17  ;;  %v898_v17 = vld [vmem:[%s3196_s5 + $0xd0] sm:$0xff] }
  0xf7   : > { %v683_v30 = vpack.c.bf16 %v672_v23, %v671_v25  ;;  %v619_v33 = vmul.f32 %v2581_v51, %v586_v27  ;;  %v657_v35 = vadd.f32 %v2612_v15, %v634_v26  ;;  %1313 = vmatpush1.bf16.msra.mxu1 %v2208_v61  ;;  %v902_v61 = vld [vmem:[%s3196_s5 + $0xf0] sm:$0xff] }
  0xf9   : > { %v635_v36 = vadd.f32 %v619_v33, %v535_v29  ;;  %2248 = vmatprep.mubr.msk.bf16.mxu0 %vm726_vm0, %v683_v30  ;;  %v673_v39 = vmax.f32 %v657_v35, 0.0 }
  0xfb   : > { %v658_v52 = vadd.f32 %v2612_v15, %v635_v36  ;;  %v408_v37 = vpop.permute.xlu1 %407 }
  0xfc   : > { %v437_v5 = vmul.f32 %v2565_v45, %v408_v37 }
  0xfd   : > { %v674_v40 = vmax.f32 %v658_v52, 0.0 }
  0xfe   : > { %v537_v19 = vadd.f32 %v521_v4, %v437_v5 }
  0xff   : > { %v684_v42 = vpack.c.bf16 %v674_v40, %v673_v39 }
 0x100   : > { %v490_v44 = vpop.permute.xlu1 %489 }
 0x101   : > { %2249 = vmatmul.mubr.msk.bf16.gmra.mrb[8].mxu0 %vm726_vm0, %v684_v42  ;;  %v520_v63 = vmul.f32 %v2569_v46, %v490_v44  ;;  %v878_v42 = vld [vmem:[%s3196_s5 + $0x30] sm:$0xff] }
 0x103   : > { %v536_v57 = vadd.f32 %v520_v63, %v436_v53 }
 0x105   : > { %v413_v48 = vpop.permute.xlu1 %412  ;;  %v636_v10 = vadd.f32 %v620_v58, %v536_v57 }
 0x106   : > { %v438_v21 = vmul.f32 %v2565_v45, %v413_v48 }
 0x107   : > { %v659_v23 = vadd.f32 %v2612_v15, %v636_v10  ;;  %v894_v10 = vld [vmem:[%s3196_s5 + $0xb0] sm:$0xff] }
 0x108   : > { %v538_v27 = vadd.f32 %v522_v20, %v438_v21  ;;  %v903_v20 = vld [vmem:[%s3196_s5 + $0xf8] sm:$0xff]  ;;  %v2172_v21 = vcombine.low %v890_v8, %v894_v10 }
 0x109   : > { %v418_v49 = vpop.permute.xlu1 %417  ;;  %v675_v33 = vmax.f32 %v659_v23, 0.0  ;;  %v2181_v23 = vcombine.high %v898_v17, %v902_v61 }
 0x10a   : > { %v439_v6 = vmul.f32 %v2565_v45, %v418_v49  ;;  %v2762_v49 = vld [vmem:[%s3195_s4] ss:$0 sm:$0xff] }
 0x10e   : > { %v502_v59 = vpop.permute.xlu1 %501 }
 0x10f   : > { %v523_v41 = vmul.f32 %v2569_v46, %v502_v59 }
 0x111   : > { %v539_v11 = vadd.f32 %v523_v41, %v439_v6 }
 0x113   : > { %v594_v16 = vpop.permute.xlu1 %593  ;;  %v639_v24 = vadd.f32 %v623_v12, %v539_v11  ;;  %v891_v11 = vld [vmem:[%s3196_s5 + $0x98] sm:$0xff] }
 0x114   : > { %v621_v22 = vmul.f32 %v2581_v51, %v594_v16  ;;  %v895_v12 = vld [vmem:[%s3196_s5 + $0xb8] sm:$0xff]  ;;  %v2173_v16 = vcombine.high %v890_v8, %v894_v10 }
 0x115   : > { %v662_v46 = vadd.f32 %v2612_v15, %v639_v24  ;;  %v2811_v18 = vcombine.high %v891_v11, %v895_v12  ;;  %v906_v24 = vld [vmem:[%s3196_s5 + $0x110] sm:$0xff] }
 0x116   : > { %v637_v25 = vadd.f32 %v621_v22, %v537_v19  ;;  %v899_v19 = vld [vmem:[%s3196_s5 + $0xd8] sm:$0xff]  ;;  %v2823_v22 = vcombine.low %v891_v11, %v895_v12 }
 0x117   : > { %v598_v26 = vpop.permute.xlu1 %597  ;;  %v678_v37 = vmax.f32 %v662_v46, 0.0 }
 0x118   : > { %v660_v29 = vadd.f32 %v2612_v15, %v637_v25  ;;  %v622_v30 = vmul.f32 %v2581_v51, %v598_v26  ;;  %v874_v51 = vld [vmem:[%s3196_s5 + $0x10] sm:$0xff]  ;;  %v2829_v25 = vcombine.high %v899_v19, %v903_v20 }
 0x119   : > { %v2156_v43 = vcombine.low %v874_v51, %v878_v42  ;;  %v2157_v44 = vcombine.high %v874_v51, %v878_v42  ;;  %v910_v26 = vld [vmem:[%s3196_s5 + $0x130] sm:$0xff] }
 0x11a   : > { %v676_v45 = vmax.f32 %v660_v29, 0.0  ;;  %v638_v35 = vadd.f32 %v622_v30, %v538_v27  ;;  %v907_v27 = vld [vmem:[%s3196_s5 + $0x118] sm:$0xff]  ;;  %v2180_v30 = vcombine.low %v898_v17, %v902_v61  ;;  %v2189_v46 = vcombine.high %v906_v24, %v910_v26  ;;  %v922_v42 = vld [vmem:[%s3196_s5 + $0x190] sm:$0xff] }
 0x11b   : > { %1524 = vmatprep.subr.bf16.mxu1 %v2157_v44  ;;  %v911_v29 = vld [vmem:[%s3196_s5 + $0x138] sm:$0xff]  ;;  %v926_v44 = vld [vmem:[%s3196_s5 + $0x1b0] sm:$0xff] }
 0x11c   : > { %v685_v36 = vpack.c.bf16 %v676_v45, %v675_v33  ;;  %v661_v52 = vadd.f32 %v2612_v15, %v638_v35  ;;  %v875_v15 = vld [vmem:[%s3196_s5 + $0x18] sm:$0xff]  ;;  %v2845_v33 = vcombine.low %v899_v19, %v903_v20  ;;  %v914_v45 = vld [vmem:[%s3196_s5 + $0x150] sm:$0xff]  ;;  %v2851_v35 = vcombine.high %v907_v27, %v911_v29 }
 0x11d   : > { %v2756_v48 = vcombine.high %v875_v15, %v879_v47  ;;  %v2784_v6 = vcombine.low %v875_v15, %v879_v47  ;;  %v923_v15 = vld [vmem:[%s3196_s5 + $0x198] sm:$0xff] }
 0x11e   : > { %v677_v39 = vmax.f32 %v661_v52, 0.0  ;;  %2252 = vmatprep.mubr.msk.bf16.mxu0 %vm726_vm0, %v685_v36  ;;  %v918_v36 = vld [vmem:[%s3196_s5 + $0x170] sm:$0xff]  ;;  %v915_v52 = vld [vmem:[%s3196_s5 + $0x158] sm:$0xff] }
 0x11f   : > { %1637 = vmatprep.subr.bf16.mxu0 %v2756_v48  ;;  %v2197_v51 = vcombine.high %v914_v45, %v918_v36  ;;  %v927_v47 = vld [vmem:[%s3196_s5 + $0x1b8] sm:$0xff] }
 0x120   : > { %v686_v40 = vpack.c.bf16 %v678_v37, %v677_v39  ;;  %v919_v37 = vld [vmem:[%s3196_s5 + $0x178] sm:$0xff]  ;;  %v2188_v39 = vcombine.low %v906_v24, %v910_v26 }
 0x122   : > { %2253 = vmatmul.mubr.msk.bf16.gmra.mrb[12].mxu0 %vm726_vm0, %v686_v40  ;;  %v2863_v40 = vcombine.low %v907_v27, %v911_v29 }
 0x123   : > { %1443 = vmatprep.mubr.bf16.mxu0 %v2387_v1 }
 0x18e   : > { %v2242_v63 = vpop.f32.mrb[0].mxu0 }
 0x18f   : > { %v794_v50 = vadd.f32 %v2242_v63, %v2762_v49  ;;  %v785_v53 = vpop.f32.mrb[1].mxu0  ;;  %v2196_v63 = vcombine.low %v914_v45, %v918_v36 }
 0x190   : > { %v786_v54 = vadd.f32 %v2762_v49, %v785_v53  ;;  %v2243_v55 = vpop.f32.mrb[2].mxu0  ;;  %v2205_v53 = vcombine.high %v922_v42, %v926_v44 }
 0x191   : > { %v797_v56 = vadd.f32 %v2243_v55, %v2762_v49  ;;  %v788_v57 = vpop.f32.mrb[3].mxu0  ;;  %v850_v59 = vmax.f32 %v794_v50, 0.0  ;;  %v2881_v50 = vcombine.low %v915_v52, %v919_v37  ;;  %v2887_v55 = vcombine.high %v923_v15, %v927_v47 }
 0x192   : > { %v789_v58 = vadd.f32 %v2762_v49, %v788_v57  ;;  %v848_v41 = vmax.f32 %v786_v54, 0.0  ;;  %v930_v54 = vld [vmem:[%s3196_s5 + $0x1d0] sm:$0xff]  ;;  %v931_v57 = vld [vmem:[%s3196_s5 + $0x1d8] sm:$0xff] }
 0x193   : > { %v851_v60 = vmax.f32 %v797_v56, 0.0  ;;  %v934_v56 = vld [vmem:[%s3196_s5 + $0x1f0] sm:$0xff] }
 0x194   : > { %v849_v62 = vmax.f32 %v789_v58, 0.0  ;;  %v935_v58 = vld [vmem:[%s3196_s5 + $0x1f8] sm:$0xff]  ;;  %v2212_v11 = vcombine.low %v930_v54, %v934_v56 }
 0x195   : > { %v2780_v4 = vpack.c.bf16 %v851_v60, %v850_v59  ;;  %v2204_v59 = vcombine.low %v922_v42, %v926_v44  ;;  %v2899_v60 = vcombine.low %v923_v15, %v927_v47  ;;  %v2908_v12 = vcombine.low %v931_v57, %v935_v58 }
 0x196   : > { %v2782_v5 = vpack.c.bf16 %v849_v62, %v848_v41  ;;  %v2213_v41 = vcombine.high %v930_v54, %v934_v56  ;;  %v2902_v62 = vcombine.high %v931_v57, %v935_v58 }
 0x198   : > { %1331 = vmatmul.mubr.bf16.vlgmr.msra.gmra.mrb[0].mxu1 %v2782_v5  ;;  %1444 = vmatmul.mubr.bf16.vlgmr.msra.gmra.mrb[16].mxu0 %v2782_v5 }
 0x199   : > { %1340 = vmatprep.mubr.bf16.mxu1 %v2387_v1  ;;  %1453 = vmatprep.mubr.bf16.mxu0 %v2387_v1 }
 0x19a   : > { %1525 = vmatpush1.bf16.msra.mxu1 %v2156_v43  ;;  %1638 = vmatpush1.bf16.msra.mxu0 %v2784_v6  ;;  %v2869_v43 = vcombine.high %v915_v52, %v919_v37 }
 0x19b   : > { %1526 = vmatprep.subr.bf16.mxu1 %v2165_v7  ;;  %1639 = vmatprep.subr.bf16.mxu0 %v2789_v9 }
 0x19e   : > { %1527 = vmatpush1.bf16.msra.mxu1 %v2164_v13  ;;  %1640 = vmatpush1.bf16.msra.mxu0 %v2805_v14 }
 0x19f   : > { %1528 = vmatprep.subr.bf16.mxu1 %v2173_v16  ;;  %1641 = vmatprep.subr.bf16.mxu0 %v2811_v18 }
 0x1a0   : > { %1341 = vmatmul.mubr.bf16.gmra.mrb[4].mxu1 %v2780_v4  ;;  %1454 = vmatmul.mubr.bf16.gmra.mrb[20].mxu0 %v2780_v4 }
 0x1a1   : > { %1350 = vmatprep.mubr.bf16.mxu1 %v2387_v1  ;;  %1463 = vmatprep.mubr.bf16.mxu0 %v2387_v1 }
 0x1a2   : > { %1529 = vmatpush1.bf16.msra.mxu1 %v2172_v21  ;;  %1642 = vmatpush1.bf16.msra.mxu0 %v2823_v22 }
 0x1a3   : > { %1530 = vmatprep.subr.bf16.mxu1 %v2181_v23  ;;  %1643 = vmatprep.subr.bf16.mxu0 %v2829_v25 }
 0x1a6   : > { %1531 = vmatpush1.bf16.msra.mxu1 %v2180_v30  ;;  %1644 = vmatpush1.bf16.msra.mxu0 %v2845_v33 }
 0x1a7   : > { %1532 = vmatprep.subr.bf16.mxu1 %v2189_v46  ;;  %1645 = vmatprep.subr.bf16.mxu0 %v2851_v35 }
 0x1aa   : > { %1533 = vmatpush1.bf16.msra.mxu1 %v2188_v39  ;;  %1646 = vmatpush1.bf16.msra.mxu0 %v2863_v40 }
 0x1ab   : > { %1534 = vmatprep.subr.bf16.mxu1 %v2197_v51  ;;  %1647 = vmatprep.subr.bf16.mxu0 %v2869_v43 }
 0x1ae   : > { %1535 = vmatpush1.bf16.msra.mxu1 %v2196_v63  ;;  %1648 = vmatpush1.bf16.msra.mxu0 %v2881_v50 }
 0x1af   : > { %v2246_v38 = vpop.f32.mrb[4].mxu0  ;;  %1536 = vmatprep.subr.bf16.mxu1 %v2205_v53  ;;  %1649 = vmatprep.subr.bf16.mxu0 %v2887_v55 }
 0x1b0   : > { %v810_v0 = vadd.f32 %v2246_v38, %v2762_v49  ;;  %v801_v2 = vpop.f32.mrb[5].mxu0 }
 0x1b1   : > { %v802_v3 = vadd.f32 %v2762_v49, %v801_v2  ;;  %v2247_v7 = vpop.f32.mrb[6].mxu0 }
 0x1b2   : > { %v813_v8 = vadd.f32 %v2247_v7, %v2762_v49  ;;  %v804_v10 = vpop.f32.mrb[7].mxu0  ;;  %1537 = vmatpush1.bf16.msra.mxu1 %v2204_v59  ;;  %1650 = vmatpush1.bf16.msra.mxu0 %v2899_v60  ;;  %v854_v16 = vmax.f32 %v810_v0, 0.0 }
 0x1b3   : > { %v805_v13 = vadd.f32 %v2762_v49, %v804_v10  ;;  %1538 = vmatprep.subr.bf16.mxu1 %v2213_v41  ;;  %1651 = vmatprep.subr.bf16.mxu0 %v2902_v62  ;;  %v852_v61 = vmax.f32 %v802_v3, 0.0 }
 0x1b4   : > { %v855_v17 = vmax.f32 %v813_v8, 0.0 }
 0x1b5   : > { %v853_v19 = vmax.f32 %v805_v13, 0.0 }
 0x1b6   : > { %v2912_v20 = vpack.c.bf16 %v855_v17, %v854_v16  ;;  %1539 = vmatpush1.bf16.msra.mxu1 %v2212_v11  ;;  %1652 = vmatpush1.bf16.msra.mxu0 %v2908_v12 }
 0x1b7   : > { %v2915_v21 = vpack.c.bf16 %v853_v19, %v852_v61  ;;  %2256 = vmatprep.subr.bf16.mxu1 %v2756_v48 }
 0x1b9   : > { %1351 = vmatmul.mubr.bf16.gmra.mrb[8].mxu1 %v2915_v21  ;;  %1464 = vmatmul.mubr.bf16.gmra.mrb[24].mxu0 %v2915_v21 }
 0x1ba   : > { %1360 = vmatprep.mubr.bf16.mxu1 %v2387_v1  ;;  %1473 = vmatprep.mubr.bf16.mxu0 %v2387_v1 }
 0x1c1   : > { %1361 = vmatmul.mubr.bf16.gmra.mrb[12].mxu1 %v2912_v20  ;;  %1474 = vmatmul.mubr.bf16.gmra.mrb[28].mxu0 %v2912_v20 }
 0x1c2   : > { %1370 = vmatprep.mubr.bf16.mxu1 %v2387_v1  ;;  %1483 = vmatprep.mubr.bf16.mxu0 %v2387_v1 }
 0x1d4   : > { %v2250_v23 = vpop.f32.mrb[8].mxu0 }
 0x1d5   : > { %v826_v24 = vadd.f32 %v2250_v23, %v2762_v49  ;;  %v817_v48 = vpop.f32.mrb[9].mxu0 }
 0x1d6   : > { %v818_v26 = vadd.f32 %v2762_v49, %v817_v48  ;;  %v2251_v27 = vpop.f32.mrb[10].mxu0 }
 0x1d7   : > { %v829_v29 = vadd.f32 %v2251_v27, %v2762_v49  ;;  %v820_v30 = vpop.f32.mrb[11].mxu0  ;;  %v858_v45 = vmax.f32 %v826_v24, 0.0 }
 0x1d8   : > { %v821_v46 = vadd.f32 %v2762_v49, %v820_v30  ;;  %v856_v52 = vmax.f32 %v818_v26, 0.0 }
 0x1d9   : > { %v859_v36 = vmax.f32 %v829_v29, 0.0 }
 0x1da   : > { %v857_v37 = vmax.f32 %v821_v46, 0.0 }
 0x1db   : > { %v2930_v39 = vpack.c.bf16 %v859_v36, %v858_v45 }
 0x1dc   : > { %v868_v51 = vpack.c.bf16 %v857_v37, %v856_v52 }
 0x1de   : > { %1371 = vmatmul.mubr.bf16.gmra.mrb[16].mxu1 %v868_v51  ;;  %1484 = vmatmul.mubr.bf16.gmra.mrb[32].mxu0 %v868_v51 }
 0x1df   : > { %1380 = vmatprep.mubr.bf16.mxu1 %v2387_v1  ;;  %1493 = vmatprep.mubr.bf16.mxu0 %v2387_v1 }
 0x1e6   : > { %1381 = vmatmul.mubr.bf16.gmra.mrb[20].mxu1 %v2930_v39  ;;  %1494 = vmatmul.mubr.bf16.gmra.mrb[36].mxu0 %v2930_v39 }
 0x1e7   : > { %1390 = vmatprep.mubr.bf16.mxu1 %v2387_v1  ;;  %1503 = vmatprep.mubr.bf16.mxu0 %v2387_v1 }
 0x1f5   : > { %v2254_v42 = vpop.f32.mrb[12].mxu0 }
 0x1f6   : > { %v842_v44 = vadd.f32 %v2254_v42, %v2762_v49  ;;  %v833_v15 = vpop.f32.mrb[13].mxu0 }
 0x1f7   : > { %v834_v47 = vadd.f32 %v2762_v49, %v833_v15  ;;  %v2255_v63 = vpop.f32.mrb[14].mxu0 }
 0x1f8   : > { %v845_v53 = vadd.f32 %v2255_v63, %v2762_v49  ;;  %v836_v54 = vpop.f32.mrb[15].mxu0  ;;  %v862_v57 = vmax.f32 %v842_v44, 0.0 }
 0x1f9   : > { %v837_v56 = vadd.f32 %v2762_v49, %v836_v54  ;;  %v860_v59 = vmax.f32 %v834_v47, 0.0  ;;  %v2988_v49 = vld [vmem:[%s3197_s6] sm:$0xff] }
 0x1fa   : > { %v863_v58 = vmax.f32 %v845_v53, 0.0 }
 0x1fb   : > { %v861_v38 = vmax.f32 %v837_v56, 0.0 }
 0x1fc   : > { %v871_v41 = vpack.c.bf16 %v863_v58, %v862_v57 }
 0x1fd   : > { %v870_v0 = vpack.c.bf16 %v861_v38, %v860_v59 }
 0x1ff   : > { %1391 = vmatmul.mubr.bf16.gmra.mrb[24].mxu1 %v870_v0  ;;  %1504 = vmatmul.mubr.bf16.gmra.mrb[40].mxu0 %v870_v0 }
 0x200   : > { %1400 = vmatprep.mubr.bf16.mxu1 %v2387_v1  ;;  %1513 = vmatprep.mubr.bf16.mxu0 %v2387_v1 }
 0x207   : > { %1401 = vmatmul.mubr.bf16.gmra.mrb[28].mxu1 %v871_v41  ;;  %1514 = vmatmul.mubr.bf16.gmra.mrb[44].mxu0 %v871_v41 }
 0x208   : > { %1556 = vmatprep.mubr.bf16.mxu1 %v2387_v1  ;;  %1669 = vmatprep.mubr.bf16.mxu0 %v2387_v1 }
 0x20f   : > { %1557 = vmatmul.mubr.bf16.vlgmr.msra.gmra.mrb[32].mxu1 %v2782_v5  ;;  %1670 = vmatmul.mubr.bf16.vlgmr.msra.gmra.mrb[48].mxu0 %v2782_v5  ;;  %v2994_v5 = vrot.slane %v2988_v49, %v422_v31 }
 0x210   : > { %2264 = vmatpush1.bf16.msra.mxu1 %v2784_v6  ;;  %1566 = vmatprep.mubr.bf16.mxu1 %v2387_v1  ;;  %v2999_v6 = vrot.slane %v2988_v49, %v606_v34 }
 0x211   : > { %2257 = vmatprep.subr.bf16.mxu1 %v2789_v9  ;;  %1679 = vmatprep.mubr.bf16.mxu0 %v2387_v1 }
 0x214   : > { %2265 = vmatpush1.bf16.msra.mxu1 %v2805_v14  ;;  %v3004_v14 = vrot.slane %v2988_v49, %v506_v32 }
 0x215   : > { %2258 = vmatprep.subr.bf16.mxu1 %v2811_v18 }
 0x217   : > { %1567 = vmatmul.mubr.bf16.gmra.mrb[36].mxu1 %v2780_v4  ;;  %1680 = vmatmul.mubr.bf16.gmra.mrb[52].mxu0 %v2780_v4  ;;  %v952_v4 = vsub.s32 3, %v2533_v28 }
 0x218   : > { %1576 = vmatprep.mubr.bf16.mxu1 %v2387_v1  ;;  %1689 = vmatprep.mubr.bf16.mxu0 %v2387_v1 }
 0x219   : > { %2266 = vmatpush1.bf16.msra.mxu1 %v2823_v22  ;;  %v3007_v18 = vrot.slane %v2988_v49, %v952_v4 }
 0x21a   : > { %2259 = vmatprep.subr.bf16.mxu1 %v2829_v25 }
 0x21d   : > { %2267 = vmatpush1.bf16.msra.mxu1 %v2845_v33 }
 0x21e   : > { %2260 = vmatprep.subr.bf16.mxu1 %v2851_v35 }
 0x21f   : > { %1577 = vmatmul.mubr.bf16.gmra.mrb[40].mxu1 %v2915_v21  ;;  %1690 = vmatmul.mubr.bf16.gmra.mrb[56].mxu0 %v2915_v21 }
 0x220   : > { %1586 = vmatprep.mubr.bf16.mxu1 %v2387_v1  ;;  %1699 = vmatprep.mubr.bf16.mxu0 %v2387_v1 }
 0x221   : > { %2268 = vmatpush1.bf16.msra.mxu1 %v2863_v40 }
 0x222   : > { %2261 = vmatprep.subr.bf16.mxu1 %v2869_v43 }
 0x225   : > { %2269 = vmatpush1.bf16.msra.mxu1 %v2881_v50 }
 0x226   : > { %2262 = vmatprep.subr.bf16.mxu1 %v2887_v55 }
 0x227   : > { %1587 = vmatmul.mubr.bf16.gmra.mrb[44].mxu1 %v2912_v20  ;;  %1700 = vmatmul.mubr.bf16.gmra.mrb[60].mxu0 %v2912_v20 }
 0x228   : > { %1596 = vmatprep.mubr.bf16.mxu1 %v2387_v1  ;;  %1709 = vmatprep.mubr.bf16.mxu0 %v2387_v1 }
 0x229   : > { %2270 = vmatpush1.bf16.msra.mxu1 %v2899_v60 }
 0x22a   : > { %2263 = vmatprep.subr.bf16.mxu1 %v2902_v62 }
 0x22d   : > { %2271 = vmatpush1.bf16.msra.mxu1 %v2908_v12 }
 0x22f   : > { %1597 = vmatmul.mubr.bf16.gmra.mrb[48].mxu1 %v868_v51  ;;  %1710 = vmatmul.mubr.bf16.gmra.mrb[64].mxu0 %v868_v51 }
 0x230   : > { %1606 = vmatprep.mubr.bf16.mxu1 %v2387_v1  ;;  %1719 = vmatprep.mubr.bf16.mxu0 %v2387_v1 }
 0x237   : > { %1607 = vmatmul.mubr.bf16.gmra.mrb[52].mxu1 %v2930_v39  ;;  %1720 = vmatmul.mubr.bf16.gmra.mrb[68].mxu0 %v2930_v39 }
 0x238   : > { %1616 = vmatprep.mubr.bf16.mxu1 %v2387_v1  ;;  %1729 = vmatprep.mubr.bf16.mxu0 %v2387_v1 }
 0x23f   : > { %1617 = vmatmul.mubr.bf16.gmra.mrb[56].mxu1 %v870_v0  ;;  %1730 = vmatmul.mubr.bf16.gmra.mrb[72].mxu0 %v870_v0 }
 0x240   : > { %1626 = vmatprep.mubr.bf16.mxu1 %v2387_v1 }
 0x247   : > { %1627 = vmatmul.mubr.bf16.gmra.mrb[60].mxu1 %v871_v41 }
 0x248   : > { %1739 = vmatprep.mubr.bf16.mxu1 %v2387_v1 }
 0x24f   : > { %1740 = vmatmul.mubr.bf16.vlgmr.msra.gmra.mrb[64].mxu1 %v871_v41 }
 0x26b   : > { %v1332_v9 = vpop.f32.mrb[0].mxu1  ;;  %v1445_v1 = vpop.f32.mrb[16].mxu0 }
 0x26c   : > { %v1334_v22 = vpop.f32.mrb[1].mxu1  ;;  %v1447_v25 = vpop.f32.mrb[17].mxu0  ;;  %v1333_v35 = vadd.f32 %v1332_v9, %v2994_v5  ;;  %v1446_v40 = vadd.f32 %v1445_v1, %v2999_v6 }
 0x26d   : > { %v1336_v33 = vpop.f32.mrb[2].mxu1  ;;  %v1449_v31 = vpop.f32.mrb[18].mxu0  ;;  %v1335_v32 = vadd.f32 %v1334_v22, %v3004_v14  ;;  %v1448_v60 = vadd.f32 %v1447_v25, %v3007_v18 }
 0x26e   : > { %v1337_v34 = vadd.f32 %v1336_v33, %v2994_v5  ;;  %v1450_v43 = vadd.f32 %v1449_v31, %v2999_v6  ;;  %v1338_v50 = vpop.f32.mrb[3].mxu1  ;;  %v1451_v55 = vpop.f32.mrb[19].mxu0 }
 0x26f   : > { %v1339_v62 = vadd.f32 %v1338_v50, %v3004_v14  ;;  %v1452_v2 = vadd.f32 %v1451_v55, %v3007_v18 }
 0x270   : > { %v1750_v3 = vmax.f32 %v1333_v35, %v1337_v34  ;;  %v1792_v7 = vmax.f32 %v1446_v40, %v1450_v43 }
 0x271   : > { %v1771_v8 = vmax.f32 %v1335_v32, %v1339_v62  ;;  %v1813_v10 = vmax.f32 %v1448_v60, %v1452_v2 }
 0x273   : > { %v1342_v11 = vpop.f32.mrb[4].mxu1  ;;  %v1455_v12 = vpop.f32.mrb[20].mxu0 }
 0x274   : > { %v1343_v13 = vadd.f32 %v1342_v11, %v2994_v5  ;;  %v1456_v16 = vadd.f32 %v1455_v12, %v2999_v6  ;;  %v1344_v17 = vpop.f32.mrb[5].mxu1  ;;  %v1457_v61 = vpop.f32.mrb[21].mxu0 }
 0x275   : > { %v1345_v19 = vadd.f32 %v1344_v17, %v3004_v14  ;;  %v1458_v20 = vadd.f32 %v1457_v61, %v3007_v18  ;;  %v1346_v21 = vpop.f32.mrb[6].mxu1  ;;  %v1459_v23 = vpop.f32.mrb[22].mxu0 }
 0x276   : > { %v1751_v24 = vmax.f32 %v1750_v3, %v1343_v13  ;;  %v1793_v48 = vmax.f32 %v1792_v7, %v1456_v16  ;;  %v1347_v26 = vadd.f32 %v1346_v21, %v2994_v5  ;;  %v1460_v27 = vadd.f32 %v1459_v23, %v2999_v6  ;;  %v1348_v29 = vpop.f32.mrb[7].mxu1  ;;  %v1461_v30 = vpop.f32.mrb[23].mxu0 }
 0x277   : > { %v1772_v46 = vmax.f32 %v1771_v8, %v1345_v19  ;;  %v1814_v45 = vmax.f32 %v1813_v10, %v1458_v20  ;;  %v1349_v36 = vadd.f32 %v1348_v29, %v3004_v14  ;;  %v1462_v52 = vadd.f32 %v1461_v30, %v3007_v18 }
 0x278   : > { %v1752_v37 = vmax.f32 %v1751_v24, %v1347_v26  ;;  %v1794_v39 = vmax.f32 %v1793_v48, %v1460_v27 }
 0x279   : > { %v1773_v51 = vmax.f32 %v1772_v46, %v1349_v36  ;;  %v1815_v42 = vmax.f32 %v1814_v45, %v1462_v52 }
 0x28c   : > { %v1352_v44 = vpop.f32.mrb[8].mxu1  ;;  %v1465_v15 = vpop.f32.mrb[24].mxu0 }
 0x28d   : > { %v1353_v47 = vadd.f32 %v1352_v44, %v2994_v5  ;;  %v1466_v63 = vadd.f32 %v1465_v15, %v2999_v6  ;;  %v1354_v53 = vpop.f32.mrb[9].mxu1  ;;  %v1467_v54 = vpop.f32.mrb[25].mxu0 }
 0x28e   : > { %v1355_v56 = vadd.f32 %v1354_v53, %v3004_v14  ;;  %v1468_v57 = vadd.f32 %v1467_v54, %v3007_v18  ;;  %v1356_v58 = vpop.f32.mrb[10].mxu1  ;;  %v1469_v59 = vpop.f32.mrb[26].mxu0 }
 0x28f   : > { %v1753_v38 = vmax.f32 %v1752_v37, %v1353_v47  ;;  %v1795_v41 = vmax.f32 %v1794_v39, %v1466_v63  ;;  %v1357_v0 = vadd.f32 %v1356_v58, %v2994_v5  ;;  %v1470_v4 = vadd.f32 %v1469_v59, %v2999_v6  ;;  %v1358_v9 = vpop.f32.mrb[11].mxu1  ;;  %v1471_v1 = vpop.f32.mrb[27].mxu0 }
 0x290   : > { %v1774_v22 = vmax.f32 %v1773_v51, %v1355_v56  ;;  %v1816_v25 = vmax.f32 %v1815_v42, %v1468_v57  ;;  %v1359_v33 = vadd.f32 %v1358_v9, %v3004_v14  ;;  %v1472_v31 = vadd.f32 %v1471_v1, %v3007_v18 }
 0x291   : > { %v1754_v35 = vmax.f32 %v1753_v38, %v1357_v0  ;;  %v1796_v40 = vmax.f32 %v1795_v41, %v1470_v4 }
 0x292   : > { %v1775_v34 = vmax.f32 %v1774_v22, %v1359_v33  ;;  %v1817_v43 = vmax.f32 %v1816_v25, %v1472_v31 }
 0x294   : > { %v1362_v50 = vpop.f32.mrb[12].mxu1  ;;  %v1475_v55 = vpop.f32.mrb[28].mxu0 }
 0x295   : > { %v1363_v32 = vadd.f32 %v1362_v50, %v2994_v5  ;;  %v1476_v60 = vadd.f32 %v1475_v55, %v2999_v6  ;;  %v1364_v62 = vpop.f32.mrb[13].mxu1  ;;  %v1477_v2 = vpop.f32.mrb[29].mxu0 }
 0x296   : > { %v1365_v3 = vadd.f32 %v1364_v62, %v3004_v14  ;;  %v1478_v7 = vadd.f32 %v1477_v2, %v3007_v18  ;;  %v1366_v8 = vpop.f32.mrb[14].mxu1  ;;  %v1479_v10 = vpop.f32.mrb[30].mxu0 }
 0x297   : > { %v1755_v11 = vmax.f32 %v1754_v35, %v1363_v32  ;;  %v1797_v12 = vmax.f32 %v1796_v40, %v1476_v60  ;;  %v1367_v13 = vadd.f32 %v1366_v8, %v2994_v5  ;;  %v1480_v16 = vadd.f32 %v1479_v10, %v2999_v6  ;;  %v1368_v17 = vpop.f32.mrb[15].mxu1  ;;  %v1481_v61 = vpop.f32.mrb[31].mxu0 }
 0x298   : > { %v1776_v19 = vmax.f32 %v1775_v34, %v1365_v3  ;;  %v1818_v20 = vmax.f32 %v1817_v43, %v1478_v7  ;;  %v1369_v21 = vadd.f32 %v1368_v17, %v3004_v14  ;;  %v1482_v23 = vadd.f32 %v1481_v61, %v3007_v18 }
 0x299   : > { %v1756_v24 = vmax.f32 %v1755_v11, %v1367_v13  ;;  %v1798_v48 = vmax.f32 %v1797_v12, %v1480_v16 }
 0x29a   : > { %v1777_v26 = vmax.f32 %v1776_v19, %v1369_v21  ;;  %v1819_v27 = vmax.f32 %v1818_v20, %v1482_v23 }
 0x2b1   : > { %v1372_v29 = vpop.f32.mrb[16].mxu1  ;;  %v1485_v30 = vpop.f32.mrb[32].mxu0 }
 0x2b2   : > { %v1373_v46 = vadd.f32 %v1372_v29, %v2994_v5  ;;  %v1486_v45 = vadd.f32 %v1485_v30, %v2999_v6  ;;  %v1374_v36 = vpop.f32.mrb[17].mxu1  ;;  %v1487_v52 = vpop.f32.mrb[33].mxu0 }
 0x2b3   : > { %v1375_v37 = vadd.f32 %v1374_v36, %v3004_v14  ;;  %v1488_v39 = vadd.f32 %v1487_v52, %v3007_v18  ;;  %v1376_v51 = vpop.f32.mrb[18].mxu1  ;;  %v1489_v42 = vpop.f32.mrb[34].mxu0 }
 0x2b4   : > { %v1757_v44 = vmax.f32 %v1756_v24, %v1373_v46  ;;  %v1799_v15 = vmax.f32 %v1798_v48, %v1486_v45  ;;  %v1377_v47 = vadd.f32 %v1376_v51, %v2994_v5  ;;  %v1490_v63 = vadd.f32 %v1489_v42, %v2999_v6  ;;  %v1378_v53 = vpop.f32.mrb[19].mxu1  ;;  %v1491_v54 = vpop.f32.mrb[35].mxu0 }
 0x2b5   : > { %v1778_v56 = vmax.f32 %v1777_v26, %v1375_v37  ;;  %v1820_v57 = vmax.f32 %v1819_v27, %v1488_v39  ;;  %v1379_v58 = vadd.f32 %v1378_v53, %v3004_v14  ;;  %v1492_v59 = vadd.f32 %v1491_v54, %v3007_v18 }
 0x2b6   : > { %v1758_v38 = vmax.f32 %v1757_v44, %v1377_v47  ;;  %v1800_v41 = vmax.f32 %v1799_v15, %v1490_v63 }
 0x2b7   : > { %v1779_v0 = vmax.f32 %v1778_v56, %v1379_v58  ;;  %v1821_v4 = vmax.f32 %v1820_v57, %v1492_v59 }
 0x2b9   : > { %v1382_v9 = vpop.f32.mrb[20].mxu1  ;;  %v1495_v1 = vpop.f32.mrb[36].mxu0 }
 0x2ba   : > { %v1383_v22 = vadd.f32 %v1382_v9, %v2994_v5  ;;  %v1496_v25 = vadd.f32 %v1495_v1, %v2999_v6  ;;  %v1384_v33 = vpop.f32.mrb[21].mxu1  ;;  %v1497_v31 = vpop.f32.mrb[37].mxu0 }
 0x2bb   : > { %v1385_v35 = vadd.f32 %v1384_v33, %v3004_v14  ;;  %v1498_v40 = vadd.f32 %v1497_v31, %v3007_v18  ;;  %v1386_v34 = vpop.f32.mrb[22].mxu1  ;;  %v1499_v43 = vpop.f32.mrb[38].mxu0 }
 0x2bc   : > { %v1759_v50 = vmax.f32 %v1758_v38, %v1383_v22  ;;  %v1801_v55 = vmax.f32 %v1800_v41, %v1496_v25  ;;  %v1387_v32 = vadd.f32 %v1386_v34, %v2994_v5  ;;  %v1500_v60 = vadd.f32 %v1499_v43, %v2999_v6  ;;  %v1388_v62 = vpop.f32.mrb[23].mxu1  ;;  %v1501_v2 = vpop.f32.mrb[39].mxu0 }
 0x2bd   : > { %v1780_v3 = vmax.f32 %v1779_v0, %v1385_v35  ;;  %v1822_v7 = vmax.f32 %v1821_v4, %v1498_v40  ;;  %v1389_v8 = vadd.f32 %v1388_v62, %v3004_v14  ;;  %v1502_v10 = vadd.f32 %v1501_v2, %v3007_v18 }
 0x2be   : > { %v1760_v11 = vmax.f32 %v1759_v50, %v1387_v32  ;;  %v1802_v12 = vmax.f32 %v1801_v55, %v1500_v60  ;;  %v956_v38 = vsub.s32 4, %v2533_v28  ;;  %v964_v41 = vsub.s32 6, %v2533_v28 }
 0x2bf   : > { %v1781_v13 = vmax.f32 %v1780_v3, %v1389_v8  ;;  %v1823_v16 = vmax.f32 %v1822_v7, %v1502_v10  ;;  %v960_v22 = vsub.s32 5, %v2533_v28  ;;  %v968_v25 = vsub.s32 7, %v2533_v28 }
 0x2c0   : > { %v3078_v3 = vrot.slane %v2988_v49, %v956_v38  ;;  %v3081_v7 = vrot.slane %v2988_v49, %v964_v41 }
 0x2c1   : > { %v3087_v10 = vrot.slane %v2988_v49, %v968_v25 }
 0x2d2   : > { %v1392_v17 = vpop.f32.mrb[24].mxu1  ;;  %v1505_v61 = vpop.f32.mrb[40].mxu0 }
 0x2d3   : > { %v1393_v19 = vadd.f32 %v1392_v17, %v2994_v5  ;;  %v1506_v20 = vadd.f32 %v1505_v61, %v2999_v6  ;;  %v1394_v21 = vpop.f32.mrb[25].mxu1  ;;  %v1507_v23 = vpop.f32.mrb[41].mxu0 }
 0x2d4   : > { %v1395_v24 = vadd.f32 %v1394_v21, %v3004_v14  ;;  %v1508_v48 = vadd.f32 %v1507_v23, %v3007_v18  ;;  %v1396_v26 = vpop.f32.mrb[26].mxu1  ;;  %v1509_v27 = vpop.f32.mrb[42].mxu0 }
 0x2d5   : > { %v1761_v29 = vmax.f32 %v1760_v11, %v1393_v19  ;;  %v1803_v30 = vmax.f32 %v1802_v12, %v1506_v20  ;;  %v1397_v46 = vadd.f32 %v1396_v26, %v2994_v5  ;;  %v1510_v45 = vadd.f32 %v1509_v27, %v2999_v6  ;;  %v1398_v36 = vpop.f32.mrb[27].mxu1  ;;  %v1511_v52 = vpop.f32.mrb[43].mxu0 }
 0x2d6   : > { %v1782_v37 = vmax.f32 %v1781_v13, %v1395_v24  ;;  %v1824_v39 = vmax.f32 %v1823_v16, %v1508_v48  ;;  %v1399_v51 = vadd.f32 %v1398_v36, %v3004_v14  ;;  %v1512_v42 = vadd.f32 %v1511_v52, %v3007_v18 }
 0x2d7   : > { %v1762_v44 = vmax.f32 %v1761_v29, %v1397_v46  ;;  %v1804_v15 = vmax.f32 %v1803_v30, %v1510_v45 }
 0x2d8   : > { %v1783_v47 = vmax.f32 %v1782_v37, %v1399_v51  ;;  %v1825_v63 = vmax.f32 %v1824_v39, %v1512_v42 }
 0x2da   : > { %v1402_v53 = vpop.f32.mrb[28].mxu1  ;;  %v1515_v54 = vpop.f32.mrb[44].mxu0 }
 0x2db   : > { %v1403_v56 = vadd.f32 %v1402_v53, %v2994_v5  ;;  %v1516_v57 = vadd.f32 %v1515_v54, %v2999_v6  ;;  %v1404_v58 = vpop.f32.mrb[29].mxu1  ;;  %v1517_v59 = vpop.f32.mrb[45].mxu0 }
 0x2dc   : > { %v1405_v0 = vadd.f32 %v1404_v58, %v3004_v14  ;;  %v1518_v4 = vadd.f32 %v1517_v59, %v3007_v18  ;;  %v1406_v9 = vpop.f32.mrb[30].mxu1  ;;  %v1519_v1 = vpop.f32.mrb[46].mxu0 }
 0x2dd   : > { %v1763_v33 = vmax.f32 %v1762_v44, %v1403_v56  ;;  %v1805_v31 = vmax.f32 %v1804_v15, %v1516_v57  ;;  %v1407_v35 = vadd.f32 %v1406_v9, %v2994_v5  ;;  %v1520_v40 = vadd.f32 %v1519_v1, %v2999_v6  ;;  %v1408_v34 = vpop.f32.mrb[31].mxu1  ;;  %v1521_v43 = vpop.f32.mrb[47].mxu0 }
 0x2de   : > { %v1784_v50 = vmax.f32 %v1783_v47, %v1405_v0  ;;  %v1826_v55 = vmax.f32 %v1825_v63, %v1518_v4  ;;  %v1409_v32 = vadd.f32 %v1408_v34, %v3004_v14  ;;  %v1522_v60 = vadd.f32 %v1521_v43, %v3007_v18 }
 0x2df   : > { %v1764_v62 = vmax.f32 %v1763_v33, %v1407_v35  ;;  %v1806_v2 = vmax.f32 %v1805_v31, %v1520_v40  ;;  %v3084_v6 = vrot.slane %v2988_v49, %v960_v22 }
 0x2e0   : > { %v1785_v8 = vmax.f32 %v1784_v50, %v1409_v32  ;;  %v1827_v5 = vmax.f32 %v1826_v55, %v1522_v60 }
 0x2e1   : > { %v1765_v11 = vrot.slane %v1764_v62, 4  ;;  %v1807_v14 = vrot.slane %v1806_v2, 4 }
 0x2e2   : > { %v1786_v12 = vrot.slane %v1785_v8, 4  ;;  %v1828_v18 = vrot.slane %v1827_v5, 4  ;;  %v1558_v13 = vpop.f32.mrb[32].mxu1  ;;  %v1671_v16 = vpop.f32.mrb[48].mxu0 }
 0x2e3   : > { %v1766_v17 = vmax.f32 %v1764_v62, %v1765_v11  ;;  %v1808_v61 = vmax.f32 %v1806_v2, %v1807_v14  ;;  %v1559_v19 = vadd.f32 %v1558_v13, %v3078_v3  ;;  %v1672_v20 = vadd.f32 %v1671_v16, %v3081_v7  ;;  %v1560_v21 = vpop.f32.mrb[33].mxu1  ;;  %v1673_v23 = vpop.f32.mrb[49].mxu0 }
 0x2e4   : > { %v1787_v24 = vmax.f32 %v1785_v8, %v1786_v12  ;;  %v1829_v48 = vmax.f32 %v1827_v5, %v1828_v18  ;;  %v1561_v26 = vadd.f32 %v1560_v21, %v3084_v6  ;;  %v1674_v49 = vadd.f32 %v1673_v23, %v3087_v10  ;;  %v1562_v27 = vpop.f32.mrb[34].mxu1  ;;  %v1675_v29 = vpop.f32.mrb[50].mxu0 }
 0x2e5   : > { %v1767_v30 = vrot.slane %v1766_v17, 2  ;;  %v1809_v46 = vrot.slane %v1808_v61, 2  ;;  %v1563_v45 = vadd.f32 %v1562_v27, %v3078_v3  ;;  %v1676_v36 = vadd.f32 %v1675_v29, %v3081_v7  ;;  %v1564_v52 = vpop.f32.mrb[35].mxu1  ;;  %v1677_v37 = vpop.f32.mrb[51].mxu0 }
 0x2e6   : > { %v1788_v39 = vrot.slane %v1787_v24, 2  ;;  %v1830_v51 = vrot.slane %v1829_v48, 2  ;;  %v1565_v42 = vadd.f32 %v1564_v52, %v3084_v6  ;;  %v1678_v44 = vadd.f32 %v1677_v37, %v3087_v10 }
 0x2e7   : > { %v1768_v15 = vmax.f32 %v1766_v17, %v1767_v30  ;;  %v1810_v47 = vmax.f32 %v1808_v61, %v1809_v46  ;;  %v1834_v63 = vmax.f32 %v1559_v19, %v1563_v45  ;;  %v1876_v53 = vmax.f32 %v1672_v20, %v1676_v36 }
 0x2e8   : > { %v1789_v54 = vmax.f32 %v1787_v24, %v1788_v39  ;;  %v1831_v56 = vmax.f32 %v1829_v48, %v1830_v51  ;;  %v1855_v57 = vmax.f32 %v1561_v26, %v1565_v42  ;;  %v1897_v58 = vmax.f32 %v1674_v49, %v1678_v44 }
 0x2e9   : > { %v1769_v59 = vrot.slane %v1768_v15, 1  ;;  %v1811_v38 = vrot.slane %v1810_v47, 1 }
 0x2ea   : > { %v1790_v41 = vrot.slane %v1789_v54, 1  ;;  %v1832_v0 = vrot.slane %v1831_v56, 1  ;;  %v1568_v4 = vpop.f32.mrb[36].mxu1  ;;  %v1681_v9 = vpop.f32.mrb[52].mxu0 }
 0x2eb   : > { %v3097_v1 = vmax.f32 %v1768_v15, %v1769_v59  ;;  %v3099_v22 = vmax.f32 %v1810_v47, %v1811_v38  ;;  %v1569_v25 = vadd.f32 %v1568_v4, %v3078_v3  ;;  %v1682_v33 = vadd.f32 %v1681_v9, %v3081_v7  ;;  %v1570_v31 = vpop.f32.mrb[37].mxu1  ;;  %v1683_v35 = vpop.f32.mrb[53].mxu0 }
 0x2ec   : > { %v3103_v40 = vmax.f32 %v1789_v54, %v1790_v41  ;;  %v3105_v34 = vmax.f32 %v1831_v56, %v1832_v0  ;;  %v1571_v43 = vadd.f32 %v1570_v31, %v3084_v6  ;;  %v1684_v50 = vadd.f32 %v1683_v35, %v3087_v10  ;;  %v1572_v55 = vpop.f32.mrb[38].mxu1  ;;  %v1685_v32 = vpop.f32.mrb[54].mxu0 }
 0x2ed   : > { %v1835_v60 = vmax.f32 %v1834_v63, %v1569_v25  ;;  %v1877_v62 = vmax.f32 %v1876_v53, %v1682_v33  ;;  %v1573_v2 = vadd.f32 %v1572_v55, %v3078_v3  ;;  %v1686_v8 = vadd.f32 %v1685_v32, %v3081_v7  ;;  %v1574_v5 = vpop.f32.mrb[39].mxu1  ;;  %v1687_v11 = vpop.f32.mrb[55].mxu0 }
 0x2ee   : > { %v1856_v14 = vmax.f32 %v1855_v57, %v1571_v43  ;;  %v1898_v12 = vmax.f32 %v1897_v58, %v1684_v50  ;;  %v1575_v18 = vadd.f32 %v1574_v5, %v3084_v6  ;;  %v1688_v13 = vadd.f32 %v1687_v11, %v3087_v10 }
 0x2ef   : > { %v1836_v16 = vmax.f32 %v1835_v60, %v1573_v2  ;;  %v1878_v17 = vmax.f32 %v1877_v62, %v1686_v8 }
 0x2f0   : > { %v1857_v61 = vmax.f32 %v1856_v14, %v1575_v18  ;;  %v1899_v19 = vmax.f32 %v1898_v12, %v1688_v13 }
 0x2f2   : > { %v1578_v20 = vpop.f32.mrb[40].mxu1  ;;  %v1691_v21 = vpop.f32.mrb[56].mxu0 }
 0x2f3   : > { %v1579_v23 = vadd.f32 %v1578_v20, %v3078_v3  ;;  %v1692_v24 = vadd.f32 %v1691_v21, %v3081_v7  ;;  %v1580_v48 = vpop.f32.mrb[41].mxu1  ;;  %v1693_v26 = vpop.f32.mrb[57].mxu0 }
 0x2f4   : > { %v1581_v49 = vadd.f32 %v1580_v48, %v3084_v6  ;;  %v1694_v27 = vadd.f32 %v1693_v26, %v3087_v10  ;;  %v1582_v29 = vpop.f32.mrb[42].mxu1  ;;  %v1695_v30 = vpop.f32.mrb[58].mxu0 }
 0x2f5   : > { %v1837_v46 = vmax.f32 %v1836_v16, %v1579_v23  ;;  %v1879_v45 = vmax.f32 %v1878_v17, %v1692_v24  ;;  %v1583_v36 = vadd.f32 %v1582_v29, %v3078_v3  ;;  %v1696_v52 = vadd.f32 %v1695_v30, %v3081_v7  ;;  %v1584_v37 = vpop.f32.mrb[43].mxu1  ;;  %v1697_v39 = vpop.f32.mrb[59].mxu0 }
 0x2f6   : > { %v1858_v51 = vmax.f32 %v1857_v61, %v1581_v49  ;;  %v1900_v42 = vmax.f32 %v1899_v19, %v1694_v27  ;;  %v1585_v44 = vadd.f32 %v1584_v37, %v3084_v6  ;;  %v1698_v15 = vadd.f32 %v1697_v39, %v3087_v10 }
 0x2f7   : > { %v1838_v47 = vmax.f32 %v1837_v46, %v1583_v36  ;;  %v1880_v63 = vmax.f32 %v1879_v45, %v1696_v52 }
 0x2f8   : > { %v1859_v53 = vmax.f32 %v1858_v51, %v1585_v44  ;;  %v1901_v54 = vmax.f32 %v1900_v42, %v1698_v15 }
 0x2fa   : > { %v1588_v56 = vpop.f32.mrb[44].mxu1  ;;  %v1701_v57 = vpop.f32.mrb[60].mxu0 }
 0x2fb   : > { %v1589_v58 = vadd.f32 %v1588_v56, %v3078_v3  ;;  %v1702_v59 = vadd.f32 %v1701_v57, %v3081_v7  ;;  %v1590_v38 = vpop.f32.mrb[45].mxu1  ;;  %v1703_v41 = vpop.f32.mrb[61].mxu0 }
 0x2fc   : > { %v1591_v0 = vadd.f32 %v1590_v38, %v3084_v6  ;;  %v1704_v4 = vadd.f32 %v1703_v41, %v3087_v10  ;;  %v1592_v9 = vpop.f32.mrb[46].mxu1  ;;  %v1705_v25 = vpop.f32.mrb[62].mxu0 }
 0x2fd   : > { %v1839_v33 = vmax.f32 %v1838_v47, %v1589_v58  ;;  %v1881_v31 = vmax.f32 %v1880_v63, %v1702_v59  ;;  %v1593_v35 = vadd.f32 %v1592_v9, %v3078_v3  ;;  %v1706_v43 = vadd.f32 %v1705_v25, %v3081_v7  ;;  %v1594_v50 = vpop.f32.mrb[47].mxu1  ;;  %v1707_v55 = vpop.f32.mrb[63].mxu0 }
 0x2fe   : > { %v1860_v32 = vmax.f32 %v1859_v53, %v1591_v0  ;;  %v1902_v60 = vmax.f32 %v1901_v54, %v1704_v4  ;;  %v1595_v62 = vadd.f32 %v1594_v50, %v3084_v6  ;;  %v1708_v2 = vadd.f32 %v1707_v55, %v3087_v10 }
 0x2ff   : > { %v1840_v8 = vmax.f32 %v1839_v33, %v1593_v35  ;;  %v1882_v5 = vmax.f32 %v1881_v31, %v1706_v43 }
 0x300   : > { %v1861_v11 = vmax.f32 %v1860_v32, %v1595_v62  ;;  %v1903_v14 = vmax.f32 %v1902_v60, %v1708_v2 }
 0x302   : > { %v1598_v12 = vpop.f32.mrb[48].mxu1  ;;  %v1711_v18 = vpop.f32.mrb[64].mxu0 }
 0x303   : > { %v1599_v13 = vadd.f32 %v1598_v12, %v3078_v3  ;;  %v1712_v16 = vadd.f32 %v1711_v18, %v3081_v7  ;;  %v1600_v17 = vpop.f32.mrb[49].mxu1  ;;  %v1713_v61 = vpop.f32.mrb[65].mxu0 }
 0x304   : > { %v1601_v19 = vadd.f32 %v1600_v17, %v3084_v6  ;;  %v1714_v20 = vadd.f32 %v1713_v61, %v3087_v10  ;;  %v1602_v21 = vpop.f32.mrb[50].mxu1  ;;  %v1715_v23 = vpop.f32.mrb[66].mxu0 }
 0x305   : > { %v1841_v24 = vmax.f32 %v1840_v8, %v1599_v13  ;;  %v1883_v48 = vmax.f32 %v1882_v5, %v1712_v16  ;;  %v1603_v26 = vadd.f32 %v1602_v21, %v3078_v3  ;;  %v1716_v49 = vadd.f32 %v1715_v23, %v3081_v7  ;;  %v1604_v27 = vpop.f32.mrb[51].mxu1  ;;  %v1717_v29 = vpop.f32.mrb[67].mxu0 }
 0x306   : > { %v1862_v30 = vmax.f32 %v1861_v11, %v1601_v19  ;;  %v1904_v46 = vmax.f32 %v1903_v14, %v1714_v20  ;;  %v1605_v45 = vadd.f32 %v1604_v27, %v3084_v6  ;;  %v1718_v36 = vadd.f32 %v1717_v29, %v3087_v10 }
 0x307   : > { %v1842_v52 = vmax.f32 %v1841_v24, %v1603_v26  ;;  %v1884_v37 = vmax.f32 %v1883_v48, %v1716_v49 }
 0x308   : > { %v1863_v39 = vmax.f32 %v1862_v30, %v1605_v45  ;;  %v1905_v51 = vmax.f32 %v1904_v46, %v1718_v36 }
 0x30a   : > { %v1608_v42 = vpop.f32.mrb[52].mxu1  ;;  %v1721_v44 = vpop.f32.mrb[68].mxu0 }
 0x30b   : > { %v1609_v15 = vadd.f32 %v1608_v42, %v3078_v3  ;;  %v1722_v47 = vadd.f32 %v1721_v44, %v3081_v7  ;;  %v1610_v63 = vpop.f32.mrb[53].mxu1  ;;  %v1723_v53 = vpop.f32.mrb[69].mxu0 }
 0x30c   : > { %v1611_v54 = vadd.f32 %v1610_v63, %v3084_v6  ;;  %v1724_v56 = vadd.f32 %v1723_v53, %v3087_v10  ;;  %v1612_v57 = vpop.f32.mrb[54].mxu1  ;;  %v1725_v58 = vpop.f32.mrb[70].mxu0 }
 0x30d   : > { %v1843_v59 = vmax.f32 %v1842_v52, %v1609_v15  ;;  %v1885_v38 = vmax.f32 %v1884_v37, %v1722_v47  ;;  %v1613_v41 = vadd.f32 %v1612_v57, %v3078_v3  ;;  %v1726_v0 = vadd.f32 %v1725_v58, %v3081_v7  ;;  %v1614_v4 = vpop.f32.mrb[55].mxu1  ;;  %v1727_v9 = vpop.f32.mrb[71].mxu0 }
 0x30e   : > { %v1864_v25 = vmax.f32 %v1863_v39, %v1611_v54  ;;  %v1906_v33 = vmax.f32 %v1905_v51, %v1724_v56  ;;  %v1615_v31 = vadd.f32 %v1614_v4, %v3084_v6  ;;  %v1728_v35 = vadd.f32 %v1727_v9, %v3087_v10 }
 0x30f   : > { %v1844_v43 = vmax.f32 %v1843_v59, %v1613_v41  ;;  %v1886_v50 = vmax.f32 %v1885_v38, %v1726_v0 }
 0x310   : > { %v1865_v55 = vmax.f32 %v1864_v25, %v1615_v31  ;;  %v1907_v32 = vmax.f32 %v1906_v33, %v1728_v35 }
 0x312   : > { %v1618_v60 = vpop.f32.mrb[56].mxu1  ;;  %v1731_v62 = vpop.f32.mrb[72].mxu0 }
 0x313   : > { %v1619_v2 = vadd.f32 %v1618_v60, %v3078_v3  ;;  %v1732_v8 = vadd.f32 %v1731_v62, %v3081_v7  ;;  %v1620_v5 = vpop.f32.mrb[57].mxu1  ;;  %v1733_v11 = vpop.f32.mrb[73].mxu0 }
 0x314   : > { %v1621_v14 = vadd.f32 %v1620_v5, %v3084_v6  ;;  %v1734_v12 = vadd.f32 %v1733_v11, %v3087_v10  ;;  %v1622_v18 = vpop.f32.mrb[58].mxu1  ;;  %v1735_v13 = vpop.f32.mrb[74].mxu0 }
 0x315   : > { %v1845_v16 = vmax.f32 %v1844_v43, %v1619_v2  ;;  %v1887_v17 = vmax.f32 %v1886_v50, %v1732_v8  ;;  %v1623_v61 = vadd.f32 %v1622_v18, %v3078_v3  ;;  %v1736_v19 = vadd.f32 %v1735_v13, %v3081_v7  ;;  %v1624_v20 = vpop.f32.mrb[59].mxu1  ;;  %v1737_v21 = vpop.f32.mrb[75].mxu0 }
 0x316   : > { %v1866_v23 = vmax.f32 %v1865_v55, %v1621_v14  ;;  %v1908_v24 = vmax.f32 %v1907_v32, %v1734_v12  ;;  %v1625_v48 = vadd.f32 %v1624_v20, %v3084_v6  ;;  %v1738_v26 = vadd.f32 %v1737_v21, %v3087_v10 }
 0x317   : > { %v1846_v49 = vmax.f32 %v1845_v16, %v1623_v61  ;;  %v1888_v27 = vmax.f32 %v1887_v17, %v1736_v19  ;;  %v2389_v19 = vmov (!%p2216_p7), 1966171168   ;;  %v1930_v21 = vcombine.low (!%p2216_p7), %v3097_v1, %v3103_v40 }
 0x318   : > { %v1867_v29 = vmax.f32 %v1866_v23, %v1625_v48  ;;  %v1909_v30 = vmax.f32 %v1908_v24, %v1738_v26  ;;  %v1935_v20 = vunpack.c.l.s4 (!%p2216_p7), %v2389_v19  ;;  %v1931_v23 = vcombine.low (!%p2216_p7), %v3099_v22, %v3105_v34 }
 0x31a   : > { %v1628_v46 = vpop.f32.mrb[60].mxu1  ;;  %v1936_v26 = vunpack.c.0.s8 (!%p2216_p7), %v1935_v20 }
 0x31b   : > { %v1629_v45 = vadd.f32 %v1628_v46, %v3078_v3  ;;  %v1630_v36 = vpop.f32.mrb[61].mxu1 }
 0x31c   : > { %v1631_v52 = vadd.f32 %v1630_v36, %v3084_v6  ;;  %v1632_v37 = vpop.f32.mrb[62].mxu1 }
 0x31d   : > { %v1847_v39 = vmax.f32 %v1846_v49, %v1629_v45  ;;  %v1633_v51 = vadd.f32 %v1632_v37, %v3078_v3  ;;  %v1634_v42 = vpop.f32.mrb[63].mxu1  ;;  %v1939_v49 = vsub.s32 (!%p2216_p7), %v1936_v26, %v2533_v28 }
 0x31e   : > { %v1868_v44 = vmax.f32 %v1867_v29, %v1631_v52  ;;  %v1635_v15 = vadd.f32 %v1634_v42, %v3084_v6 }
 0x31f   : > { %v1848_v47 = vmax.f32 %v1847_v39, %v1633_v51  ;;  %v1947_v29 = vrot.slane (!%p2216_p7), %v1931_v23, %v1939_v49 }
 0x320   : > { %v1869_v63 = vmax.f32 %v1868_v44, %v1635_v15 }
 0x321   : > { %v1849_v53 = vrot.slane %v1848_v47, 4 }
 0x322   : > { %v1870_v54 = vrot.slane %v1869_v63, 4  ;;  %v1741_v56 = vpop.f32.mrb[64].mxu1 }
 0x323   : > { %v1850_v57 = vmax.f32 %v1848_v47, %v1849_v53  ;;  %v1742_v58 = vadd.f32 %v1741_v56, %v3081_v7  ;;  %v1743_v59 = vpop.f32.mrb[65].mxu1 }
 0x324   : > { %v1871_v38 = vmax.f32 %v1869_v63, %v1870_v54  ;;  %v1744_v41 = vadd.f32 %v1743_v59, %v3087_v10  ;;  %v1745_v0 = vpop.f32.mrb[66].mxu1 }
 0x325   : > { %v1851_v4 = vrot.slane %v1850_v57, 2  ;;  %v1889_v9 = vmax.f32 %v1888_v27, %v1742_v58  ;;  %v1746_v3 = vadd.f32 %v1745_v0, %v3081_v7  ;;  %v1747_v25 = vpop.f32.mrb[67].mxu1  ;;  %v1940_v27 = vrot.slane (!%p2216_p7), %v1930_v21, %v1939_v49 }
 0x326   : > { %v1872_v33 = vrot.slane %v1871_v38, 2  ;;  %v1910_v6 = vmax.f32 %v1909_v30, %v1744_v41  ;;  %v1748_v31 = vadd.f32 %v1747_v25, %v3087_v10 }
 0x327   : > { %v1852_v35 = vmax.f32 %v1850_v57, %v1851_v4  ;;  %v1890_v43 = vmax.f32 %v1889_v9, %v1746_v3  ;;  %v1962_v45 = vcombine.low (!%p2216_p7), %v1940_v27, %v1947_v29 }
 0x328   : > { %v1873_v50 = vmax.f32 %v1871_v38, %v1872_v33  ;;  %v1911_v55 = vmax.f32 %v1910_v6, %v1748_v31 }
 0x329   : > { %v1853_v32 = vrot.slane %v1852_v35, 1  ;;  %v1891_v60 = vrot.slane %v1890_v43, 4  ;;  %v1970_v52 = vrot.slane (!%p2216_p7), %v1962_v45, %v1939_v49 }
 0x32a   : > { %v1874_v62 = vrot.slane %v1873_v50, 1  ;;  %v1912_v2 = vrot.slane %v1911_v55, 4 }
 0x32b   : > { %v1854_v8 = vmax.f32 %v1852_v35, %v1853_v32  ;;  %v1892_v5 = vmax.f32 %v1890_v43, %v1891_v60 }
 0x32c   : > { %v1875_v11 = vmax.f32 %v1873_v50, %v1874_v62  ;;  %v1913_v14 = vmax.f32 %v1911_v55, %v1912_v2 }
 0x32d   : > { %v1893_v12 = vrot.slane %v1892_v5, 2 }
 0x32e   : > { %v1914_v18 = vrot.slane %v1913_v14, 2  ;;  %1921 = sbr.rel (%p2216_p7) target bundleno = 833 (0x341), region = 52  ;;  %v1932_v24 = vcombine.low (!%p2216_p7), %v1854_v8, %v1875_v11 }
 0x32f   : > { %v1894_v7 = vmax.f32 %v1892_v5, %v1893_v12 }
 0x330   : > { %v1915_v13 = vmax.f32 %v1913_v14, %v1914_v18  ;;  %v1954_v30 = vrot.slane (!%p2216_p7), %v1932_v24, %v1939_v49 }
 0x331   : > { %v1895_v16 = vrot.slane %v1894_v7, 1 }
 0x332   : > { %v1916_v17 = vrot.slane %v1915_v13, 1 }
 0x333   : > { %v1896_v61 = vmax.f32 %v1894_v7, %v1895_v16 }
 0x334   : > { %v1917_v10 = vmax.f32 %v1915_v13, %v1916_v17 }
 0x336   : > { %v1933_v48 = vcombine.low %v1896_v61, %v1917_v10 }
 0x338   : > { %v1961_v46 = vrot.slane %v1933_v48, %v1939_v49 }
 0x33a   : > { %v1963_v36 = vcombine.low %v1954_v30, %v1961_v46 }
 0x33c   : > { %v1977_v37 = vrot.slane %v1963_v36, %v1939_v49 }
 0x33e   : > { %v1978_v39 = vcombine.low %v1970_v52, %v1977_v37 }
 0x340   : > { %1980 = vst [vmem:[%s2479_s18] sm:$0xff] %v1978_v39 }
 0x341 PF: > { %p2217_p8 = scmp.le.s32.totalorder %s2368_s24, 0 }
 0x342   : > { %v2390_v51 = vmov (!%p2217_p8), 1966171168   ;;  %v1994_v44 = vcombine.low (!%p2217_p8), %v3097_v1, %v3103_v40  ;;  %v1995_v15 = vcombine.low (!%p2217_p8), %v3099_v22, %v3105_v34  ;;  %v1996_v47 = vcombine.low (!%p2217_p8), %v1854_v8, %v1875_v11 }
 0x343   : > { %1984 = sbr.rel (%p2217_p8) target bundleno = 852 (0x354), region = 56  ;;  %v1999_v42 = vunpack.c.l.s4 (!%p2217_p8), %v2390_v51  ;;  %v1997_v63 = vcombine.low (!%p2217_p8), %v1896_v61, %v1917_v10 }
 0x345   : > { %v2000_v53 = vunpack.c.0.s8 (!%p2217_p8), %v1999_v42 }
 0x347   : > { %v2003_v54 = vsub.s32 (!%p2217_p8), %v2000_v53, %v2533_v28  ;;  %v1985_v9 = vld [vmem:[%s2479_s18] sm:$0xff] (!%p2217_p8) }
 0x349   : > { %v2004_v56 = vrot.slane (!%p2217_p8), %v1994_v44, %v2003_v54  ;;  %v2011_v57 = vrot.slane (!%p2217_p8), %v1995_v15, %v2003_v54  ;;  %v2018_v58 = vrot.slane (!%p2217_p8), %v1996_v47, %v2003_v54  ;;  %v2025_v59 = vrot.slane (!%p2217_p8), %v1997_v63, %v2003_v54 }
 0x34b   : > { %v2026_v38 = vcombine.low %v2004_v56, %v2011_v57  ;;  %v2027_v41 = vcombine.low %v2018_v58, %v2025_v59 }
 0x34d   : > { %v2034_v0 = vrot.slane %v2026_v38, %v2003_v54  ;;  %v2041_v4 = vrot.slane %v2027_v41, %v2003_v54 }
 0x34f   : > { %v2042_v3 = vcombine.low %v2034_v0, %v2041_v4 }
 0x351   : > { %v2044_v1 = vmax.f32 %v1985_v9, %v2042_v3 }
 0x353   : > { %2045 = vst [vmem:[%s2479_s18] sm:$0xff] %v2044_v1 }
 0x354 PF: > { %s17_s28 = sadd.s32 1, %s2384_s28   ;;  %s3199_s24 = smov %s2376_s26 }
 0x355   : > { %p14_p9 = scmp.ge.s32.totalorder %s17_s28, 6   ;;  %s3200_s25 = smov %s2380_s27 }
 0x356   : > { %s3201_s26 = smov %s3204_s29  ;;  %s3202_s27 = smov %s3208_s30 }
 0x357   :  { %16 = sbr.rel (!%p14_p9) target bundleno = 3 (0x3), region = 89 }

// kernel: pointnetfeat_forward.3
= control target key start
LH: loop header
LB: loop body
LE: loop exit
PB: predicated region body
PF: predicated region fallthrough
CT: control target
= control target key end

     0   :  { %s2529_s24 = smov 0   ;;  %s2531_s25 = smov 0   ;;  %s3284_s0 = inlined_call_operand.vmem [shape: f32[2,256,3], index: 0, kind: input, shape index: {}]   ;;  %s3285_s1 = inlined_call_operand.vmem [shape: f32[1,3,64], index: 1, kind: input, shape index: {}]   ;;  %s3286_s2 = inlined_call_operand.vmem [shape: f32[1,64], index: 2, kind: input, shape index: {}]   ;;  %s3287_s3 = inlined_call_operand.vmem [shape: bf16[64,128], index: 3, kind: input, shape index: {}]   ;;  %s3288_s4 = inlined_call_operand.vmem [shape: f32[1,128], index: 4, kind: input, shape index: {}]   ;;  %s3289_s5 = inlined_call_operand.vmem [shape: bf16[128,1024], index: 5, kind: input, shape index: {}]   ;;  %s3290_s6 = inlined_call_operand.vmem [shape: f32[1,1024], index: 6, kind: input, shape index: {}]   ;;  %s3291_s7 = inlined_call_operand.vmem [shape: f32[2,1,1024], index: 7, kind: output, shape index: {}]  }
   0x1   :  { %s2533_s26 = smov 0   ;;  %s2535_s27 = smov 0  }
   0x2   :  { %s2537_s28 = smov 0  }
   0x3 LB: > { %s26_s29 = sadd.s32 1, %s2474_s26  ;;  %s29_s30 = sadd.s32 1, %s2478_s27  ;;  %s2482_s28 = sphi %s2537_s28, %s17_s28   ;;  %s2478_s27 = sphi %s2535_s27, %s3295_s27   ;;  %s2474_s26 = sphi %s2533_s26, %s3294_s26   ;;  %s2470_s25 = sphi %s2531_s25, %s3293_s25   ;;  %s2466_s24 = sphi %s2529_s24, %s3292_s24  }
   0x4   : > { %p27_p0 = scmp.ge.s32.totalorder %s26_s29, 2  ;;  %p2231_p1 = scmp.ge.s32.totalorder %s2482_s28, 1 }
   0x5   : > { %p256_p2 = scmp.lt.s32.totalorder %s2482_s28, 5 }
   0x6   : > { %s3297_s29 = smov (%p27_p0, %s26_s29), 0  ;;  %s3299_s30 = smov (!%p27_p0, %s29_s30), %s2478_s27 }
   0x7   : > { %p257_p3 = pnand %p2231_p1, %p256_p2  ;;  %p31_p4 = scmp.ge.s32.totalorder %s3299_s30, 2 }
   0x8   : > { %s2232_s8 = sshll.u32 (!%p257_p3), %s2466_s24, 4  ;;  %p292_p5 = scmp.lt.s32.totalorder (!%p257_p3), %s2470_s25, 1  ;;  %v2484_v0 = vmov (!%p257_p3), 1   ;;  %v2485_v1 = vmov (!%p257_p3), 0   ;;  %v2486_v7 = vmov (!%p257_p3), 2   ;;  %v2440_v9 = vld [vmem:[%s3287_s3] sm:$0xff] (!%p257_p3)   ;;  %v403_v25 = vlaneseq (!%p257_p3) }
   0x9   : > { %s3301_s30 = smov (%p31_p4, %s3299_s30), 0  ;;  %260 = sbr.rel (%p257_p3) target bundleno = 854 (0x356), region = 48 }
   0xa   : > { %2416 = vset.pattern.permute.xlu1 (!%p257_p3), %v2484_v0  ;;  %2415 = vset.pattern.permute.xlu0 (!%p257_p3), %v2485_v1  ;;  %p294_p6 = scmp.lt.s32.totalorder (!%p257_p3), %s2232_s8, 31  ;;  %v2441_v10 = vld [vmem:[%s3287_s3 + $0x8] sm:$0xff] (!%p257_p3)   ;;  %v2442_v12 = vld [vmem:[%s3287_s3 + $0x10] sm:$0xff] (!%p257_p3)   ;;  %v2443_v14 = vld [vmem:[%s3287_s3 + $0x18] sm:$0xff] (!%p257_p3)   ;;  %v2626_v28 = vshrl.u32 (!%p257_p3), %v403_v25, 7  ;;  %vm709_vm0 = vcmask (!%p257_p3), 523264  }
   0xb   : > { %1313 = vmatprep.mubr.bf16.mxu1 (!%p257_p3), %v2485_v1  ;;  %2330 = vmatprep.subr.bf16.mxu0 (!%p257_p3), %v2440_v9  ;;  %v322_v33 = vld [vmem:[%s3285_s1] sm:$0x7] (!%p257_p3)  ;;  %v2643_v38 = vld [vmem:[%s3289_s5 + $0x8] sm:$0xff] (!%p257_p3)  ;;  %p2314_p7 = scmp.ne.s32.totalorder (!%p257_p3), %s2466_s24, 0 }
   0xc   : > { %2331 = vmatpush3.bf16.msra.mxu0 (!%p257_p3), %v2440_v9  ;;  %v489_v31 = vsub.s32 (!%p257_p3), 1, %v2626_v28  ;;  %v405_v32 = vsub.s32 (!%p257_p3), 0, %v2626_v28  ;;  %v589_v35 = vsub.s32 (!%p257_p3), 2, %v2626_v28  ;;  %v855_v36 = vld [vmem:[%s3289_s5] sm:$0xff] (!%p257_p3)  ;;  %v2648_v41 = vld [vmem:[%s3289_s5 + $0x28] sm:$0xff] (!%p257_p3) }
   0xd   : > { %2332 = vmatprep.subr.bf16.mxu0 (!%p257_p3), %v2441_v10  ;;  %v859_v37 = vld [vmem:[%s3289_s5 + $0x20] sm:$0xff] (!%p257_p3)  ;;  %v2253_v47 = vcombine.high (!%p257_p3), %v2643_v38, %v2648_v41 }
   0xe   : > { %v2251_v40 = vcombine.high (!%p257_p3), %v855_v36, %v859_v37  ;;  %v2250_v42 = vcombine.low (!%p257_p3), %v855_v36, %v859_v37  ;;  %v863_v43 = vld [vmem:[%s3289_s5 + $0x40] sm:$0xff] (!%p257_p3)  ;;  %v2658_v45 = vrot.slane (!%p257_p3), %v322_v33, %v489_v31  ;;  %v2662_v46 = vrot.slane (!%p257_p3), %v322_v33, %v405_v32 }
   0xf   : > { %v867_v44 = vld [vmem:[%s3289_s5 + $0x60] sm:$0xff] (!%p257_p3)  ;;  %v2676_v52 = vrot.slane (!%p257_p3), %v322_v33, %v589_v35 }
  0x10   : > { %s3303_s25 = smov (!%p292_p5, %s2470_s25), 1  ;;  %s3305_s8 = smov (!%p294_p6, %s2232_s8), 31  ;;  %2333 = vmatpush3.bf16.msra.mxu0 %v2441_v10  ;;  %v2259_v48 = vcombine.high %v863_v43, %v867_v44  ;;  %v871_v49 = vld [vmem:[%s3289_s5 + $0x80] sm:$0xff]  ;;  %1281 = vmatprep.subr.bf16.mxu1 %v2251_v40  ;;  %v2258_v53 = vcombine.low %v863_v43, %v867_v44  ;;  %v864_v44 = vld [vmem:[%s3289_s5 + $0x48] sm:$0xff] }
  0x11   : > { %s2233_s9 = sshll.u32 %s3303_s25, 5  ;;  %s2235_s10 = sshll.u32 %s3303_s25, 3  ;;  %2334 = vmatprep.subr.bf16.mxu0 %v2442_v12  ;;  %v875_v50 = vld [vmem:[%s3289_s5 + $0xa0] sm:$0xff]  ;;  %1282 = vmatpush1.bf16.msra.mxu1 %v2250_v42 }
  0x12   : > { %s297_s11 = sadd.s32 %s2233_s9, %s3305_s8  ;;  %s2568_s14 = scalar_lea.vmem %s3291_s7, %s2235_s10  ;;  %1283 = vmatprep.subr.bf16.mxu1 %v2259_v48  ;;  %v2267_v56 = vcombine.high %v871_v49, %v875_v50  ;;  %v879_v60 = vld [vmem:[%s3289_s5 + $0xc0] sm:$0xff] }
  0x13   : > { %s2234_s15 = sshll.u32 %s297_s11, 3  ;;  %v883_v61 = vld [vmem:[%s3289_s5 + $0xe0] sm:$0xff] }
  0x14   : > { %s2573_s18 = scalar_lea.vmem %s3284_s0, %s2234_s15  ;;  %2335 = vmatpush3.bf16.msra.mxu0 %v2442_v12  ;;  %v891_v9 = vld [vmem:[%s3289_s5 + $0x120] sm:$0xff] }
  0x15   : > { %v306_v2 = vld [vmem:[%s2573_s18] sm:$0xff]  ;;  %v307_v3 = vld [vmem:[%s2573_s18 + $0x8] sm:$0xff]  ;;  %v308_v4 = vld [vmem:[%s2573_s18 + $0x10] sm:$0xff]  ;;  %2336 = vmatprep.subr.bf16.mxu0 %v2443_v14  ;;  %1284 = vmatpush1.bf16.msra.mxu1 %v2258_v53 }
  0x16   : > { %424 = vperm.xlu1 %2416, %v306_v2   ;;  %325 = vperm.xlu0 %2415, %v306_v2   ;;  %v309_v5 = vld [vmem:[%s2573_s18 + $0x18] sm:$0xff]  ;;  %v311_v6 = vld [vmem:[%s2573_s18 + $0x28] sm:$0xff]  ;;  %v312_v8 = vld [vmem:[%s2573_s18 + $0x30] sm:$0xff] }
  0x17   : > { %v310_v11 = vld [vmem:[%s2573_s18 + $0x20] sm:$0xff]  ;;  %v313_v13 = vld [vmem:[%s2573_s18 + $0x38] sm:$0xff]  ;;  %v315_v15 = vld [vmem:[%s2573_s18 + $0x48] sm:$0xff]  ;;  %1285 = vmatprep.subr.bf16.mxu1 %v2267_v56 }
  0x18   : > { %2337 = vmatpush3.bf16.msra.mxu0 %v2443_v14  ;;  %v316_v16 = vld [vmem:[%s2573_s18 + $0x50] sm:$0xff]  ;;  %v318_v17 = vld [vmem:[%s2573_s18 + $0x60] sm:$0xff]  ;;  %v319_v18 = vld [vmem:[%s2573_s18 + $0x68] sm:$0xff] }
  0x19   : > { %v314_v19 = vld [vmem:[%s2573_s18 + $0x40] sm:$0xff]  ;;  %v320_v20 = vld [vmem:[%s2573_s18 + $0x70] sm:$0xff]  ;;  %v317_v21 = vld [vmem:[%s2573_s18 + $0x58] sm:$0xff]  ;;  %1394 = vmatprep.subr.bf16.mxu0 %v2253_v47 }
  0x1a   : > { %428 = vperm.xlu1 %2416, %v307_v3   ;;  %330 = vperm.xlu0 %2415, %v307_v3   ;;  %v321_v22 = vld [vmem:[%s2573_s18 + $0x78] sm:$0xff]  ;;  %v868_v47 = vld [vmem:[%s3289_s5 + $0x68] sm:$0xff] }
  0x1e   : > { %2417 = vset.pattern.permute.xlu1 %v2485_v1  ;;  %335 = vperm.xlu0 %2415, %v308_v4  }
  0x1f   : > { %340 = vperm.xlu1 %2417, %v309_v5  }
  0x22   : > { %2418 = vset.pattern.permute.xlu0 %v2484_v0 }
  0x23   : > { %2419 = vset.pattern.permute.xlu1 %v2484_v0  ;;  %432 = vperm.xlu0 %2418, %v308_v4  }
  0x24   : > { %436 = vperm.xlu1 %2419, %v309_v5  }
  0x27   : > { %444 = vperm.xlu0 %2418, %v311_v6  }
  0x28   : > { %2420 = vset.pattern.permute.xlu1 %v2486_v7 }
  0x29   : > { %524 = vperm.xlu1 %2420, %v306_v2  }
  0x2b   : > { %448 = vperm.xlu0 %2418, %v312_v8  }
  0x2d   : > { %532 = vperm.xlu1 %2420, %v308_v4  }
  0x2f   : > { %2424 = vset.pattern.permute.xlu0 %v2486_v7 }
  0x30   : > { %528 = vperm.xlu0 %2424, %v307_v3   ;;  %v2275_v3 = vcombine.high %v879_v60, %v883_v61 }
  0x31   : > { %536 = vperm.xlu1 %2420, %v309_v5  }
  0x34   : > { %540 = vperm.xlu0 %2424, %v310_v11  }
  0x35   : > { %2421 = vset.pattern.permute.xlu1 %v2485_v1 }
  0x36   : > { %350 = vperm.xlu1 %2421, %v311_v6  }
  0x38   : > { %552 = vperm.xlu0 %2424, %v313_v13  }
  0x3a   : > { %2422 = vset.pattern.permute.xlu1 %v2484_v0 }
  0x3b   : > { %440 = vperm.xlu1 %2422, %v310_v11  }
  0x3c   : > { %560 = vperm.xlu0 %2424, %v315_v15  }
  0x3f   : > { %2423 = vset.pattern.permute.xlu1 %v2485_v1 }
  0x40   : > { %355 = vperm.xlu1 %2423, %v312_v8   ;;  %2432 = vset.pattern.permute.xlu0 %v2485_v1 }
  0x41   : > { %345 = vperm.xlu0 %2432, %v310_v11  }
  0x44   : > { %360 = vperm.xlu1 %2423, %v313_v13  }
  0x45   : > { %370 = vperm.xlu0 %2432, %v315_v15  }
  0x48   : > { %2425 = vset.pattern.permute.xlu1 %v2484_v0 }
  0x49   : > { %452 = vperm.xlu1 %2425, %v313_v13   ;;  %375 = vperm.xlu0 %2432, %v316_v16   ;;  %v2274_v13 = vcombine.low %v879_v60, %v883_v61  ;;  %v876_v60 = vld [vmem:[%s3289_s5 + $0xa8] sm:$0xff] }
  0x4d   : > { %2426 = vset.pattern.permute.xlu1 %v2486_v7  ;;  %385 = vperm.xlu0 %2432, %v318_v17  }
  0x4e   : > { %544 = vperm.xlu1 %2426, %v311_v6  }
  0x51   : > { %2433 = vset.pattern.permute.xlu0 %v2484_v0 }
  0x52   : > { %548 = vperm.xlu1 %2426, %v312_v8   ;;  %464 = vperm.xlu0 %2433, %v316_v16   ;;  %v887_v8 = vld [vmem:[%s3289_s5 + $0x100] sm:$0xff] }
  0x56   : > { %2427 = vset.pattern.permute.xlu1 %v2485_v1  ;;  %476 = vperm.xlu0 %2433, %v319_v18  }
  0x57   : > { %365 = vperm.xlu1 %2427, %v314_v19  }
  0x5a   : > { %480 = vperm.xlu0 %2433, %v320_v20  }
  0x5b   : > { %2428 = vset.pattern.permute.xlu1 %v2484_v0 }
  0x5c   : > { %456 = vperm.xlu1 %2428, %v314_v19  }
  0x5e   : > { %2438 = vset.pattern.permute.xlu0 %v2486_v7 }
  0x5f   : > { %572 = vperm.xlu0 %2438, %v318_v17  }
  0x60   : > { %460 = vperm.xlu1 %2428, %v315_v15   ;;  %v2705_v15 = vld [vmem:[%s3286_s2] ss:$0 sm:$0xff] }
  0x63   : > { %584 = vperm.xlu0 %2438, %v321_v22  }
  0x64   : > { %2429 = vset.pattern.permute.xlu1 %v2485_v1 }
  0x65   : > { %380 = vperm.xlu1 %2429, %v317_v21  }
  0x69   : > { %2430 = vset.pattern.permute.xlu1 %v2484_v0 }
  0x6a   : > { %468 = vperm.xlu1 %2430, %v317_v21  }
  0x6e   : > { %2431 = vset.pattern.permute.xlu1 %v2486_v7 }
  0x6f   : > { %556 = vperm.xlu1 %2431, %v314_v19  }
  0x73   : > { %564 = vperm.xlu1 %2431, %v316_v16  }
  0x77   : > { %568 = vperm.xlu1 %2431, %v317_v21  }
  0x7b   : > { %2434 = vset.pattern.permute.xlu1 %v2485_v1 }
  0x7c   : > { %390 = vperm.xlu1 %2434, %v319_v18  }
  0x80   : > { %2435 = vset.pattern.permute.xlu1 %v2484_v0 }
  0x81   : > { %472 = vperm.xlu1 %2435, %v318_v17  }
  0x85   : > { %2436 = vset.pattern.permute.xlu1 %v2485_v1 }
  0x86   : > { %395 = vperm.xlu1 %2436, %v320_v20  }
  0x8a   : > { %400 = vperm.xlu1 %2436, %v321_v22  }
  0x8e   : > { %2437 = vset.pattern.permute.xlu1 %v2484_v0  ;;  %v2266_v0 = vcombine.low %v871_v49, %v875_v50 }
  0x8f   : > { %484 = vperm.xlu1 %2437, %v321_v22   ;;  %v895_v22 = vld [vmem:[%s3289_s5 + $0x140] sm:$0xff] }
  0x90   : > { %1286 = vmatpush1.bf16.msra.mxu1 %v2266_v0  ;;  %v884_v0 = vld [vmem:[%s3289_s5 + $0xe8] sm:$0xff] }
  0x91   : > { %1287 = vmatprep.subr.bf16.mxu1 %v2275_v3 }
  0x93   : > { %2439 = vset.pattern.permute.xlu1 %v2486_v7 }
  0x94   : > { %576 = vperm.xlu1 %2439, %v319_v18   ;;  %v2283_v18 = vcombine.high %v887_v8, %v891_v9  ;;  %1288 = vmatpush1.bf16.msra.mxu1 %v2274_v13  ;;  %v896_v13 = vld [vmem:[%s3289_s5 + $0x148] sm:$0xff] }
  0x95   : > { %v425_v23 = vpop.permute.xlu1 %424  ;;  %v326_v24 = vpop.permute.xlu0 %325 }
  0x96   : > { %v491_v57 = vmul.f32 %v2658_v45, %v425_v23  ;;  %v407_v58 = vmul.f32 %v2662_v46, %v326_v24  ;;  %v899_v23 = vld [vmem:[%s3289_s5 + $0x160] sm:$0xff]  ;;  %1289 = vmatprep.subr.bf16.mxu1 %v2283_v18 }
  0x97   : > { %v2291_v36 = vcombine.high %v895_v22, %v899_v23  ;;  %v2290_v48 = vcombine.low %v895_v22, %v899_v23 }
  0x98   : > { %580 = vperm.xlu1 %2439, %v320_v20   ;;  %v507_v4 = vadd.f32 %v491_v57, %v407_v58  ;;  %v2261_v57 = vcombine.high %v864_v44, %v868_v47 }
  0x99   : > { %v429_v26 = vpop.permute.xlu1 %428  ;;  %v331_v27 = vpop.permute.xlu0 %330 }
  0x9a   : > { %v492_v5 = vmul.f32 %v2658_v45, %v429_v26  ;;  %v408_v6 = vmul.f32 %v2662_v46, %v331_v27 }
  0x9c   : > { %v508_v19 = vadd.f32 %v492_v5, %v408_v6  ;;  %v888_v6 = vld [vmem:[%s3289_s5 + $0x108] sm:$0xff] }
  0x9d   : > { %v336_v29 = vpop.permute.xlu0 %335 }
  0x9e   : > { %v341_v30 = vpop.permute.xlu1 %340  ;;  %v409_v54 = vmul.f32 %v2662_v46, %v336_v29  ;;  %v2282_v29 = vcombine.low %v887_v8, %v891_v9 }
  0x9f   : > { %v410_v14 = vmul.f32 %v2662_v46, %v341_v30 }
  0xa0   : > { %1290 = vmatpush1.bf16.msra.mxu1 %v2282_v29 }
  0xa1   : > { %1291 = vmatprep.subr.bf16.mxu1 %v2291_v36 }
  0xa2   : > { %v433_v34 = vpop.permute.xlu0 %432 }
  0xa3   : > { %v437_v39 = vpop.permute.xlu1 %436  ;;  %v493_v55 = vmul.f32 %v2658_v45, %v433_v34 }
  0xa4   : > { %v494_v10 = vmul.f32 %v2658_v45, %v437_v39  ;;  %1292 = vmatpush1.bf16.msra.mxu1 %v2290_v48 }
  0xa5   : > { %v509_v2 = vadd.f32 %v493_v55, %v409_v54  ;;  %v2252_v55 = vcombine.low %v2643_v38, %v2648_v41  ;;  %v2260_v38 = vcombine.low %v864_v44, %v868_v47 }
  0xa6   : > { %v2672_v51 = vpop.permute.xlu0 %444  ;;  %v510_v24 = vadd.f32 %v494_v10, %v410_v14  ;;  %v900_v14 = vld [vmem:[%s3289_s5 + $0x168] sm:$0xff] }
  0xa7   : > { %v496_v22 = vmul.f32 %v2658_v45, %v2672_v51  ;;  %v2292_v29 = vcombine.low %v896_v13, %v900_v14 }
  0xa8   : > { %v525_v59 = vpop.permute.xlu1 %524 }
  0xa9   : > { %v591_v62 = vmul.f32 %v2676_v52, %v525_v59  ;;  %v872_v59 = vld [vmem:[%s3289_s5 + $0x88] sm:$0xff] }
  0xaa   : > { %v2689_v63 = vpop.permute.xlu0 %448  ;;  %v2269_v41 = vcombine.high %v872_v59, %v876_v60  ;;  %v2268_v3 = vcombine.low %v872_v59, %v876_v60 }
  0xab   : > { %v607_v12 = vadd.f32 %v591_v62, %v507_v4  ;;  %v880_v62 = vld [vmem:[%s3289_s5 + $0xc8] sm:$0xff] }
  0xac   : > { %v533_v7 = vpop.permute.xlu1 %532  ;;  %v2277_v5 = vcombine.high %v880_v62, %v884_v0  ;;  %v2276_v10 = vcombine.low %v880_v62, %v884_v0 }
  0xad   : > { %v593_v11 = vmul.f32 %v2676_v52, %v533_v7  ;;  %v630_v27 = vadd.f32 %v2705_v15, %v607_v12  ;;  %v892_v7 = vld [vmem:[%s3289_s5 + $0x128] sm:$0xff] }
  0xaf   : > { %v609_v16 = vadd.f32 %v593_v11, %v509_v2  ;;  %v529_v17 = vpop.permute.xlu0 %528  ;;  %v646_v42 = vmax.f32 %v630_v27, 0.0  ;;  %v2285_v11 = vcombine.high %v888_v6, %v892_v7 }
  0xb0   : > { %v592_v20 = vmul.f32 %v2676_v52, %v529_v17  ;;  %v537_v21 = vpop.permute.xlu1 %536 }
  0xb1   : > { %v594_v25 = vmul.f32 %v2676_v52, %v537_v21  ;;  %v632_v30 = vadd.f32 %v2705_v15, %v609_v16  ;;  %v2293_v21 = vcombine.high %v896_v13, %v900_v14 }
  0xb2   : > { %v608_v26 = vadd.f32 %v592_v20, %v508_v19  ;;  %v2284_v19 = vcombine.low %v888_v6, %v892_v7 }
  0xb3   : > { %v610_v33 = vadd.f32 %v594_v25, %v510_v24  ;;  %v541_v34 = vpop.permute.xlu0 %540  ;;  %v648_v49 = vmax.f32 %v632_v30, 0.0 }
  0xb4   : > { %v631_v37 = vadd.f32 %v2705_v15, %v608_v26  ;;  %v595_v16 = vmul.f32 %v2676_v52, %v541_v34 }
  0xb5   : > { %v633_v39 = vadd.f32 %v2705_v15, %v610_v33  ;;  %v351_v40 = vpop.permute.xlu1 %350  ;;  %v497_v33 = vmul.f32 %v2658_v45, %v2689_v63 }
  0xb6   : > { %v647_v43 = vmax.f32 %v631_v37, 0.0  ;;  %v412_v23 = vmul.f32 %v2662_v46, %v351_v40 }
  0xb7   : > { %v649_v50 = vmax.f32 %v633_v39, 0.0  ;;  %v553_v53 = vpop.permute.xlu0 %552 }
  0xb8   : > { %v662_v54 = vpack.c.bf16 %v647_v43, %v646_v42  ;;  %v598_v25 = vmul.f32 %v2676_v52, %v553_v53  ;;  %v512_v34 = vadd.f32 %v496_v22, %v412_v23 }
  0xb9   : > { %v663_v56 = vpack.c.bf16 %v649_v50, %v648_v49 }
  0xba   : > { %v441_v58 = vpop.permute.xlu1 %440  ;;  %2338 = vmatprep.mubr.msk.bf16.mxu0 %vm709_vm0, %v662_v54 }
  0xbb   : > { %2339 = vmatmul.mubr.msk.bf16.vlgmr.msra.gmra.mrb[0].mxu0 %vm709_vm0, %v663_v56  ;;  %v2735_v61 = vpop.permute.xlu0 %560  ;;  %v495_v12 = vmul.f32 %v2658_v45, %v441_v58 }
  0xbc   : > { %1395 = vmatpush1.bf16.msra.mxu0 %v2252_v55 }
  0xbd   : > { %1396 = vmatprep.subr.bf16.mxu0 %v2261_v57 }
  0xbf   : > { %v356_v2 = vpop.permute.xlu1 %355 }
  0xc0   : > { %1397 = vmatpush1.bf16.msra.mxu0 %v2260_v38  ;;  %v346_v4 = vpop.permute.xlu0 %345  ;;  %v413_v36 = vmul.f32 %v2662_v46, %v356_v2 }
  0xc1   : > { %1398 = vmatprep.subr.bf16.mxu0 %v2269_v41  ;;  %v411_v9 = vmul.f32 %v2662_v46, %v346_v4  ;;  %v600_v4 = vmul.f32 %v2676_v52, %v2735_v61 }
  0xc2   : > { %v513_v43 = vadd.f32 %v497_v33, %v413_v36 }
  0xc3   : > { %v361_v8 = vpop.permute.xlu1 %360  ;;  %v511_v17 = vadd.f32 %v495_v12, %v411_v9 }
  0xc4   : > { %1399 = vmatpush1.bf16.msra.mxu0 %v2268_v3  ;;  %v414_v24 = vmul.f32 %v2662_v46, %v361_v8  ;;  %v371_v59 = vpop.permute.xlu0 %370 }
  0xc5   : > { %1400 = vmatprep.subr.bf16.mxu0 %v2277_v5  ;;  %v611_v26 = vadd.f32 %v595_v16, %v511_v17  ;;  %v416_v3 = vmul.f32 %v2662_v46, %v371_v59 }
  0xc7   : > { %v634_v37 = vadd.f32 %v2705_v15, %v611_v26 }
  0xc8   : > { %v453_v18 = vpop.permute.xlu1 %452  ;;  %1401 = vmatpush1.bf16.msra.mxu0 %v2276_v10  ;;  %v376_v38 = vpop.permute.xlu0 %375 }
  0xc9   : > { %v498_v20 = vmul.f32 %v2658_v45, %v453_v18  ;;  %1402 = vmatprep.subr.bf16.mxu0 %v2285_v11  ;;  %v650_v48 = vmax.f32 %v634_v37, 0.0  ;;  %v417_v11 = vmul.f32 %v2662_v46, %v376_v38  ;;  %v908_v38 = vld [vmem:[%s3289_s5 + $0x1a8] sm:$0xff] }
  0xcb   : > { %v514_v27 = vadd.f32 %v498_v20, %v414_v24 }
  0xcc   : > { %1403 = vmatpush1.bf16.msra.mxu0 %v2284_v19  ;;  %v386_v0 = vpop.permute.xlu0 %385 }
  0xcd   : > { %v545_v30 = vpop.permute.xlu1 %544  ;;  %1404 = vmatprep.subr.bf16.mxu0 %v2293_v21  ;;  %v614_v39 = vadd.f32 %v598_v25, %v514_v27 }
  0xce   : > { %v596_v51 = vmul.f32 %v2676_v52, %v545_v30 }
  0xcf   : > { %v637_v49 = vadd.f32 %v2705_v15, %v614_v39 }
  0xd0   : > { %v612_v40 = vadd.f32 %v596_v51, %v512_v34  ;;  %1405 = vmatpush1.bf16.msra.mxu0 %v2292_v29 }
  0xd1   : > { %v549_v42 = vpop.permute.xlu1 %548  ;;  %v653_v56 = vmax.f32 %v637_v49, 0.0  ;;  %v465_v7 = vpop.permute.xlu0 %464 }
  0xd2   : > { %v635_v44 = vadd.f32 %v2705_v15, %v612_v40  ;;  %v597_v47 = vmul.f32 %v2676_v52, %v549_v42  ;;  %v501_v12 = vmul.f32 %v2658_v45, %v465_v7  ;;  %v911_v7 = vld [vmem:[%s3289_s5 + $0x1c0] sm:$0xff] }
  0xd4   : > { %v651_v63 = vmax.f32 %v635_v44, 0.0  ;;  %v613_v50 = vadd.f32 %v597_v47, %v513_v43  ;;  %v517_v61 = vadd.f32 %v501_v12, %v417_v11 }
  0xd5   : > { %v477_v43 = vpop.permute.xlu0 %476 }
  0xd6   : > { %v664_v53 = vpack.c.bf16 %v651_v63, %v650_v48  ;;  %v636_v54 = vadd.f32 %v2705_v15, %v613_v50  ;;  %v366_v55 = vpop.permute.xlu1 %365 }
  0xd7   : > { %v415_v9 = vmul.f32 %v2662_v46, %v366_v55  ;;  %v907_v55 = vld [vmem:[%s3289_s5 + $0x1a0] sm:$0xff] }
  0xd8   : > { %v652_v57 = vmax.f32 %v636_v54, 0.0  ;;  %2342 = vmatprep.mubr.msk.bf16.mxu0 %vm709_vm0, %v664_v53  ;;  %v419_v53 = vmul.f32 %v2662_v46, %v386_v0  ;;  %v903_v54 = vld [vmem:[%s3289_s5 + $0x180] sm:$0xff] }
  0xd9   : > { %v481_v47 = vpop.permute.xlu0 %480 }
  0xda   : > { %v665_v58 = vpack.c.bf16 %v653_v56, %v652_v57  ;;  %v904_v56 = vld [vmem:[%s3289_s5 + $0x188] sm:$0xff] }
  0xdb   : > { %v457_v60 = vpop.permute.xlu1 %456  ;;  %v2300_v0 = vcombine.low %v904_v56, %v908_v38 }
  0xdc   : > { %2343 = vmatmul.mubr.msk.bf16.gmra.mrb[4].mxu0 %vm709_vm0, %v665_v58  ;;  %v499_v8 = vmul.f32 %v2658_v45, %v457_v60  ;;  %v2299_v60 = vcombine.high %v903_v54, %v907_v55 }
  0xde   : > { %v515_v14 = vadd.f32 %v499_v8, %v415_v9  ;;  %v573_v50 = vpop.permute.xlu0 %572  ;;  %1293 = vmatprep.subr.bf16.mxu1 %v2299_v60  ;;  %v915_v8 = vld [vmem:[%s3289_s5 + $0x1e0] sm:$0xff]  ;;  %v912_v9 = vld [vmem:[%s3289_s5 + $0x1c8] sm:$0xff] }
  0xdf   : > { %v461_v41 = vpop.permute.xlu1 %460  ;;  %v603_v58 = vmul.f32 %v2676_v52, %v573_v50 }
  0xe0   : > { %v500_v2 = vmul.f32 %v2658_v45, %v461_v41 }
  0xe2   : > { %v516_v5 = vadd.f32 %v500_v2, %v416_v3  ;;  %v2301_v2 = vcombine.high %v904_v56, %v908_v38  ;;  %v2298_v3 = vcombine.low %v903_v54, %v907_v55  ;;  %v865_v38 = vld [vmem:[%s3289_s5 + $0x50] sm:$0xff] }
  0xe4   : > { %v381_v62 = vpop.permute.xlu1 %380  ;;  %v616_v10 = vadd.f32 %v600_v4, %v516_v5  ;;  %v504_v4 = vmul.f32 %v2658_v45, %v477_v43  ;;  %1406 = vmatprep.subr.bf16.mxu0 %v2301_v2  ;;  %1294 = vmatpush1.bf16.msra.mxu1 %v2298_v3  ;;  %v866_v2 = vld [vmem:[%s3289_s5 + $0x58] sm:$0xff] }
  0xe5   : > { %v418_v24 = vmul.f32 %v2662_v46, %v381_v62  ;;  %v585_v62 = vpop.permute.xlu0 %584  ;;  %1407 = vmatpush1.bf16.msra.mxu0 %v2300_v0  ;;  %v869_v0 = vld [vmem:[%s3289_s5 + $0x70] sm:$0xff]  ;;  %v870_v3 = vld [vmem:[%s3289_s5 + $0x78] sm:$0xff] }
  0xe6   : > { %v639_v17 = vadd.f32 %v2705_v15, %v616_v10  ;;  %v606_v12 = vmul.f32 %v2676_v52, %v585_v62 }
  0xe8   : > { %v655_v23 = vmax.f32 %v639_v17, 0.0 }
  0xe9   : > { %v469_v6 = vpop.permute.xlu1 %468 }
  0xea   : > { %v502_v20 = vmul.f32 %v2658_v45, %v469_v6 }
  0xec   : > { %v518_v29 = vadd.f32 %v502_v20, %v418_v24  ;;  %v505_v20 = vmul.f32 %v2658_v45, %v481_v47  ;;  %v862_v47 = vld [vmem:[%s3289_s5 + $0x38] sm:$0xff] }
  0xee   : > { %v557_v13 = vpop.permute.xlu1 %556 }
  0xef   : > { %v599_v16 = vmul.f32 %v2676_v52, %v557_v13  ;;  %v2307_v13 = vcombine.high %v911_v7, %v915_v8 }
  0xf1   : > { %v615_v18 = vadd.f32 %v599_v16, %v515_v14  ;;  %v916_v14 = vld [vmem:[%s3289_s5 + $0x1e8] sm:$0xff]  ;;  %1295 = vmatprep.subr.bf16.mxu1 %v2307_v13  ;;  %v2262_v13 = vcombine.low %v865_v38, %v869_v0 }
  0xf2   : > { %v565_v19 = vpop.permute.xlu1 %564  ;;  %v2308_v17 = vcombine.low %v912_v9, %v916_v14 }
  0xf3   : > { %v638_v21 = vadd.f32 %v2705_v15, %v615_v18  ;;  %v601_v22 = vmul.f32 %v2676_v52, %v565_v19  ;;  %v2309_v18 = vcombine.high %v912_v9, %v916_v14  ;;  %v2882_v9 = vcombine.high %v866_v2, %v870_v3 }
  0xf4   : > { %v2898_v14 = vcombine.low %v866_v2, %v870_v3 }
  0xf5   : > { %v654_v25 = vmax.f32 %v638_v21, 0.0  ;;  %v617_v26 = vadd.f32 %v601_v22, %v517_v61  ;;  %v2306_v61 = vcombine.low %v911_v7, %v915_v8  ;;  %1408 = vmatprep.subr.bf16.mxu0 %v2309_v18  ;;  %v2263_v7 = vcombine.high %v865_v38, %v869_v0  ;;  %v873_v8 = vld [vmem:[%s3289_s5 + $0x90] sm:$0xff] }
  0xf6   : > { %v569_v27 = vpop.permute.xlu1 %568  ;;  %1409 = vmatpush1.bf16.msra.mxu0 %v2308_v17  ;;  %v881_v17 = vld [vmem:[%s3289_s5 + $0xd0] sm:$0xff] }
  0xf7   : > { %v666_v30 = vpack.c.bf16 %v655_v23, %v654_v25  ;;  %v602_v33 = vmul.f32 %v2676_v52, %v569_v27  ;;  %v640_v34 = vadd.f32 %v2705_v15, %v617_v26  ;;  %1296 = vmatpush1.bf16.msra.mxu1 %v2306_v61  ;;  %v885_v61 = vld [vmem:[%s3289_s5 + $0xf0] sm:$0xff] }
  0xf9   : > { %v618_v36 = vadd.f32 %v602_v33, %v518_v29  ;;  %2346 = vmatprep.mubr.msk.bf16.mxu0 %vm709_vm0, %v666_v30  ;;  %v656_v39 = vmax.f32 %v640_v34, 0.0 }
  0xfb   : > { %v641_v51 = vadd.f32 %v2705_v15, %v618_v36  ;;  %v391_v37 = vpop.permute.xlu1 %390 }
  0xfc   : > { %v420_v5 = vmul.f32 %v2662_v46, %v391_v37 }
  0xfd   : > { %v657_v40 = vmax.f32 %v641_v51, 0.0 }
  0xfe   : > { %v520_v19 = vadd.f32 %v504_v4, %v420_v5 }
  0xff   : > { %v667_v42 = vpack.c.bf16 %v657_v40, %v656_v39 }
 0x100   : > { %v473_v44 = vpop.permute.xlu1 %472 }
 0x101   : > { %2347 = vmatmul.mubr.msk.bf16.gmra.mrb[8].mxu0 %vm709_vm0, %v667_v42  ;;  %v503_v63 = vmul.f32 %v2658_v45, %v473_v44  ;;  %v861_v42 = vld [vmem:[%s3289_s5 + $0x30] sm:$0xff] }
 0x103   : > { %v519_v57 = vadd.f32 %v503_v63, %v419_v53 }
 0x105   : > { %v396_v48 = vpop.permute.xlu1 %395  ;;  %v619_v10 = vadd.f32 %v603_v58, %v519_v57 }
 0x106   : > { %v421_v21 = vmul.f32 %v2662_v46, %v396_v48 }
 0x107   : > { %v642_v23 = vadd.f32 %v2705_v15, %v619_v10  ;;  %v877_v10 = vld [vmem:[%s3289_s5 + $0xb0] sm:$0xff] }
 0x108   : > { %v521_v27 = vadd.f32 %v505_v20, %v421_v21  ;;  %v886_v20 = vld [vmem:[%s3289_s5 + $0xf8] sm:$0xff]  ;;  %v2270_v21 = vcombine.low %v873_v8, %v877_v10 }
 0x109   : > { %v401_v49 = vpop.permute.xlu1 %400  ;;  %v658_v33 = vmax.f32 %v642_v23, 0.0  ;;  %v2279_v23 = vcombine.high %v881_v17, %v885_v61 }
 0x10a   : > { %v422_v6 = vmul.f32 %v2662_v46, %v401_v49  ;;  %v2855_v49 = vld [vmem:[%s3288_s4] ss:$0 sm:$0xff] }
 0x10e   : > { %v485_v59 = vpop.permute.xlu1 %484 }
 0x10f   : > { %v506_v41 = vmul.f32 %v2658_v45, %v485_v59 }
 0x111   : > { %v522_v11 = vadd.f32 %v506_v41, %v422_v6 }
 0x113   : > { %v577_v16 = vpop.permute.xlu1 %576  ;;  %v622_v24 = vadd.f32 %v606_v12, %v522_v11  ;;  %v874_v11 = vld [vmem:[%s3289_s5 + $0x98] sm:$0xff] }
 0x114   : > { %v604_v22 = vmul.f32 %v2676_v52, %v577_v16  ;;  %v878_v12 = vld [vmem:[%s3289_s5 + $0xb8] sm:$0xff]  ;;  %v2271_v16 = vcombine.high %v873_v8, %v877_v10 }
 0x115   : > { %v645_v45 = vadd.f32 %v2705_v15, %v622_v24  ;;  %v2904_v18 = vcombine.high %v874_v11, %v878_v12  ;;  %v889_v24 = vld [vmem:[%s3289_s5 + $0x110] sm:$0xff] }
 0x116   : > { %v620_v25 = vadd.f32 %v604_v22, %v520_v19  ;;  %v882_v19 = vld [vmem:[%s3289_s5 + $0xd8] sm:$0xff]  ;;  %v2916_v22 = vcombine.low %v874_v11, %v878_v12 }
 0x117   : > { %v581_v26 = vpop.permute.xlu1 %580  ;;  %v661_v37 = vmax.f32 %v645_v45, 0.0 }
 0x118   : > { %v643_v29 = vadd.f32 %v2705_v15, %v620_v25  ;;  %v605_v30 = vmul.f32 %v2676_v52, %v581_v26  ;;  %v857_v52 = vld [vmem:[%s3289_s5 + $0x10] sm:$0xff]  ;;  %v2922_v25 = vcombine.high %v882_v19, %v886_v20 }
 0x119   : > { %v2254_v43 = vcombine.low %v857_v52, %v861_v42  ;;  %v2255_v44 = vcombine.high %v857_v52, %v861_v42  ;;  %v893_v26 = vld [vmem:[%s3289_s5 + $0x130] sm:$0xff] }
 0x11a   : > { %v659_v46 = vmax.f32 %v643_v29, 0.0  ;;  %v621_v34 = vadd.f32 %v605_v30, %v521_v27  ;;  %v890_v27 = vld [vmem:[%s3289_s5 + $0x118] sm:$0xff]  ;;  %v2278_v30 = vcombine.low %v881_v17, %v885_v61  ;;  %v2287_v45 = vcombine.high %v889_v24, %v893_v26  ;;  %v905_v42 = vld [vmem:[%s3289_s5 + $0x190] sm:$0xff] }
 0x11b   : > { %1507 = vmatprep.subr.bf16.mxu1 %v2255_v44  ;;  %v894_v29 = vld [vmem:[%s3289_s5 + $0x138] sm:$0xff]  ;;  %v909_v44 = vld [vmem:[%s3289_s5 + $0x1b0] sm:$0xff] }
 0x11c   : > { %v668_v36 = vpack.c.bf16 %v659_v46, %v658_v33  ;;  %v644_v51 = vadd.f32 %v2705_v15, %v621_v34  ;;  %v858_v15 = vld [vmem:[%s3289_s5 + $0x18] sm:$0xff]  ;;  %v2938_v33 = vcombine.low %v882_v19, %v886_v20  ;;  %v897_v46 = vld [vmem:[%s3289_s5 + $0x150] sm:$0xff]  ;;  %v2944_v34 = vcombine.high %v890_v27, %v894_v29 }
 0x11d   : > { %v2849_v48 = vcombine.high %v858_v15, %v862_v47  ;;  %v2877_v6 = vcombine.low %v858_v15, %v862_v47  ;;  %v906_v15 = vld [vmem:[%s3289_s5 + $0x198] sm:$0xff] }
 0x11e   : > { %v660_v39 = vmax.f32 %v644_v51, 0.0  ;;  %2350 = vmatprep.mubr.msk.bf16.mxu0 %vm709_vm0, %v668_v36  ;;  %v901_v36 = vld [vmem:[%s3289_s5 + $0x170] sm:$0xff]  ;;  %v898_v51 = vld [vmem:[%s3289_s5 + $0x158] sm:$0xff] }
 0x11f   : > { %1620 = vmatprep.subr.bf16.mxu0 %v2849_v48  ;;  %v2295_v52 = vcombine.high %v897_v46, %v901_v36  ;;  %v910_v47 = vld [vmem:[%s3289_s5 + $0x1b8] sm:$0xff] }
 0x120   : > { %v669_v40 = vpack.c.bf16 %v661_v37, %v660_v39  ;;  %v902_v37 = vld [vmem:[%s3289_s5 + $0x178] sm:$0xff]  ;;  %v2286_v39 = vcombine.low %v889_v24, %v893_v26 }
 0x122   : > { %2351 = vmatmul.mubr.msk.bf16.gmra.mrb[12].mxu0 %vm709_vm0, %v669_v40  ;;  %v2956_v40 = vcombine.low %v890_v27, %v894_v29 }
 0x123   : > { %1426 = vmatprep.mubr.bf16.mxu0 %v2485_v1 }
 0x18e   : > { %v2340_v63 = vpop.f32.mrb[0].mxu0 }
 0x18f   : > { %v777_v50 = vadd.f32 %v2340_v63, %v2855_v49  ;;  %v768_v53 = vpop.f32.mrb[1].mxu0  ;;  %v2294_v63 = vcombine.low %v897_v46, %v901_v36 }
 0x190   : > { %v769_v54 = vadd.f32 %v2855_v49, %v768_v53  ;;  %v2341_v55 = vpop.f32.mrb[2].mxu0  ;;  %v2303_v53 = vcombine.high %v905_v42, %v909_v44 }
 0x191   : > { %v780_v56 = vadd.f32 %v2341_v55, %v2855_v49  ;;  %v771_v57 = vpop.f32.mrb[3].mxu0  ;;  %v833_v59 = vmax.f32 %v777_v50, 0.0  ;;  %v2974_v50 = vcombine.low %v898_v51, %v902_v37  ;;  %v2980_v55 = vcombine.high %v906_v15, %v910_v47 }
 0x192   : > { %v772_v58 = vadd.f32 %v2855_v49, %v771_v57  ;;  %v831_v41 = vmax.f32 %v769_v54, 0.0  ;;  %v913_v54 = vld [vmem:[%s3289_s5 + $0x1d0] sm:$0xff]  ;;  %v914_v57 = vld [vmem:[%s3289_s5 + $0x1d8] sm:$0xff] }
 0x193   : > { %v834_v60 = vmax.f32 %v780_v56, 0.0  ;;  %v917_v56 = vld [vmem:[%s3289_s5 + $0x1f0] sm:$0xff] }
 0x194   : > { %v832_v62 = vmax.f32 %v772_v58, 0.0  ;;  %v918_v58 = vld [vmem:[%s3289_s5 + $0x1f8] sm:$0xff]  ;;  %v2310_v11 = vcombine.low %v913_v54, %v917_v56 }
 0x195   : > { %v2873_v4 = vpack.c.bf16 %v834_v60, %v833_v59  ;;  %v2302_v59 = vcombine.low %v905_v42, %v909_v44  ;;  %v2992_v60 = vcombine.low %v906_v15, %v910_v47  ;;  %v3001_v12 = vcombine.low %v914_v57, %v918_v58 }
 0x196   : > { %v2875_v5 = vpack.c.bf16 %v832_v62, %v831_v41  ;;  %v2311_v41 = vcombine.high %v913_v54, %v917_v56  ;;  %v2995_v62 = vcombine.high %v914_v57, %v918_v58 }
 0x198   : > { %1314 = vmatmul.mubr.bf16.vlgmr.msra.gmra.mrb[0].mxu1 %v2875_v5  ;;  %1427 = vmatmul.mubr.bf16.vlgmr.msra.gmra.mrb[16].mxu0 %v2875_v5 }
 0x199   : > { %1323 = vmatprep.mubr.bf16.mxu1 %v2485_v1  ;;  %1436 = vmatprep.mubr.bf16.mxu0 %v2485_v1 }
 0x19a   : > { %1508 = vmatpush1.bf16.msra.mxu1 %v2254_v43  ;;  %1621 = vmatpush1.bf16.msra.mxu0 %v2877_v6  ;;  %v2962_v43 = vcombine.high %v898_v51, %v902_v37 }
 0x19b   : > { %1509 = vmatprep.subr.bf16.mxu1 %v2263_v7  ;;  %1622 = vmatprep.subr.bf16.mxu0 %v2882_v9 }
 0x19e   : > { %1510 = vmatpush1.bf16.msra.mxu1 %v2262_v13  ;;  %1623 = vmatpush1.bf16.msra.mxu0 %v2898_v14 }
 0x19f   : > { %1511 = vmatprep.subr.bf16.mxu1 %v2271_v16  ;;  %1624 = vmatprep.subr.bf16.mxu0 %v2904_v18 }
 0x1a0   : > { %1324 = vmatmul.mubr.bf16.gmra.mrb[4].mxu1 %v2873_v4  ;;  %1437 = vmatmul.mubr.bf16.gmra.mrb[20].mxu0 %v2873_v4 }
 0x1a1   : > { %1333 = vmatprep.mubr.bf16.mxu1 %v2485_v1  ;;  %1446 = vmatprep.mubr.bf16.mxu0 %v2485_v1 }
 0x1a2   : > { %1512 = vmatpush1.bf16.msra.mxu1 %v2270_v21  ;;  %1625 = vmatpush1.bf16.msra.mxu0 %v2916_v22 }
 0x1a3   : > { %1513 = vmatprep.subr.bf16.mxu1 %v2279_v23  ;;  %1626 = vmatprep.subr.bf16.mxu0 %v2922_v25 }
 0x1a6   : > { %1514 = vmatpush1.bf16.msra.mxu1 %v2278_v30  ;;  %1627 = vmatpush1.bf16.msra.mxu0 %v2938_v33 }
 0x1a7   : > { %1515 = vmatprep.subr.bf16.mxu1 %v2287_v45  ;;  %1628 = vmatprep.subr.bf16.mxu0 %v2944_v34 }
 0x1aa   : > { %1516 = vmatpush1.bf16.msra.mxu1 %v2286_v39  ;;  %1629 = vmatpush1.bf16.msra.mxu0 %v2956_v40 }
 0x1ab   : > { %1517 = vmatprep.subr.bf16.mxu1 %v2295_v52  ;;  %1630 = vmatprep.subr.bf16.mxu0 %v2962_v43 }
 0x1ae   : > { %1518 = vmatpush1.bf16.msra.mxu1 %v2294_v63  ;;  %1631 = vmatpush1.bf16.msra.mxu0 %v2974_v50 }
 0x1af   : > { %v2344_v38 = vpop.f32.mrb[4].mxu0  ;;  %1519 = vmatprep.subr.bf16.mxu1 %v2303_v53  ;;  %1632 = vmatprep.subr.bf16.mxu0 %v2980_v55 }
 0x1b0   : > { %v793_v0 = vadd.f32 %v2344_v38, %v2855_v49  ;;  %v784_v2 = vpop.f32.mrb[5].mxu0 }
 0x1b1   : > { %v785_v3 = vadd.f32 %v2855_v49, %v784_v2  ;;  %v2345_v7 = vpop.f32.mrb[6].mxu0 }
 0x1b2   : > { %v796_v8 = vadd.f32 %v2345_v7, %v2855_v49  ;;  %v787_v10 = vpop.f32.mrb[7].mxu0  ;;  %1520 = vmatpush1.bf16.msra.mxu1 %v2302_v59  ;;  %1633 = vmatpush1.bf16.msra.mxu0 %v2992_v60  ;;  %v837_v16 = vmax.f32 %v793_v0, 0.0 }
 0x1b3   : > { %v788_v13 = vadd.f32 %v2855_v49, %v787_v10  ;;  %1521 = vmatprep.subr.bf16.mxu1 %v2311_v41  ;;  %1634 = vmatprep.subr.bf16.mxu0 %v2995_v62  ;;  %v835_v61 = vmax.f32 %v785_v3, 0.0 }
 0x1b4   : > { %v838_v17 = vmax.f32 %v796_v8, 0.0 }
 0x1b5   : > { %v836_v19 = vmax.f32 %v788_v13, 0.0 }
 0x1b6   : > { %v3005_v20 = vpack.c.bf16 %v838_v17, %v837_v16  ;;  %1522 = vmatpush1.bf16.msra.mxu1 %v2310_v11  ;;  %1635 = vmatpush1.bf16.msra.mxu0 %v3001_v12 }
 0x1b7   : > { %v3008_v21 = vpack.c.bf16 %v836_v19, %v835_v61  ;;  %2354 = vmatprep.subr.bf16.mxu1 %v2849_v48 }
 0x1b9   : > { %1334 = vmatmul.mubr.bf16.gmra.mrb[8].mxu1 %v3008_v21  ;;  %1447 = vmatmul.mubr.bf16.gmra.mrb[24].mxu0 %v3008_v21 }
 0x1ba   : > { %1343 = vmatprep.mubr.bf16.mxu1 %v2485_v1  ;;  %1456 = vmatprep.mubr.bf16.mxu0 %v2485_v1 }
 0x1c1   : > { %1344 = vmatmul.mubr.bf16.gmra.mrb[12].mxu1 %v3005_v20  ;;  %1457 = vmatmul.mubr.bf16.gmra.mrb[28].mxu0 %v3005_v20 }
 0x1c2   : > { %1353 = vmatprep.mubr.bf16.mxu1 %v2485_v1  ;;  %1466 = vmatprep.mubr.bf16.mxu0 %v2485_v1 }
 0x1d4   : > { %v2348_v23 = vpop.f32.mrb[8].mxu0 }
 0x1d5   : > { %v809_v24 = vadd.f32 %v2348_v23, %v2855_v49  ;;  %v800_v48 = vpop.f32.mrb[9].mxu0 }
 0x1d6   : > { %v801_v26 = vadd.f32 %v2855_v49, %v800_v48  ;;  %v2349_v27 = vpop.f32.mrb[10].mxu0 }
 0x1d7   : > { %v812_v29 = vadd.f32 %v2349_v27, %v2855_v49  ;;  %v803_v30 = vpop.f32.mrb[11].mxu0  ;;  %v841_v46 = vmax.f32 %v809_v24, 0.0 }
 0x1d8   : > { %v804_v45 = vadd.f32 %v2855_v49, %v803_v30  ;;  %v839_v51 = vmax.f32 %v801_v26, 0.0 }
 0x1d9   : > { %v842_v36 = vmax.f32 %v812_v29, 0.0 }
 0x1da   : > { %v840_v37 = vmax.f32 %v804_v45, 0.0 }
 0x1db   : > { %v3023_v39 = vpack.c.bf16 %v842_v36, %v841_v46 }
 0x1dc   : > { %v851_v52 = vpack.c.bf16 %v840_v37, %v839_v51 }
 0x1de   : > { %1354 = vmatmul.mubr.bf16.gmra.mrb[16].mxu1 %v851_v52  ;;  %1467 = vmatmul.mubr.bf16.gmra.mrb[32].mxu0 %v851_v52 }
 0x1df   : > { %1363 = vmatprep.mubr.bf16.mxu1 %v2485_v1  ;;  %1476 = vmatprep.mubr.bf16.mxu0 %v2485_v1 }
 0x1e6   : > { %1364 = vmatmul.mubr.bf16.gmra.mrb[20].mxu1 %v3023_v39  ;;  %1477 = vmatmul.mubr.bf16.gmra.mrb[36].mxu0 %v3023_v39 }
 0x1e7   : > { %1373 = vmatprep.mubr.bf16.mxu1 %v2485_v1  ;;  %1486 = vmatprep.mubr.bf16.mxu0 %v2485_v1 }
 0x1f5   : > { %v2352_v42 = vpop.f32.mrb[12].mxu0 }
 0x1f6   : > { %v825_v44 = vadd.f32 %v2352_v42, %v2855_v49  ;;  %v816_v15 = vpop.f32.mrb[13].mxu0 }
 0x1f7   : > { %v817_v47 = vadd.f32 %v2855_v49, %v816_v15  ;;  %v2353_v63 = vpop.f32.mrb[14].mxu0 }
 0x1f8   : > { %v828_v53 = vadd.f32 %v2353_v63, %v2855_v49  ;;  %v819_v54 = vpop.f32.mrb[15].mxu0  ;;  %v845_v57 = vmax.f32 %v825_v44, 0.0 }
 0x1f9   : > { %v820_v56 = vadd.f32 %v2855_v49, %v819_v54  ;;  %v843_v59 = vmax.f32 %v817_v47, 0.0  ;;  %v3081_v49 = vld [vmem:[%s3290_s6] sm:$0xff] }
 0x1fa   : > { %v846_v58 = vmax.f32 %v828_v53, 0.0 }
 0x1fb   : > { %v844_v38 = vmax.f32 %v820_v56, 0.0 }
 0x1fc   : > { %v854_v41 = vpack.c.bf16 %v846_v58, %v845_v57 }
 0x1fd   : > { %v853_v0 = vpack.c.bf16 %v844_v38, %v843_v59 }
 0x1ff   : > { %1374 = vmatmul.mubr.bf16.gmra.mrb[24].mxu1 %v853_v0  ;;  %1487 = vmatmul.mubr.bf16.gmra.mrb[40].mxu0 %v853_v0 }
 0x200   : > { %1383 = vmatprep.mubr.bf16.mxu1 %v2485_v1  ;;  %1496 = vmatprep.mubr.bf16.mxu0 %v2485_v1 }
 0x207   : > { %1384 = vmatmul.mubr.bf16.gmra.mrb[28].mxu1 %v854_v41  ;;  %1497 = vmatmul.mubr.bf16.gmra.mrb[44].mxu0 %v854_v41 }
 0x208   : > { %1539 = vmatprep.mubr.bf16.mxu1 %v2485_v1  ;;  %1652 = vmatprep.mubr.bf16.mxu0 %v2485_v1 }
 0x20f   : > { %1540 = vmatmul.mubr.bf16.vlgmr.msra.gmra.mrb[32].mxu1 %v2875_v5  ;;  %1653 = vmatmul.mubr.bf16.vlgmr.msra.gmra.mrb[48].mxu0 %v2875_v5  ;;  %v3087_v5 = vrot.slane %v3081_v49, %v405_v32 }
 0x210   : > { %2362 = vmatpush1.bf16.msra.mxu1 %v2877_v6  ;;  %1549 = vmatprep.mubr.bf16.mxu1 %v2485_v1  ;;  %v3092_v6 = vrot.slane %v3081_v49, %v589_v35 }
 0x211   : > { %2355 = vmatprep.subr.bf16.mxu1 %v2882_v9  ;;  %1662 = vmatprep.mubr.bf16.mxu0 %v2485_v1 }
 0x214   : > { %2363 = vmatpush1.bf16.msra.mxu1 %v2898_v14 }
 0x215   : > { %2356 = vmatprep.subr.bf16.mxu1 %v2904_v18 }
 0x217   : > { %1550 = vmatmul.mubr.bf16.gmra.mrb[36].mxu1 %v2873_v4  ;;  %1663 = vmatmul.mubr.bf16.gmra.mrb[52].mxu0 %v2873_v4  ;;  %v935_v4 = vsub.s32 3, %v2626_v28 }
 0x218   : > { %1559 = vmatprep.mubr.bf16.mxu1 %v2485_v1  ;;  %1672 = vmatprep.mubr.bf16.mxu0 %v2485_v1 }
 0x219   : > { %2364 = vmatpush1.bf16.msra.mxu1 %v2916_v22  ;;  %v3100_v9 = vrot.slane %v3081_v49, %v935_v4 }
 0x21a   : > { %2357 = vmatprep.subr.bf16.mxu1 %v2922_v25 }
 0x21d   : > { %2365 = vmatpush1.bf16.msra.mxu1 %v2938_v33 }
 0x21e   : > { %2358 = vmatprep.subr.bf16.mxu1 %v2944_v34 }
 0x21f   : > { %1560 = vmatmul.mubr.bf16.gmra.mrb[40].mxu1 %v3008_v21  ;;  %1673 = vmatmul.mubr.bf16.gmra.mrb[56].mxu0 %v3008_v21 }
 0x220   : > { %1569 = vmatprep.mubr.bf16.mxu1 %v2485_v1  ;;  %1682 = vmatprep.mubr.bf16.mxu0 %v2485_v1 }
 0x221   : > { %2366 = vmatpush1.bf16.msra.mxu1 %v2956_v40 }
 0x222   : > { %2359 = vmatprep.subr.bf16.mxu1 %v2962_v43 }
 0x225   : > { %2367 = vmatpush1.bf16.msra.mxu1 %v2974_v50 }
 0x226   : > { %2360 = vmatprep.subr.bf16.mxu1 %v2980_v55 }
 0x227   : > { %1570 = vmatmul.mubr.bf16.gmra.mrb[44].mxu1 %v3005_v20  ;;  %1683 = vmatmul.mubr.bf16.gmra.mrb[60].mxu0 %v3005_v20 }
 0x228   : > { %1579 = vmatprep.mubr.bf16.mxu1 %v2485_v1  ;;  %1692 = vmatprep.mubr.bf16.mxu0 %v2485_v1 }
 0x229   : > { %2368 = vmatpush1.bf16.msra.mxu1 %v2992_v60 }
 0x22a   : > { %2361 = vmatprep.subr.bf16.mxu1 %v2995_v62 }
 0x22d   : > { %2369 = vmatpush1.bf16.msra.mxu1 %v3001_v12 }
 0x22f   : > { %1580 = vmatmul.mubr.bf16.gmra.mrb[48].mxu1 %v851_v52  ;;  %1693 = vmatmul.mubr.bf16.gmra.mrb[64].mxu0 %v851_v52 }
 0x230   : > { %1589 = vmatprep.mubr.bf16.mxu1 %v2485_v1  ;;  %1702 = vmatprep.mubr.bf16.mxu0 %v2485_v1 }
 0x237   : > { %1590 = vmatmul.mubr.bf16.gmra.mrb[52].mxu1 %v3023_v39  ;;  %1703 = vmatmul.mubr.bf16.gmra.mrb[68].mxu0 %v3023_v39 }
 0x238   : > { %1599 = vmatprep.mubr.bf16.mxu1 %v2485_v1  ;;  %1712 = vmatprep.mubr.bf16.mxu0 %v2485_v1 }
 0x23f   : > { %1600 = vmatmul.mubr.bf16.gmra.mrb[56].mxu1 %v853_v0  ;;  %1713 = vmatmul.mubr.bf16.gmra.mrb[72].mxu0 %v853_v0 }
 0x240   : > { %1609 = vmatprep.mubr.bf16.mxu1 %v2485_v1 }
 0x247   : > { %1610 = vmatmul.mubr.bf16.gmra.mrb[60].mxu1 %v854_v41 }
 0x248   : > { %1722 = vmatprep.mubr.bf16.mxu1 %v2485_v1  ;;  %v3097_v1 = vrot.slane %v3081_v49, %v489_v31 }
 0x24f   : > { %1723 = vmatmul.mubr.bf16.vlgmr.msra.gmra.mrb[64].mxu1 %v854_v41 }
 0x26b   : > { %v1315_v14 = vpop.f32.mrb[0].mxu1  ;;  %v1428_v18 = vpop.f32.mrb[16].mxu0 }
 0x26c   : > { %v1316_v22 = vadd.f32 %v1315_v14, %v3087_v5  ;;  %v1429_v32 = vadd.f32 %v1428_v18, %v3092_v6  ;;  %v1317_v25 = vpop.f32.mrb[1].mxu1  ;;  %v1430_v33 = vpop.f32.mrb[17].mxu0 }
 0x26d   : > { %v1318_v34 = vadd.f32 %v1317_v25, %v3097_v1  ;;  %v1431_v35 = vadd.f32 %v1430_v33, %v3100_v9  ;;  %v1319_v40 = vpop.f32.mrb[2].mxu1  ;;  %v1432_v43 = vpop.f32.mrb[18].mxu0 }
 0x26e   : > { %v1320_v31 = vadd.f32 %v1319_v40, %v3087_v5  ;;  %v1433_v50 = vadd.f32 %v1432_v43, %v3092_v6  ;;  %v1321_v55 = vpop.f32.mrb[3].mxu1  ;;  %v1434_v60 = vpop.f32.mrb[19].mxu0  ;;  %v1733_v3 = vmax.f32 %v1316_v22, 0.0  ;;  %v1735_v7 = vmax.f32 %v1429_v32, 0.0 }
 0x26f   : > { %v1322_v62 = vadd.f32 %v1321_v55, %v3097_v1  ;;  %v1435_v2 = vadd.f32 %v1434_v60, %v3100_v9  ;;  %v1734_v11 = vmax.f32 %v1318_v34, 0.0  ;;  %v1736_v12 = vmax.f32 %v1431_v35, 0.0 }
 0x270   : > { %v1741_v8 = vmax.f32 %v1320_v31, 0.0  ;;  %v1743_v10 = vmax.f32 %v1433_v50, 0.0 }
 0x271   : > { %v1742_v13 = vmax.f32 %v1322_v62, 0.0  ;;  %v1744_v16 = vmax.f32 %v1435_v2, 0.0 }
 0x272   : > { %v1861_v17 = vmax.f32 %v1733_v3, %v1741_v8  ;;  %v1903_v61 = vmax.f32 %v1735_v7, %v1743_v10 }
 0x273   : > { %v1882_v19 = vmax.f32 %v1734_v11, %v1742_v13  ;;  %v1924_v20 = vmax.f32 %v1736_v12, %v1744_v16  ;;  %v1325_v21 = vpop.f32.mrb[4].mxu1  ;;  %v1438_v23 = vpop.f32.mrb[20].mxu0 }
 0x274   : > { %v1326_v24 = vadd.f32 %v1325_v21, %v3087_v5  ;;  %v1439_v48 = vadd.f32 %v1438_v23, %v3092_v6  ;;  %v1327_v26 = vpop.f32.mrb[5].mxu1  ;;  %v1440_v27 = vpop.f32.mrb[21].mxu0 }
 0x275   : > { %v1328_v29 = vadd.f32 %v1327_v26, %v3097_v1  ;;  %v1441_v30 = vadd.f32 %v1440_v27, %v3100_v9  ;;  %v1329_v45 = vpop.f32.mrb[6].mxu1  ;;  %v1442_v46 = vpop.f32.mrb[22].mxu0 }
 0x276   : > { %v1749_v36 = vmax.f32 %v1326_v24, 0.0  ;;  %v1751_v51 = vmax.f32 %v1439_v48, 0.0  ;;  %v1330_v37 = vadd.f32 %v1329_v45, %v3087_v5  ;;  %v1443_v39 = vadd.f32 %v1442_v46, %v3092_v6  ;;  %v1331_v52 = vpop.f32.mrb[7].mxu1  ;;  %v1444_v42 = vpop.f32.mrb[23].mxu0 }
 0x277   : > { %v1750_v44 = vmax.f32 %v1328_v29, 0.0  ;;  %v1752_v15 = vmax.f32 %v1441_v30, 0.0  ;;  %v1332_v47 = vadd.f32 %v1331_v52, %v3097_v1  ;;  %v1445_v63 = vadd.f32 %v1444_v42, %v3100_v9 }
 0x278   : > { %v1862_v53 = vmax.f32 %v1861_v17, %v1749_v36  ;;  %v1904_v54 = vmax.f32 %v1903_v61, %v1751_v51  ;;  %v1757_v56 = vmax.f32 %v1330_v37, 0.0  ;;  %v1759_v57 = vmax.f32 %v1443_v39, 0.0 }
 0x279   : > { %v1883_v58 = vmax.f32 %v1882_v19, %v1750_v44  ;;  %v1925_v59 = vmax.f32 %v1924_v20, %v1752_v15  ;;  %v1758_v38 = vmax.f32 %v1332_v47, 0.0  ;;  %v1760_v41 = vmax.f32 %v1445_v63, 0.0 }
 0x27a   : > { %v1863_v0 = vmax.f32 %v1862_v53, %v1757_v56  ;;  %v1905_v4 = vmax.f32 %v1904_v54, %v1759_v57 }
 0x27b   : > { %v1884_v14 = vmax.f32 %v1883_v58, %v1758_v38  ;;  %v1926_v18 = vmax.f32 %v1925_v59, %v1760_v41 }
 0x28c   : > { %v1335_v22 = vpop.f32.mrb[8].mxu1  ;;  %v1448_v32 = vpop.f32.mrb[24].mxu0 }
 0x28d   : > { %v1336_v25 = vadd.f32 %v1335_v22, %v3087_v5  ;;  %v1449_v33 = vadd.f32 %v1448_v32, %v3092_v6  ;;  %v1337_v34 = vpop.f32.mrb[9].mxu1  ;;  %v1450_v35 = vpop.f32.mrb[25].mxu0 }
 0x28e   : > { %v1338_v40 = vadd.f32 %v1337_v34, %v3097_v1  ;;  %v1451_v43 = vadd.f32 %v1450_v35, %v3100_v9  ;;  %v1339_v31 = vpop.f32.mrb[10].mxu1  ;;  %v1452_v50 = vpop.f32.mrb[26].mxu0 }
 0x28f   : > { %v1765_v55 = vmax.f32 %v1336_v25, 0.0  ;;  %v1767_v60 = vmax.f32 %v1449_v33, 0.0  ;;  %v1340_v62 = vadd.f32 %v1339_v31, %v3087_v5  ;;  %v1453_v2 = vadd.f32 %v1452_v50, %v3092_v6  ;;  %v1341_v3 = vpop.f32.mrb[11].mxu1  ;;  %v1454_v7 = vpop.f32.mrb[27].mxu0 }
 0x290   : > { %v1766_v8 = vmax.f32 %v1338_v40, 0.0  ;;  %v1768_v10 = vmax.f32 %v1451_v43, 0.0  ;;  %v1342_v11 = vadd.f32 %v1341_v3, %v3097_v1  ;;  %v1455_v12 = vadd.f32 %v1454_v7, %v3100_v9 }
 0x291   : > { %v1864_v13 = vmax.f32 %v1863_v0, %v1765_v55  ;;  %v1906_v16 = vmax.f32 %v1905_v4, %v1767_v60  ;;  %v1773_v17 = vmax.f32 %v1340_v62, 0.0  ;;  %v1775_v61 = vmax.f32 %v1453_v2, 0.0 }
 0x292   : > { %v1885_v19 = vmax.f32 %v1884_v14, %v1766_v8  ;;  %v1927_v20 = vmax.f32 %v1926_v18, %v1768_v10  ;;  %v1774_v21 = vmax.f32 %v1342_v11, 0.0  ;;  %v1776_v23 = vmax.f32 %v1455_v12, 0.0 }
 0x293   : > { %v1865_v24 = vmax.f32 %v1864_v13, %v1773_v17  ;;  %v1907_v48 = vmax.f32 %v1906_v16, %v1775_v61 }
 0x294   : > { %v1886_v26 = vmax.f32 %v1885_v19, %v1774_v21  ;;  %v1928_v27 = vmax.f32 %v1927_v20, %v1776_v23  ;;  %v1345_v29 = vpop.f32.mrb[12].mxu1  ;;  %v1458_v30 = vpop.f32.mrb[28].mxu0 }
 0x295   : > { %v1346_v45 = vadd.f32 %v1345_v29, %v3087_v5  ;;  %v1459_v46 = vadd.f32 %v1458_v30, %v3092_v6  ;;  %v1347_v36 = vpop.f32.mrb[13].mxu1  ;;  %v1460_v51 = vpop.f32.mrb[29].mxu0 }
 0x296   : > { %v1348_v37 = vadd.f32 %v1347_v36, %v3097_v1  ;;  %v1461_v39 = vadd.f32 %v1460_v51, %v3100_v9  ;;  %v1349_v52 = vpop.f32.mrb[14].mxu1  ;;  %v1462_v42 = vpop.f32.mrb[30].mxu0 }
 0x297   : > { %v1781_v44 = vmax.f32 %v1346_v45, 0.0  ;;  %v1783_v15 = vmax.f32 %v1459_v46, 0.0  ;;  %v1350_v47 = vadd.f32 %v1349_v52, %v3087_v5  ;;  %v1463_v63 = vadd.f32 %v1462_v42, %v3092_v6  ;;  %v1351_v53 = vpop.f32.mrb[15].mxu1  ;;  %v1464_v54 = vpop.f32.mrb[31].mxu0 }
 0x298   : > { %v1782_v56 = vmax.f32 %v1348_v37, 0.0  ;;  %v1784_v57 = vmax.f32 %v1461_v39, 0.0  ;;  %v1352_v58 = vadd.f32 %v1351_v53, %v3097_v1  ;;  %v1465_v59 = vadd.f32 %v1464_v54, %v3100_v9 }
 0x299   : > { %v1866_v38 = vmax.f32 %v1865_v24, %v1781_v44  ;;  %v1908_v41 = vmax.f32 %v1907_v48, %v1783_v15  ;;  %v1789_v0 = vmax.f32 %v1350_v47, 0.0  ;;  %v1791_v4 = vmax.f32 %v1463_v63, 0.0 }
 0x29a   : > { %v1887_v14 = vmax.f32 %v1886_v26, %v1782_v56  ;;  %v1929_v18 = vmax.f32 %v1928_v27, %v1784_v57  ;;  %v1790_v22 = vmax.f32 %v1352_v58, 0.0  ;;  %v1792_v32 = vmax.f32 %v1465_v59, 0.0 }
 0x29b   : > { %v1867_v25 = vmax.f32 %v1866_v38, %v1789_v0  ;;  %v1909_v33 = vmax.f32 %v1908_v41, %v1791_v4 }
 0x29c   : > { %v1888_v34 = vmax.f32 %v1887_v14, %v1790_v22  ;;  %v1930_v35 = vmax.f32 %v1929_v18, %v1792_v32 }
 0x2b1   : > { %v1355_v40 = vpop.f32.mrb[16].mxu1  ;;  %v1468_v43 = vpop.f32.mrb[32].mxu0 }
 0x2b2   : > { %v1356_v31 = vadd.f32 %v1355_v40, %v3087_v5  ;;  %v1469_v50 = vadd.f32 %v1468_v43, %v3092_v6  ;;  %v1357_v55 = vpop.f32.mrb[17].mxu1  ;;  %v1470_v60 = vpop.f32.mrb[33].mxu0 }
 0x2b3   : > { %v1358_v62 = vadd.f32 %v1357_v55, %v3097_v1  ;;  %v1471_v2 = vadd.f32 %v1470_v60, %v3100_v9  ;;  %v1359_v3 = vpop.f32.mrb[18].mxu1  ;;  %v1472_v7 = vpop.f32.mrb[34].mxu0 }
 0x2b4   : > { %v1797_v8 = vmax.f32 %v1356_v31, 0.0  ;;  %v1799_v10 = vmax.f32 %v1469_v50, 0.0  ;;  %v1360_v11 = vadd.f32 %v1359_v3, %v3087_v5  ;;  %v1473_v12 = vadd.f32 %v1472_v7, %v3092_v6  ;;  %v1361_v13 = vpop.f32.mrb[19].mxu1  ;;  %v1474_v16 = vpop.f32.mrb[35].mxu0 }
 0x2b5   : > { %v1798_v17 = vmax.f32 %v1358_v62, 0.0  ;;  %v1800_v61 = vmax.f32 %v1471_v2, 0.0  ;;  %v1362_v19 = vadd.f32 %v1361_v13, %v3097_v1  ;;  %v1475_v20 = vadd.f32 %v1474_v16, %v3100_v9 }
 0x2b6   : > { %v1868_v21 = vmax.f32 %v1867_v25, %v1797_v8  ;;  %v1910_v23 = vmax.f32 %v1909_v33, %v1799_v10  ;;  %v1805_v24 = vmax.f32 %v1360_v11, 0.0  ;;  %v1807_v48 = vmax.f32 %v1473_v12, 0.0 }
 0x2b7   : > { %v1889_v26 = vmax.f32 %v1888_v34, %v1798_v17  ;;  %v1931_v27 = vmax.f32 %v1930_v35, %v1800_v61  ;;  %v1806_v29 = vmax.f32 %v1362_v19, 0.0  ;;  %v1808_v30 = vmax.f32 %v1475_v20, 0.0 }
 0x2b8   : > { %v1869_v45 = vmax.f32 %v1868_v21, %v1805_v24  ;;  %v1911_v46 = vmax.f32 %v1910_v23, %v1807_v48  ;;  %v939_v11 = vsub.s32 4, %v2626_v28  ;;  %v947_v12 = vsub.s32 6, %v2626_v28 }
 0x2b9   : > { %v1890_v36 = vmax.f32 %v1889_v26, %v1806_v29  ;;  %v1932_v51 = vmax.f32 %v1931_v27, %v1808_v30  ;;  %v1365_v37 = vpop.f32.mrb[20].mxu1  ;;  %v1478_v39 = vpop.f32.mrb[36].mxu0  ;;  %v943_v19 = vsub.s32 5, %v2626_v28  ;;  %v951_v20 = vsub.s32 7, %v2626_v28 }
 0x2ba   : > { %v1366_v52 = vadd.f32 %v1365_v37, %v3087_v5  ;;  %v1479_v42 = vadd.f32 %v1478_v39, %v3092_v6  ;;  %v1367_v44 = vpop.f32.mrb[21].mxu1  ;;  %v1480_v15 = vpop.f32.mrb[37].mxu0 }
 0x2bb   : > { %v1368_v47 = vadd.f32 %v1367_v44, %v3097_v1  ;;  %v1481_v63 = vadd.f32 %v1480_v15, %v3100_v9  ;;  %v1369_v53 = vpop.f32.mrb[22].mxu1  ;;  %v1482_v54 = vpop.f32.mrb[38].mxu0 }
 0x2bc   : > { %v1813_v56 = vmax.f32 %v1366_v52, 0.0  ;;  %v1815_v57 = vmax.f32 %v1479_v42, 0.0  ;;  %v1370_v58 = vadd.f32 %v1369_v53, %v3087_v5  ;;  %v1483_v59 = vadd.f32 %v1482_v54, %v3092_v6  ;;  %v1371_v38 = vpop.f32.mrb[23].mxu1  ;;  %v1484_v41 = vpop.f32.mrb[39].mxu0 }
 0x2bd   : > { %v1814_v0 = vmax.f32 %v1368_v47, 0.0  ;;  %v1816_v4 = vmax.f32 %v1481_v63, 0.0  ;;  %v1372_v14 = vadd.f32 %v1371_v38, %v3097_v1  ;;  %v1485_v18 = vadd.f32 %v1484_v41, %v3100_v9 }
 0x2be   : > { %v1870_v22 = vmax.f32 %v1869_v45, %v1813_v56  ;;  %v1912_v32 = vmax.f32 %v1911_v46, %v1815_v57  ;;  %v1821_v25 = vmax.f32 %v1370_v58, 0.0  ;;  %v1823_v33 = vmax.f32 %v1483_v59, 0.0 }
 0x2bf   : > { %v1891_v34 = vmax.f32 %v1890_v36, %v1814_v0  ;;  %v1933_v35 = vmax.f32 %v1932_v51, %v1816_v4  ;;  %v1822_v40 = vmax.f32 %v1372_v14, 0.0  ;;  %v1824_v43 = vmax.f32 %v1485_v18, 0.0 }
 0x2c0   : > { %v1871_v31 = vmax.f32 %v1870_v22, %v1821_v25  ;;  %v1913_v50 = vmax.f32 %v1912_v32, %v1823_v33  ;;  %v3165_v0 = vrot.slane %v3081_v49, %v939_v11  ;;  %v3168_v4 = vrot.slane %v3081_v49, %v947_v12 }
 0x2c1   : > { %v1892_v55 = vmax.f32 %v1891_v34, %v1822_v40  ;;  %v1934_v60 = vmax.f32 %v1933_v35, %v1824_v43  ;;  %v3173_v25 = vrot.slane %v3081_v49, %v943_v19  ;;  %v3176_v33 = vrot.slane %v3081_v49, %v951_v20 }
 0x2d2   : > { %v1375_v62 = vpop.f32.mrb[24].mxu1  ;;  %v1488_v2 = vpop.f32.mrb[40].mxu0 }
 0x2d3   : > { %v1376_v3 = vadd.f32 %v1375_v62, %v3087_v5  ;;  %v1489_v7 = vadd.f32 %v1488_v2, %v3092_v6  ;;  %v1377_v8 = vpop.f32.mrb[25].mxu1  ;;  %v1490_v10 = vpop.f32.mrb[41].mxu0 }
 0x2d4   : > { %v1378_v13 = vadd.f32 %v1377_v8, %v3097_v1  ;;  %v1491_v16 = vadd.f32 %v1490_v10, %v3100_v9  ;;  %v1379_v17 = vpop.f32.mrb[26].mxu1  ;;  %v1492_v61 = vpop.f32.mrb[42].mxu0 }
 0x2d5   : > { %v1829_v21 = vmax.f32 %v1376_v3, 0.0  ;;  %v1831_v23 = vmax.f32 %v1489_v7, 0.0  ;;  %v1380_v24 = vadd.f32 %v1379_v17, %v3087_v5  ;;  %v1493_v48 = vadd.f32 %v1492_v61, %v3092_v6  ;;  %v1381_v26 = vpop.f32.mrb[27].mxu1  ;;  %v1494_v27 = vpop.f32.mrb[43].mxu0 }
 0x2d6   : > { %v1830_v29 = vmax.f32 %v1378_v13, 0.0  ;;  %v1832_v30 = vmax.f32 %v1491_v16, 0.0  ;;  %v1382_v45 = vadd.f32 %v1381_v26, %v3097_v1  ;;  %v1495_v46 = vadd.f32 %v1494_v27, %v3100_v9 }
 0x2d7   : > { %v1872_v36 = vmax.f32 %v1871_v31, %v1829_v21  ;;  %v1914_v51 = vmax.f32 %v1913_v50, %v1831_v23  ;;  %v1837_v37 = vmax.f32 %v1380_v24, 0.0  ;;  %v1839_v39 = vmax.f32 %v1493_v48, 0.0 }
 0x2d8   : > { %v1893_v52 = vmax.f32 %v1892_v55, %v1830_v29  ;;  %v1935_v42 = vmax.f32 %v1934_v60, %v1832_v30  ;;  %v1838_v44 = vmax.f32 %v1382_v45, 0.0  ;;  %v1840_v15 = vmax.f32 %v1495_v46, 0.0 }
 0x2d9   : > { %v1873_v47 = vmax.f32 %v1872_v36, %v1837_v37  ;;  %v1915_v63 = vmax.f32 %v1914_v51, %v1839_v39 }
 0x2da   : > { %v1894_v53 = vmax.f32 %v1893_v52, %v1838_v44  ;;  %v1936_v54 = vmax.f32 %v1935_v42, %v1840_v15  ;;  %v1385_v56 = vpop.f32.mrb[28].mxu1  ;;  %v1498_v57 = vpop.f32.mrb[44].mxu0 }
 0x2db   : > { %v1386_v58 = vadd.f32 %v1385_v56, %v3087_v5  ;;  %v1499_v59 = vadd.f32 %v1498_v57, %v3092_v6  ;;  %v1387_v38 = vpop.f32.mrb[29].mxu1  ;;  %v1500_v41 = vpop.f32.mrb[45].mxu0 }
 0x2dc   : > { %v1388_v14 = vadd.f32 %v1387_v38, %v3097_v1  ;;  %v1501_v18 = vadd.f32 %v1500_v41, %v3100_v9  ;;  %v1389_v22 = vpop.f32.mrb[30].mxu1  ;;  %v1502_v32 = vpop.f32.mrb[46].mxu0 }
 0x2dd   : > { %v1845_v34 = vmax.f32 %v1386_v58, 0.0  ;;  %v1847_v35 = vmax.f32 %v1499_v59, 0.0  ;;  %v1390_v40 = vadd.f32 %v1389_v22, %v3087_v5  ;;  %v1503_v43 = vadd.f32 %v1502_v32, %v3092_v6  ;;  %v1391_v31 = vpop.f32.mrb[31].mxu1  ;;  %v1504_v50 = vpop.f32.mrb[47].mxu0 }
 0x2de   : > { %v1846_v55 = vmax.f32 %v1388_v14, 0.0  ;;  %v1848_v60 = vmax.f32 %v1501_v18, 0.0  ;;  %v1392_v62 = vadd.f32 %v1391_v31, %v3097_v1  ;;  %v1505_v2 = vadd.f32 %v1504_v50, %v3100_v9 }
 0x2df   : > { %v1874_v3 = vmax.f32 %v1873_v47, %v1845_v34  ;;  %v1916_v7 = vmax.f32 %v1915_v63, %v1847_v35  ;;  %v1853_v8 = vmax.f32 %v1390_v40, 0.0  ;;  %v1855_v10 = vmax.f32 %v1503_v43, 0.0 }
 0x2e0   : > { %v1895_v49 = vmax.f32 %v1894_v53, %v1846_v55  ;;  %v1937_v11 = vmax.f32 %v1936_v54, %v1848_v60  ;;  %v1854_v12 = vmax.f32 %v1392_v62, 0.0  ;;  %v1856_v13 = vmax.f32 %v1505_v2, 0.0 }
 0x2e1   : > { %v1875_v16 = vmax.f32 %v1874_v3, %v1853_v8  ;;  %v1917_v5 = vmax.f32 %v1916_v7, %v1855_v10 }
 0x2e2   : > { %v1896_v17 = vmax.f32 %v1895_v49, %v1854_v12  ;;  %v1938_v6 = vmax.f32 %v1937_v11, %v1856_v13  ;;  %v1541_v61 = vpop.f32.mrb[32].mxu1  ;;  %v1654_v19 = vpop.f32.mrb[48].mxu0 }
 0x2e3   : > { %v1876_v20 = vrot.slane %v1875_v16, 4  ;;  %v1918_v21 = vrot.slane %v1917_v5, 4  ;;  %v1542_v1 = vadd.f32 %v1541_v61, %v3165_v0  ;;  %v1655_v9 = vadd.f32 %v1654_v19, %v3168_v4  ;;  %v1543_v23 = vpop.f32.mrb[33].mxu1  ;;  %v1656_v24 = vpop.f32.mrb[49].mxu0 }
 0x2e4   : > { %v1897_v48 = vrot.slane %v1896_v17, 4  ;;  %v1939_v26 = vrot.slane %v1938_v6, 4  ;;  %v1544_v27 = vadd.f32 %v1543_v23, %v3173_v25  ;;  %v1657_v29 = vadd.f32 %v1656_v24, %v3176_v33  ;;  %v1545_v30 = vpop.f32.mrb[34].mxu1  ;;  %v1658_v45 = vpop.f32.mrb[50].mxu0 }
 0x2e5   : > { %v1877_v46 = vmax.f32 %v1875_v16, %v1876_v20  ;;  %v1919_v36 = vmax.f32 %v1917_v5, %v1918_v21  ;;  %v1737_v51 = vmax.f32 %v1542_v1, 0.0  ;;  %v1739_v37 = vmax.f32 %v1655_v9, 0.0  ;;  %v1547_v39 = vpop.f32.mrb[35].mxu1  ;;  %v1660_v52 = vpop.f32.mrb[51].mxu0 }
 0x2e6   : > { %v1898_v42 = vmax.f32 %v1896_v17, %v1897_v48  ;;  %v1940_v44 = vmax.f32 %v1938_v6, %v1939_v26  ;;  %v1738_v15 = vmax.f32 %v1544_v27, 0.0  ;;  %v1740_v47 = vmax.f32 %v1657_v29, 0.0 }
 0x2e7   : > { %v1878_v63 = vrot.slane %v1877_v46, 2  ;;  %v1920_v53 = vrot.slane %v1919_v36, 2  ;;  %v1546_v54 = vadd.f32 %v1545_v30, %v3165_v0  ;;  %v1659_v56 = vadd.f32 %v1658_v45, %v3168_v4 }
 0x2e8   : > { %v1899_v57 = vrot.slane %v1898_v42, 2  ;;  %v1941_v58 = vrot.slane %v1940_v44, 2  ;;  %v1548_v59 = vadd.f32 %v1547_v39, %v3173_v25  ;;  %v1661_v38 = vadd.f32 %v1660_v52, %v3176_v33 }
 0x2e9   : > { %v1879_v41 = vmax.f32 %v1877_v46, %v1878_v63  ;;  %v1921_v14 = vmax.f32 %v1919_v36, %v1920_v53  ;;  %v1745_v18 = vmax.f32 %v1546_v54, 0.0  ;;  %v1747_v22 = vmax.f32 %v1659_v56, 0.0 }
 0x2ea   : > { %v1900_v32 = vmax.f32 %v1898_v42, %v1899_v57  ;;  %v1942_v34 = vmax.f32 %v1940_v44, %v1941_v58  ;;  %v1746_v35 = vmax.f32 %v1548_v59, 0.0  ;;  %v1748_v40 = vmax.f32 %v1661_v38, 0.0  ;;  %v1551_v43 = vpop.f32.mrb[36].mxu1  ;;  %v1664_v31 = vpop.f32.mrb[52].mxu0 }
 0x2eb   : > { %v1880_v50 = vrot.slane %v1879_v41, 1  ;;  %v1922_v55 = vrot.slane %v1921_v14, 1  ;;  %v1945_v60 = vmax.f32 %v1737_v51, %v1745_v18  ;;  %v1987_v62 = vmax.f32 %v1739_v37, %v1747_v22  ;;  %v1553_v2 = vpop.f32.mrb[37].mxu1  ;;  %v1666_v3 = vpop.f32.mrb[53].mxu0 }
 0x2ec   : > { %v1901_v7 = vrot.slane %v1900_v32, 1  ;;  %v1943_v8 = vrot.slane %v1942_v34, 1  ;;  %v1966_v10 = vmax.f32 %v1738_v15, %v1746_v35  ;;  %v2008_v49 = vmax.f32 %v1740_v47, %v1748_v40  ;;  %v1555_v11 = vpop.f32.mrb[38].mxu1  ;;  %v1668_v12 = vpop.f32.mrb[54].mxu0 }
 0x2ed   : > { %v3190_v13 = vmax.f32 %v1879_v41, %v1880_v50  ;;  %v3192_v16 = vmax.f32 %v1921_v14, %v1922_v55  ;;  %v1552_v5 = vadd.f32 %v1551_v43, %v3165_v0  ;;  %v1665_v17 = vadd.f32 %v1664_v31, %v3168_v4  ;;  %v1557_v6 = vpop.f32.mrb[39].mxu1  ;;  %v1670_v61 = vpop.f32.mrb[55].mxu0 }
 0x2ee   : > { %v3196_v19 = vmax.f32 %v1900_v32, %v1901_v7  ;;  %v3198_v20 = vmax.f32 %v1942_v34, %v1943_v8  ;;  %v1554_v21 = vadd.f32 %v1553_v2, %v3173_v25  ;;  %v1667_v1 = vadd.f32 %v1666_v3, %v3176_v33 }
 0x2ef   : > { %v1753_v9 = vmax.f32 %v1552_v5, 0.0  ;;  %v1755_v23 = vmax.f32 %v1665_v17, 0.0  ;;  %v1556_v24 = vadd.f32 %v1555_v11, %v3165_v0  ;;  %v1669_v48 = vadd.f32 %v1668_v12, %v3168_v4 }
 0x2f0   : > { %v1754_v26 = vmax.f32 %v1554_v21, 0.0  ;;  %v1756_v27 = vmax.f32 %v1667_v1, 0.0  ;;  %v1558_v29 = vadd.f32 %v1557_v6, %v3173_v25  ;;  %v1671_v30 = vadd.f32 %v1670_v61, %v3176_v33 }
 0x2f1   : > { %v1946_v45 = vmax.f32 %v1945_v60, %v1753_v9  ;;  %v1988_v46 = vmax.f32 %v1987_v62, %v1755_v23  ;;  %v1761_v36 = vmax.f32 %v1556_v24, 0.0  ;;  %v1763_v51 = vmax.f32 %v1669_v48, 0.0 }
 0x2f2   : > { %v1967_v37 = vmax.f32 %v1966_v10, %v1754_v26  ;;  %v2009_v39 = vmax.f32 %v2008_v49, %v1756_v27  ;;  %v1762_v52 = vmax.f32 %v1558_v29, 0.0  ;;  %v1764_v42 = vmax.f32 %v1671_v30, 0.0  ;;  %v1561_v44 = vpop.f32.mrb[40].mxu1  ;;  %v1674_v15 = vpop.f32.mrb[56].mxu0 }
 0x2f3   : > { %v1947_v47 = vmax.f32 %v1946_v45, %v1761_v36  ;;  %v1989_v63 = vmax.f32 %v1988_v46, %v1763_v51  ;;  %v1562_v53 = vadd.f32 %v1561_v44, %v3165_v0  ;;  %v1675_v54 = vadd.f32 %v1674_v15, %v3168_v4  ;;  %v1563_v56 = vpop.f32.mrb[41].mxu1  ;;  %v1676_v57 = vpop.f32.mrb[57].mxu0 }
 0x2f4   : > { %v1968_v58 = vmax.f32 %v1967_v37, %v1762_v52  ;;  %v2010_v59 = vmax.f32 %v2009_v39, %v1764_v42  ;;  %v1564_v38 = vadd.f32 %v1563_v56, %v3173_v25  ;;  %v1677_v41 = vadd.f32 %v1676_v57, %v3176_v33  ;;  %v1565_v14 = vpop.f32.mrb[42].mxu1  ;;  %v1678_v18 = vpop.f32.mrb[58].mxu0 }
 0x2f5   : > { %v1769_v22 = vmax.f32 %v1562_v53, 0.0  ;;  %v1771_v32 = vmax.f32 %v1675_v54, 0.0  ;;  %v1566_v34 = vadd.f32 %v1565_v14, %v3165_v0  ;;  %v1679_v35 = vadd.f32 %v1678_v18, %v3168_v4  ;;  %v1567_v40 = vpop.f32.mrb[43].mxu1  ;;  %v1680_v43 = vpop.f32.mrb[59].mxu0 }
 0x2f6   : > { %v1770_v31 = vmax.f32 %v1564_v38, 0.0  ;;  %v1772_v50 = vmax.f32 %v1677_v41, 0.0  ;;  %v1568_v55 = vadd.f32 %v1567_v40, %v3173_v25  ;;  %v1681_v60 = vadd.f32 %v1680_v43, %v3176_v33 }
 0x2f7   : > { %v1948_v62 = vmax.f32 %v1947_v47, %v1769_v22  ;;  %v1990_v2 = vmax.f32 %v1989_v63, %v1771_v32  ;;  %v1777_v3 = vmax.f32 %v1566_v34, 0.0  ;;  %v1779_v7 = vmax.f32 %v1679_v35, 0.0 }
 0x2f8   : > { %v1969_v8 = vmax.f32 %v1968_v58, %v1770_v31  ;;  %v2011_v10 = vmax.f32 %v2010_v59, %v1772_v50  ;;  %v1778_v49 = vmax.f32 %v1568_v55, 0.0  ;;  %v1780_v11 = vmax.f32 %v1681_v60, 0.0 }
 0x2f9   : > { %v1949_v12 = vmax.f32 %v1948_v62, %v1777_v3  ;;  %v1991_v5 = vmax.f32 %v1990_v2, %v1779_v7 }
 0x2fa   : > { %v1970_v17 = vmax.f32 %v1969_v8, %v1778_v49  ;;  %v2012_v6 = vmax.f32 %v2011_v10, %v1780_v11  ;;  %v1571_v61 = vpop.f32.mrb[44].mxu1  ;;  %v1684_v21 = vpop.f32.mrb[60].mxu0 }
 0x2fb   : > { %v1572_v1 = vadd.f32 %v1571_v61, %v3165_v0  ;;  %v1685_v9 = vadd.f32 %v1684_v21, %v3168_v4  ;;  %v1573_v23 = vpop.f32.mrb[45].mxu1  ;;  %v1686_v24 = vpop.f32.mrb[61].mxu0 }
 0x2fc   : > { %v1574_v48 = vadd.f32 %v1573_v23, %v3173_v25  ;;  %v1687_v26 = vadd.f32 %v1686_v24, %v3176_v33  ;;  %v1575_v27 = vpop.f32.mrb[46].mxu1  ;;  %v1688_v29 = vpop.f32.mrb[62].mxu0 }
 0x2fd   : > { %v1785_v30 = vmax.f32 %v1572_v1, 0.0  ;;  %v1787_v45 = vmax.f32 %v1685_v9, 0.0  ;;  %v1576_v46 = vadd.f32 %v1575_v27, %v3165_v0  ;;  %v1689_v36 = vadd.f32 %v1688_v29, %v3168_v4  ;;  %v1577_v51 = vpop.f32.mrb[47].mxu1  ;;  %v1690_v37 = vpop.f32.mrb[63].mxu0 }
 0x2fe   : > { %v1786_v39 = vmax.f32 %v1574_v48, 0.0  ;;  %v1788_v52 = vmax.f32 %v1687_v26, 0.0  ;;  %v1578_v42 = vadd.f32 %v1577_v51, %v3173_v25  ;;  %v1691_v44 = vadd.f32 %v1690_v37, %v3176_v33 }
 0x2ff   : > { %v1950_v15 = vmax.f32 %v1949_v12, %v1785_v30  ;;  %v1992_v47 = vmax.f32 %v1991_v5, %v1787_v45  ;;  %v1793_v63 = vmax.f32 %v1576_v46, 0.0  ;;  %v1795_v53 = vmax.f32 %v1689_v36, 0.0 }
 0x300   : > { %v1971_v54 = vmax.f32 %v1970_v17, %v1786_v39  ;;  %v2013_v56 = vmax.f32 %v2012_v6, %v1788_v52  ;;  %v1794_v57 = vmax.f32 %v1578_v42, 0.0  ;;  %v1796_v58 = vmax.f32 %v1691_v44, 0.0 }
 0x301   : > { %v1951_v59 = vmax.f32 %v1950_v15, %v1793_v63  ;;  %v1993_v38 = vmax.f32 %v1992_v47, %v1795_v53 }
 0x302   : > { %v1972_v41 = vmax.f32 %v1971_v54, %v1794_v57  ;;  %v2014_v14 = vmax.f32 %v2013_v56, %v1796_v58  ;;  %v1581_v18 = vpop.f32.mrb[48].mxu1  ;;  %v1694_v22 = vpop.f32.mrb[64].mxu0 }
 0x303   : > { %v1582_v32 = vadd.f32 %v1581_v18, %v3165_v0  ;;  %v1695_v34 = vadd.f32 %v1694_v22, %v3168_v4  ;;  %v1583_v35 = vpop.f32.mrb[49].mxu1  ;;  %v1696_v40 = vpop.f32.mrb[65].mxu0 }
 0x304   : > { %v1584_v43 = vadd.f32 %v1583_v35, %v3173_v25  ;;  %v1697_v31 = vadd.f32 %v1696_v40, %v3176_v33  ;;  %v1585_v50 = vpop.f32.mrb[50].mxu1  ;;  %v1698_v55 = vpop.f32.mrb[66].mxu0 }
 0x305   : > { %v1801_v60 = vmax.f32 %v1582_v32, 0.0  ;;  %v1803_v62 = vmax.f32 %v1695_v34, 0.0  ;;  %v1586_v2 = vadd.f32 %v1585_v50, %v3165_v0  ;;  %v1699_v3 = vadd.f32 %v1698_v55, %v3168_v4  ;;  %v1587_v7 = vpop.f32.mrb[51].mxu1  ;;  %v1700_v8 = vpop.f32.mrb[67].mxu0 }
 0x306   : > { %v1802_v10 = vmax.f32 %v1584_v43, 0.0  ;;  %v1804_v49 = vmax.f32 %v1697_v31, 0.0  ;;  %v1588_v11 = vadd.f32 %v1587_v7, %v3173_v25  ;;  %v1701_v12 = vadd.f32 %v1700_v8, %v3176_v33 }
 0x307   : > { %v1952_v5 = vmax.f32 %v1951_v59, %v1801_v60  ;;  %v1994_v17 = vmax.f32 %v1993_v38, %v1803_v62  ;;  %v1809_v6 = vmax.f32 %v1586_v2, 0.0  ;;  %v1811_v61 = vmax.f32 %v1699_v3, 0.0 }
 0x308   : > { %v1973_v21 = vmax.f32 %v1972_v41, %v1802_v10  ;;  %v2015_v1 = vmax.f32 %v2014_v14, %v1804_v49  ;;  %v1810_v9 = vmax.f32 %v1588_v11, 0.0  ;;  %v1812_v23 = vmax.f32 %v1701_v12, 0.0 }
 0x309   : > { %v1953_v24 = vmax.f32 %v1952_v5, %v1809_v6  ;;  %v1995_v48 = vmax.f32 %v1994_v17, %v1811_v61 }
 0x30a   : > { %v1974_v26 = vmax.f32 %v1973_v21, %v1810_v9  ;;  %v2016_v27 = vmax.f32 %v2015_v1, %v1812_v23  ;;  %v1591_v29 = vpop.f32.mrb[52].mxu1  ;;  %v1704_v30 = vpop.f32.mrb[68].mxu0 }
 0x30b   : > { %v1592_v45 = vadd.f32 %v1591_v29, %v3165_v0  ;;  %v1705_v46 = vadd.f32 %v1704_v30, %v3168_v4  ;;  %v1593_v36 = vpop.f32.mrb[53].mxu1  ;;  %v1706_v51 = vpop.f32.mrb[69].mxu0 }
 0x30c   : > { %v1594_v37 = vadd.f32 %v1593_v36, %v3173_v25  ;;  %v1707_v39 = vadd.f32 %v1706_v51, %v3176_v33  ;;  %v1595_v52 = vpop.f32.mrb[54].mxu1  ;;  %v1708_v42 = vpop.f32.mrb[70].mxu0 }
 0x30d   : > { %v1817_v44 = vmax.f32 %v1592_v45, 0.0  ;;  %v1819_v15 = vmax.f32 %v1705_v46, 0.0  ;;  %v1596_v47 = vadd.f32 %v1595_v52, %v3165_v0  ;;  %v1709_v63 = vadd.f32 %v1708_v42, %v3168_v4  ;;  %v1597_v53 = vpop.f32.mrb[55].mxu1  ;;  %v1710_v54 = vpop.f32.mrb[71].mxu0 }
 0x30e   : > { %v1818_v56 = vmax.f32 %v1594_v37, 0.0  ;;  %v1820_v57 = vmax.f32 %v1707_v39, 0.0  ;;  %v1598_v58 = vadd.f32 %v1597_v53, %v3173_v25  ;;  %v1711_v59 = vadd.f32 %v1710_v54, %v3176_v33 }
 0x30f   : > { %v1954_v38 = vmax.f32 %v1953_v24, %v1817_v44  ;;  %v1996_v41 = vmax.f32 %v1995_v48, %v1819_v15  ;;  %v1825_v14 = vmax.f32 %v1596_v47, 0.0  ;;  %v1827_v18 = vmax.f32 %v1709_v63, 0.0 }
 0x310   : > { %v1975_v22 = vmax.f32 %v1974_v26, %v1818_v56  ;;  %v2017_v32 = vmax.f32 %v2016_v27, %v1820_v57  ;;  %v1826_v34 = vmax.f32 %v1598_v58, 0.0  ;;  %v1828_v35 = vmax.f32 %v1711_v59, 0.0 }
 0x311   : > { %v1955_v40 = vmax.f32 %v1954_v38, %v1825_v14  ;;  %v1997_v43 = vmax.f32 %v1996_v41, %v1827_v18 }
 0x312   : > { %v1976_v31 = vmax.f32 %v1975_v22, %v1826_v34  ;;  %v2018_v50 = vmax.f32 %v2017_v32, %v1828_v35  ;;  %v1601_v55 = vpop.f32.mrb[56].mxu1  ;;  %v1714_v60 = vpop.f32.mrb[72].mxu0 }
 0x313   : > { %v1602_v62 = vadd.f32 %v1601_v55, %v3165_v0  ;;  %v1715_v2 = vadd.f32 %v1714_v60, %v3168_v4  ;;  %v1603_v3 = vpop.f32.mrb[57].mxu1  ;;  %v1716_v7 = vpop.f32.mrb[73].mxu0 }
 0x314   : > { %v1604_v8 = vadd.f32 %v1603_v3, %v3173_v25  ;;  %v1717_v10 = vadd.f32 %v1716_v7, %v3176_v33  ;;  %v1605_v49 = vpop.f32.mrb[58].mxu1  ;;  %v1718_v11 = vpop.f32.mrb[74].mxu0 }
 0x315   : > { %v1833_v12 = vmax.f32 %v1602_v62, 0.0  ;;  %v1835_v5 = vmax.f32 %v1715_v2, 0.0  ;;  %v1606_v17 = vadd.f32 %v1605_v49, %v3165_v0  ;;  %v1719_v6 = vadd.f32 %v1718_v11, %v3168_v4  ;;  %v1607_v61 = vpop.f32.mrb[59].mxu1  ;;  %v1720_v21 = vpop.f32.mrb[75].mxu0 }
 0x316   : > { %v1834_v1 = vmax.f32 %v1604_v8, 0.0  ;;  %v1836_v9 = vmax.f32 %v1717_v10, 0.0  ;;  %v1608_v23 = vadd.f32 %v1607_v61, %v3173_v25  ;;  %v1721_v24 = vadd.f32 %v1720_v21, %v3176_v33 }
 0x317   : > { %v1956_v48 = vmax.f32 %v1955_v40, %v1833_v12  ;;  %v1998_v26 = vmax.f32 %v1997_v43, %v1835_v5  ;;  %v1841_v27 = vmax.f32 %v1606_v17, 0.0  ;;  %v1843_v29 = vmax.f32 %v1719_v6, 0.0 }
 0x318   : > { %v1977_v30 = vmax.f32 %v1976_v31, %v1834_v1  ;;  %v2019_v45 = vmax.f32 %v2018_v50, %v1836_v9  ;;  %v1842_v46 = vmax.f32 %v1608_v23, 0.0  ;;  %v1844_v36 = vmax.f32 %v1721_v24, 0.0 }
 0x319   : > { %v1957_v51 = vmax.f32 %v1956_v48, %v1841_v27  ;;  %v1999_v37 = vmax.f32 %v1998_v26, %v1843_v29 }
 0x31a   : > { %v1978_v39 = vmax.f32 %v1977_v30, %v1842_v46  ;;  %v2020_v52 = vmax.f32 %v2019_v45, %v1844_v36  ;;  %v1611_v42 = vpop.f32.mrb[60].mxu1 }
 0x31b   : > { %v1612_v44 = vadd.f32 %v1611_v42, %v3165_v0  ;;  %v1613_v15 = vpop.f32.mrb[61].mxu1  ;;  %v2042_v42 = vcombine.low (!%p2314_p7), %v3192_v16, %v3198_v20 }
 0x31c   : > { %v1614_v47 = vadd.f32 %v1613_v15, %v3173_v25  ;;  %v1615_v63 = vpop.f32.mrb[62].mxu1 }
 0x31d   : > { %v1849_v53 = vmax.f32 %v1612_v44, 0.0  ;;  %v1616_v54 = vadd.f32 %v1615_v63, %v3165_v0  ;;  %v1617_v56 = vpop.f32.mrb[63].mxu1 }
 0x31e   : > { %v1850_v57 = vmax.f32 %v1614_v47, 0.0  ;;  %v1618_v58 = vadd.f32 %v1617_v56, %v3173_v25 }
 0x31f   : > { %v1958_v59 = vmax.f32 %v1957_v51, %v1849_v53  ;;  %v1857_v38 = vmax.f32 %v1616_v54, 0.0 }
 0x320   : > { %v1979_v41 = vmax.f32 %v1978_v39, %v1850_v57  ;;  %v1858_v14 = vmax.f32 %v1618_v58, 0.0 }
 0x321   : > { %v1959_v18 = vmax.f32 %v1958_v59, %v1857_v38 }
 0x322   : > { %v1980_v22 = vmax.f32 %v1979_v41, %v1858_v14  ;;  %v1724_v32 = vpop.f32.mrb[64].mxu1 }
 0x323   : > { %v1960_v34 = vrot.slane %v1959_v18, 4  ;;  %v1725_v35 = vadd.f32 %v1724_v32, %v3168_v4  ;;  %v1726_v40 = vpop.f32.mrb[65].mxu1 }
 0x324   : > { %v1981_v43 = vrot.slane %v1980_v22, 4  ;;  %v1727_v31 = vadd.f32 %v1726_v40, %v3176_v33  ;;  %v1728_v50 = vpop.f32.mrb[66].mxu1 }
 0x325   : > { %v1961_v0 = vmax.f32 %v1959_v18, %v1960_v34  ;;  %v1851_v55 = vmax.f32 %v1725_v35, 0.0  ;;  %v1729_v60 = vadd.f32 %v1728_v50, %v3168_v4  ;;  %v1730_v25 = vpop.f32.mrb[67].mxu1 }
 0x326   : > { %v1982_v62 = vmax.f32 %v1980_v22, %v1981_v43  ;;  %v1852_v2 = vmax.f32 %v1727_v31, 0.0  ;;  %v1731_v3 = vadd.f32 %v1730_v25, %v3176_v33 }
 0x327   : > { %v1962_v7 = vrot.slane %v1961_v0, 2  ;;  %v2000_v8 = vmax.f32 %v1999_v37, %v1851_v55  ;;  %v1859_v10 = vmax.f32 %v1729_v60, 0.0  ;;  %v2487_v37 = vmov (!%p2314_p7), 1966171168  }
 0x328   : > { %v1983_v49 = vrot.slane %v1982_v62, 2  ;;  %v2021_v11 = vmax.f32 %v2020_v52, %v1852_v2  ;;  %v1860_v12 = vmax.f32 %v1731_v3, 0.0  ;;  %v2046_v39 = vunpack.c.l.s4 (!%p2314_p7), %v2487_v37 }
 0x329   : > { %v1963_v5 = vmax.f32 %v1961_v0, %v1962_v7  ;;  %v2001_v17 = vmax.f32 %v2000_v8, %v1859_v10  ;;  %v2041_v52 = vcombine.low (!%p2314_p7), %v3190_v13, %v3196_v19 }
 0x32a   : > { %v1984_v6 = vmax.f32 %v1982_v62, %v1983_v49  ;;  %v2022_v61 = vmax.f32 %v2021_v11, %v1860_v12  ;;  %v2047_v47 = vunpack.c.0.s8 (!%p2314_p7), %v2046_v39 }
 0x32b   : > { %v1964_v21 = vrot.slane %v1963_v5, 1  ;;  %v2002_v1 = vrot.slane %v2001_v17, 4 }
 0x32c   : > { %v1985_v9 = vrot.slane %v1984_v6, 1  ;;  %v2023_v23 = vrot.slane %v2022_v61, 4  ;;  %v2050_v63 = vsub.s32 (!%p2314_p7), %v2047_v47, %v2626_v28 }
 0x32d   : > { %v1965_v4 = vmax.f32 %v1963_v5, %v1964_v21  ;;  %v2003_v24 = vmax.f32 %v2001_v17, %v2002_v1 }
 0x32e   : > { %v1986_v48 = vmax.f32 %v1984_v6, %v1985_v9  ;;  %v2024_v26 = vmax.f32 %v2022_v61, %v2023_v23  ;;  %v2051_v53 = vrot.slane (!%p2314_p7), %v2041_v52, %v2050_v63  ;;  %v2058_v54 = vrot.slane (!%p2314_p7), %v2042_v42, %v2050_v63 }
 0x32f   : > { %v2004_v27 = vrot.slane %v2003_v24, 2 }
 0x330   : > { %v2025_v33 = vrot.slane %v2024_v26, 2  ;;  %2032 = sbr.rel (%p2314_p7) target bundleno = 835 (0x343), region = 52  ;;  %v2043_v44 = vcombine.low (!%p2314_p7), %v1965_v4, %v1986_v48  ;;  %v2073_v58 = vcombine.low (!%p2314_p7), %v2051_v53, %v2058_v54 }
 0x331   : > { %v2005_v29 = vmax.f32 %v2003_v24, %v2004_v27 }
 0x332   : > { %v2026_v30 = vmax.f32 %v2024_v26, %v2025_v33  ;;  %v2065_v56 = vrot.slane (!%p2314_p7), %v2043_v44, %v2050_v63  ;;  %v2081_v38 = vrot.slane (!%p2314_p7), %v2073_v58, %v2050_v63 }
 0x333   : > { %v2006_v45 = vrot.slane %v2005_v29, 1 }
 0x334   : > { %v2027_v46 = vrot.slane %v2026_v30, 1 }
 0x335   : > { %v2007_v36 = vmax.f32 %v2005_v29, %v2006_v45 }
 0x336   : > { %v2028_v51 = vmax.f32 %v2026_v30, %v2027_v46 }
 0x338   : > { %v2044_v15 = vcombine.low %v2007_v36, %v2028_v51 }
 0x33a   : > { %v2072_v57 = vrot.slane %v2044_v15, %v2050_v63 }
 0x33c   : > { %v2074_v59 = vcombine.low %v2065_v56, %v2072_v57 }
 0x33e   : > { %v2088_v41 = vrot.slane %v2074_v59, %v2050_v63 }
 0x340   : > { %v2089_v14 = vcombine.low %v2081_v38, %v2088_v41 }
 0x342   : > { %2091 = vst [vmem:[%s2568_s14] sm:$0xff] %v2089_v14 }
 0x343 PF: > { %p2315_p8 = scmp.le.s32.totalorder %s2466_s24, 0 }
 0x344   : > { %v2488_v18 = vmov (!%p2315_p8), 1966171168   ;;  %v2105_v32 = vcombine.low (!%p2315_p8), %v3190_v13, %v3196_v19  ;;  %v2106_v34 = vcombine.low (!%p2315_p8), %v3192_v16, %v3198_v20  ;;  %v2107_v35 = vcombine.low (!%p2315_p8), %v1965_v4, %v1986_v48 }
 0x345   : > { %2095 = sbr.rel (%p2315_p8) target bundleno = 854 (0x356), region = 56  ;;  %v2110_v22 = vunpack.c.l.s4 (!%p2315_p8), %v2488_v18  ;;  %v2108_v40 = vcombine.low (!%p2315_p8), %v2007_v36, %v2028_v51 }
 0x347   : > { %v2111_v43 = vunpack.c.0.s8 (!%p2315_p8), %v2110_v22 }
 0x349   : > { %v2114_v31 = vsub.s32 (!%p2315_p8), %v2111_v43, %v2626_v28  ;;  %v2096_v7 = vld [vmem:[%s2568_s14] sm:$0xff] (!%p2315_p8) }
 0x34b   : > { %v2115_v50 = vrot.slane (!%p2315_p8), %v2105_v32, %v2114_v31  ;;  %v2122_v0 = vrot.slane (!%p2315_p8), %v2106_v34, %v2114_v31  ;;  %v2129_v55 = vrot.slane (!%p2315_p8), %v2107_v35, %v2114_v31  ;;  %v2136_v60 = vrot.slane (!%p2315_p8), %v2108_v40, %v2114_v31 }
 0x34d   : > { %v2137_v25 = vcombine.low %v2115_v50, %v2122_v0  ;;  %v2138_v62 = vcombine.low %v2129_v55, %v2136_v60 }
 0x34f   : > { %v2145_v2 = vrot.slane %v2137_v25, %v2114_v31  ;;  %v2152_v3 = vrot.slane %v2138_v62, %v2114_v31 }
 0x351   : > { %v2153_v8 = vcombine.low %v2145_v2, %v2152_v3 }
 0x353   : > { %v2155_v13 = vmax.f32 %v2096_v7, %v2153_v8 }
 0x355   : > { %2156 = vst [vmem:[%s2568_s14] sm:$0xff] %v2155_v13 }
 0x356 PF: > { %s17_s28 = sadd.s32 1, %s2482_s28   ;;  %s3292_s24 = smov %s2474_s26 }
 0x357   : > { %p14_p9 = scmp.ge.s32.totalorder %s17_s28, 6   ;;  %s3293_s25 = smov %s2478_s27 }
 0x358   : > { %s3294_s26 = smov %s3297_s29  ;;  %s3295_s27 = smov %s3301_s30 }
 0x359   :  { %16 = sbr.rel (!%p14_p9) target bundleno = 3 (0x3), region = 86 }

// kernel: pointnetfeat_forward.4
= control target key start
LH: loop header
LB: loop body
LE: loop exit
PB: predicated region body
PF: predicated region fallthrough
CT: control target
= control target key end

     0   :  { %12 = vsyncpa [#allocation3], 0  ;;  %s3569_s24 = smov [#allocation2]   ;;  %s3955_s0 = inlined_call_operand.vmem [shape: f32[2,1024], index: 0, kind: input, shape index: {}]   ;;  %s3956_s1 = inlined_call_operand.hbm [shape: bf16[1024,512], index: 1, kind: input, shape index: {}]   ;;  %s3957_s2 = inlined_call_operand.vmem [shape: f32[1,512], index: 2, kind: input, shape index: {}]   ;;  %s3958_s3 = inlined_call_operand.vmem [shape: bf16[512,256], index: 3, kind: input, shape index: {}]   ;;  %s3959_s4 = inlined_call_operand.vmem [shape: f32[1,256], index: 4, kind: input, shape index: {}]   ;;  %s3960_s5 = inlined_call_operand.vmem [shape: bf16[256,128], index: 5, kind: input, shape index: {}]   ;;  %s3961_s6 = inlined_call_operand.vmem [shape: f32[1,128], index: 6, kind: input, shape index: {}]   ;;  %s3962_s7 = inlined_call_operand.vmem [shape: f32[2,128], index: 7, kind: output, shape index: {}]  }
   0x1   :  { %s20_s25 = sshll.u32 %s3569_s24, 4  ;;  %s3545_s28 = scalar_lea.hbm %s3956_s1, 32768  ;;  %s21_s25 = int_to_ptr.vmem [resolvable:$true] %s20_s25 }
   0x2   :  { %p3546_p0 = scmp.ne.s32.totalorder %s3956_s1, %s3545_s28  ;;  %p3549_p1 = scmp.lt.u32.totalorder %s3545_s28, %s3956_s1 }
   0x4   :  { %p3551_p2 = pnand %p3549_p1, %p3546_p0 }
   0x6   :  { %3554 = shalt.err (!%p3551_p2)
}
   0x7   :  { %s3555_s10 = scalar_lea.vmem %s21_s25, 32768  ;;  %p3560_p4 = scmp.lt.s32.totalorder %s21_s25, %s21_s25 }
   0x8   :  { %p3556_p3 = scmp.ne.s32.totalorder %s21_s25, %s3555_s10  ;;  %p3561_p5 = scmp.lt.s32.totalorder %s3555_s10, %s3555_s10 }
   0xa   :  { %p3562_p6 = por %p3561_p5, %p3560_p4 }
   0xc   :  { %p3563_p7 = pnand %p3562_p6, %p3556_p3 }
   0xe   :  { %3566 = shalt.err (!%p3563_p7)
}
   0xf   :  { %s3570_s11 = smov 256   ;;  %s3571_s12 = smov 16  }
  0x10   :  { %26 = dma.hbm_to_vmem [thread:$0]  %s3956_s1, 32768, %s21_s25, [#allocation3], %s3570_s11, %s3570_s11, %s3571_s12  }
  0x11   :  { %3567 = dma.done.wait [#allocation3], 32768  }
  0x12   :  { %3568 = vsyncadd [#allocation3], 4294934528  ;;  %v3047_v0 = vld [vmem:[#allocation2 + $0x4] ss:$16 sps:$4 sm:$0xff]   ;;  %v3051_v2 = vld [vmem:[#allocation2] ss:$16 sps:$4 sm:$0xff]   ;;  %v49_v38 = vlaneseq }
  0x13   :  { %v3049_v1 = vld [vmem:[#allocation2 + $0x204] ss:$16 sps:$4 sm:$0xff]   ;;  %1653 = vmatprep.subr.bf16.mxu1 %v3047_v0  ;;  %v3052_v3 = vld [vmem:[#allocation2 + $0x200] ss:$16 sps:$4 sm:$0xff]   ;;  %v3572_v36 = vmov 1983009808  }
  0x14   :  { %1694 = vmatprep.subr.bf16.mxu0 %v3049_v1  ;;  %v3053_v4 = vld [vmem:[#allocation2 + $0x24] ss:$16 sps:$4 sm:$0xff]   ;;  %1654 = vmatpush1.bf16.msra.mxu1 %v3051_v2  ;;  %v3057_v6 = vld [vmem:[#allocation2 + $0x20] ss:$16 sps:$4 sm:$0xff]   ;;  %v47_v37 = vunpack.c.l.s4 %v3572_v36  ;;  %v3625_v43 = vshrl.u32 %v49_v38, 7 }
  0x15   :  { %1695 = vmatpush1.bf16.msra.mxu0 %v3052_v3  ;;  %v3055_v5 = vld [vmem:[#allocation2 + $0x224] ss:$16 sps:$4 sm:$0xff]   ;;  %1655 = vmatprep.subr.bf16.mxu1 %v3053_v4  ;;  %v3058_v7 = vld [vmem:[#allocation2 + $0x220] ss:$16 sps:$4 sm:$0xff]  }
  0x16   :  { %1696 = vmatprep.subr.bf16.mxu0 %v3055_v5  ;;  %v3059_v8 = vld [vmem:[#allocation2 + $0x44] ss:$16 sps:$4 sm:$0xff]   ;;  %v3063_v10 = vld [vmem:[#allocation2 + $0x40] ss:$16 sps:$4 sm:$0xff]   ;;  %v48_v42 = vunpack.c.0.s8 %v47_v37  ;;  %v3179_v37 = vld [vmem:[#allocation2 + $0xac] ss:$16 sps:$4 sm:$0xff]  }
  0x17   :  { %v3061_v9 = vld [vmem:[#allocation2 + $0x244] ss:$16 sps:$4 sm:$0xff]   ;;  %v3064_v11 = vld [vmem:[#allocation2 + $0x240] ss:$16 sps:$4 sm:$0xff]  }
  0x18   :  { %1656 = vmatpush1.bf16.msra.mxu1 %v3057_v6  ;;  %v3065_v12 = vld [vmem:[#allocation2 + $0x64] ss:$16 sps:$4 sm:$0xff]   ;;  %v3069_v14 = vld [vmem:[#allocation2 + $0x60] ss:$16 sps:$4 sm:$0xff]   ;;  %v3628_v49 = vsub.s32 %v48_v42, %v3625_v43  ;;  %v3647_v42 = vld [vmem:[%s3955_s0 + $0x8] sm:$0xff] }
  0x19   :  { %1697 = vmatpush1.bf16.msra.mxu0 %v3058_v7  ;;  %1657 = vmatprep.subr.bf16.mxu1 %v3059_v8  ;;  %v3067_v13 = vld [vmem:[#allocation2 + $0x264] ss:$16 sps:$4 sm:$0xff]   ;;  %v3070_v15 = vld [vmem:[#allocation2 + $0x260] ss:$16 sps:$4 sm:$0xff]  }
  0x1a   :  { %1698 = vmatprep.subr.bf16.mxu0 %v3061_v9  ;;  %v3071_v16 = vld [vmem:[#allocation2 + $0x84] ss:$16 sps:$4 sm:$0xff]   ;;  %v3075_v18 = vld [vmem:[#allocation2 + $0x80] ss:$16 sps:$4 sm:$0xff]  }
  0x1b   :  { %v3073_v17 = vld [vmem:[#allocation2 + $0x284] ss:$16 sps:$4 sm:$0xff]   ;;  %v3076_v19 = vld [vmem:[#allocation2 + $0x280] ss:$16 sps:$4 sm:$0xff]  }
  0x1c   :  { %1658 = vmatpush1.bf16.msra.mxu1 %v3063_v10  ;;  %v3077_v20 = vld [vmem:[#allocation2 + $0xa4] ss:$16 sps:$4 sm:$0xff]   ;;  %v3081_v22 = vld [vmem:[#allocation2 + $0xa0] ss:$16 sps:$4 sm:$0xff]  }
  0x1d   :  { %1699 = vmatpush1.bf16.msra.mxu0 %v3064_v11  ;;  %1659 = vmatprep.subr.bf16.mxu1 %v3065_v12  ;;  %v3079_v21 = vld [vmem:[#allocation2 + $0x2a4] ss:$16 sps:$4 sm:$0xff]   ;;  %v3082_v23 = vld [vmem:[#allocation2 + $0x2a0] ss:$16 sps:$4 sm:$0xff]  }
  0x1e   :  { %1700 = vmatprep.subr.bf16.mxu0 %v3067_v13  ;;  %v3083_v24 = vld [vmem:[#allocation2 + $0xc4] ss:$16 sps:$4 sm:$0xff]   ;;  %v3087_v26 = vld [vmem:[#allocation2 + $0xc0] ss:$16 sps:$4 sm:$0xff]  }
  0x1f   :  { %v3085_v25 = vld [vmem:[#allocation2 + $0x2c4] ss:$16 sps:$4 sm:$0xff]   ;;  %v3088_v27 = vld [vmem:[#allocation2 + $0x2c0] ss:$16 sps:$4 sm:$0xff]  }
  0x20   :  { %1660 = vmatpush1.bf16.msra.mxu1 %v3069_v14  ;;  %v3089_v28 = vld [vmem:[#allocation2 + $0xe4] ss:$16 sps:$4 sm:$0xff]   ;;  %v3093_v30 = vld [vmem:[#allocation2 + $0xe0] ss:$16 sps:$4 sm:$0xff]  }
  0x21   :  { %1701 = vmatpush1.bf16.msra.mxu0 %v3070_v15  ;;  %1661 = vmatprep.subr.bf16.mxu1 %v3071_v16  ;;  %v3091_v29 = vld [vmem:[#allocation2 + $0x2e4] ss:$16 sps:$4 sm:$0xff]   ;;  %v3094_v31 = vld [vmem:[#allocation2 + $0x2e0] ss:$16 sps:$4 sm:$0xff]   ;;  %v3149_v15 = vld [vmem:[#allocation2 + $0xc] ss:$16 sps:$4 sm:$0xff]  }
  0x22   :  { %1702 = vmatprep.subr.bf16.mxu0 %v3073_v17  ;;  %v3095_v32 = vld [vmem:[#allocation2 + $0x104] ss:$16 sps:$4 sm:$0xff]   ;;  %v3099_v34 = vld [vmem:[#allocation2 + $0x100] ss:$16 sps:$4 sm:$0xff]  }
  0x23   :  { %v3097_v33 = vld [vmem:[#allocation2 + $0x304] ss:$16 sps:$4 sm:$0xff]   ;;  %v3100_v35 = vld [vmem:[#allocation2 + $0x300] ss:$16 sps:$4 sm:$0xff]  }
  0x24   :  { %1662 = vmatpush1.bf16.msra.mxu1 %v3075_v18  ;;  %v3101_v39 = vld [vmem:[#allocation2 + $0x124] ss:$16 sps:$4 sm:$0xff]   ;;  %v3105_v41 = vld [vmem:[#allocation2 + $0x120] ss:$16 sps:$4 sm:$0xff]  }
  0x25   :  { %1703 = vmatpush1.bf16.msra.mxu0 %v3076_v19  ;;  %1663 = vmatprep.subr.bf16.mxu1 %v3077_v20  ;;  %v3103_v40 = vld [vmem:[#allocation2 + $0x324] ss:$16 sps:$4 sm:$0xff]   ;;  %v3106_v44 = vld [vmem:[#allocation2 + $0x320] ss:$16 sps:$4 sm:$0xff]   ;;  %v3147_v19 = vld [vmem:[#allocation2 + $0x8] ss:$16 sps:$4 sm:$0xff]  }
  0x26   :  { %1704 = vmatprep.subr.bf16.mxu0 %v3079_v21  ;;  %v3107_v45 = vld [vmem:[#allocation2 + $0x144] ss:$16 sps:$4 sm:$0xff]   ;;  %v3111_v47 = vld [vmem:[#allocation2 + $0x140] ss:$16 sps:$4 sm:$0xff]   ;;  %v3155_v21 = vld [vmem:[#allocation2 + $0x2c] ss:$16 sps:$4 sm:$0xff]  }
  0x27   :  { %v3109_v46 = vld [vmem:[#allocation2 + $0x344] ss:$16 sps:$4 sm:$0xff]   ;;  %v3112_v48 = vld [vmem:[#allocation2 + $0x340] ss:$16 sps:$4 sm:$0xff]  }
  0x28   :  { %1664 = vmatpush1.bf16.msra.mxu1 %v3081_v22  ;;  %v3113_v50 = vld [vmem:[#allocation2 + $0x164] ss:$16 sps:$4 sm:$0xff]   ;;  %v3117_v53 = vld [vmem:[#allocation2 + $0x160] ss:$16 sps:$4 sm:$0xff]  }
  0x29   :  { %1705 = vmatpush1.bf16.msra.mxu0 %v3082_v23  ;;  %1665 = vmatprep.subr.bf16.mxu1 %v3083_v24  ;;  %v3115_v51 = vld [vmem:[#allocation2 + $0x364] ss:$16 sps:$4 sm:$0xff]   ;;  %v3118_v56 = vld [vmem:[#allocation2 + $0x360] ss:$16 sps:$4 sm:$0xff]   ;;  %v3153_v23 = vld [vmem:[#allocation2 + $0x28] ss:$16 sps:$4 sm:$0xff]  }
  0x2a   :  { %1706 = vmatprep.subr.bf16.mxu0 %v3085_v25  ;;  %v41_v52 = vld [vmem:[%s3955_s0] sm:$0xff]  ;;  %v3161_v25 = vld [vmem:[#allocation2 + $0x4c] ss:$16 sps:$4 sm:$0xff]  }
  0x2b   :  { %v52_v54 = vrot.slane %v41_v52, %v3628_v49  ;;  %v45_v55 = vcombine.high %v41_v52, %v41_v52  ;;  %v3119_v57 = vld [vmem:[#allocation2 + $0x184] ss:$16 sps:$4 sm:$0xff]   ;;  %v3123_v61 = vld [vmem:[#allocation2 + $0x180] ss:$16 sps:$4 sm:$0xff]  }
  0x2c   :  { %1666 = vmatpush1.bf16.msra.mxu1 %v3087_v26  ;;  %v3121_v58 = vld [vmem:[#allocation2 + $0x384] ss:$16 sps:$4 sm:$0xff]   ;;  %v3124_v0 = vld [vmem:[#allocation2 + $0x380] ss:$16 sps:$4 sm:$0xff]  }
  0x2d   :  { %1707 = vmatpush1.bf16.msra.mxu0 %v3088_v27  ;;  %1667 = vmatprep.subr.bf16.mxu1 %v3089_v28  ;;  %v60_v59 = vcombine.high %v52_v54, %v52_v54  ;;  %v59_v60 = vrot.slane %v45_v55, %v3628_v49  ;;  %v3125_v1 = vld [vmem:[#allocation2 + $0x1a4] ss:$16 sps:$4 sm:$0xff]   ;;  %v3129_v4 = vld [vmem:[#allocation2 + $0x1a0] ss:$16 sps:$4 sm:$0xff]   ;;  %v3638_v16 = vpack.c.bf16 %v52_v54, %v52_v54  ;;  %v3159_v27 = vld [vmem:[#allocation2 + $0x48] ss:$16 sps:$4 sm:$0xff]  }
  0x2e   :  { %1708 = vmatprep.subr.bf16.mxu0 %v3091_v29  ;;  %v3127_v2 = vld [vmem:[#allocation2 + $0x3a4] ss:$16 sps:$4 sm:$0xff]   ;;  %v3130_v5 = vld [vmem:[#allocation2 + $0x3a0] ss:$16 sps:$4 sm:$0xff]   ;;  %v3167_v29 = vld [vmem:[#allocation2 + $0x6c] ss:$16 sps:$4 sm:$0xff]  }
  0x2f   :  { %v88_v62 = vpack.c.bf16 %v60_v59, %v60_v59  ;;  %v61_v63 = vcombine.high %v59_v60, %v59_v60  ;;  %v3131_v6 = vld [vmem:[#allocation2 + $0x1c4] ss:$16 sps:$4 sm:$0xff]   ;;  %v3135_v8 = vld [vmem:[#allocation2 + $0x1c0] ss:$16 sps:$4 sm:$0xff]   ;;  %v3640_v18 = vpack.c.bf16 %v59_v60, %v59_v60  ;;  %v3197_v55 = vld [vmem:[#allocation2 + $0x10c] ss:$16 sps:$4 sm:$0xff]  }
  0x30   :  { %1668 = vmatpush1.bf16.msra.mxu1 %v3093_v30  ;;  %v3133_v7 = vld [vmem:[#allocation2 + $0x3c4] ss:$16 sps:$4 sm:$0xff]   ;;  %v3136_v9 = vld [vmem:[#allocation2 + $0x3c0] ss:$16 sps:$4 sm:$0xff]   ;;  %v3203_v59 = vld [vmem:[#allocation2 + $0x12c] ss:$16 sps:$4 sm:$0xff]  }
  0x31   :  { %1709 = vmatpush1.bf16.msra.mxu0 %v3094_v31  ;;  %1669 = vmatprep.subr.bf16.mxu1 %v3095_v32  ;;  %v3635_v3 = vpack.c.bf16 %v61_v63, %v61_v63  ;;  %v3137_v10 = vld [vmem:[#allocation2 + $0x1e4] ss:$16 sps:$4 sm:$0xff]   ;;  %v3141_v12 = vld [vmem:[#allocation2 + $0x1e0] ss:$16 sps:$4 sm:$0xff]   ;;  %v3165_v31 = vld [vmem:[#allocation2 + $0x68] ss:$16 sps:$4 sm:$0xff]  }
  0x32   :  { %1710 = vmatprep.subr.bf16.mxu0 %v3097_v33  ;;  %1685 = vmatprep.mubr.bf16.mxu1 %v88_v62  ;;  %v3139_v11 = vld [vmem:[#allocation2 + $0x3e4] ss:$16 sps:$4 sm:$0xff]   ;;  %v3142_v13 = vld [vmem:[#allocation2 + $0x3e0] ss:$16 sps:$4 sm:$0xff]   ;;  %v3173_v33 = vld [vmem:[#allocation2 + $0x8c] ss:$16 sps:$4 sm:$0xff]  }
  0x33   :  { %1726 = vmatprep.mubr.bf16.mxu0 %v3635_v3  ;;  %v3146_v14 = vld [vmem:[#allocation2 + $0x404] ss:$16 sps:$4 sm:$0xff]   ;;  %v3144_v17 = vld [vmem:[#allocation2 + $0x400] ss:$16 sps:$4 sm:$0xff]   ;;  %v3209_v63 = vld [vmem:[#allocation2 + $0x14c] ss:$16 sps:$4 sm:$0xff]  }
  0x34   :  { %1670 = vmatpush1.bf16.msra.mxu1 %v3099_v34  ;;  %v3152_v20 = vld [vmem:[#allocation2 + $0x424] ss:$16 sps:$4 sm:$0xff]   ;;  %v3150_v22 = vld [vmem:[#allocation2 + $0x420] ss:$16 sps:$4 sm:$0xff]  }
  0x35   :  { %1711 = vmatpush1.bf16.msra.mxu0 %v3100_v35  ;;  %1671 = vmatprep.subr.bf16.mxu1 %v3101_v39  ;;  %v3158_v24 = vld [vmem:[#allocation2 + $0x444] ss:$16 sps:$4 sm:$0xff]   ;;  %v3156_v26 = vld [vmem:[#allocation2 + $0x440] ss:$16 sps:$4 sm:$0xff]   ;;  %v3171_v35 = vld [vmem:[#allocation2 + $0x88] ss:$16 sps:$4 sm:$0xff]  }
  0x36   :  { %1712 = vmatprep.subr.bf16.mxu0 %v3103_v40  ;;  %v3164_v28 = vld [vmem:[#allocation2 + $0x464] ss:$16 sps:$4 sm:$0xff]   ;;  %v3162_v30 = vld [vmem:[#allocation2 + $0x460] ss:$16 sps:$4 sm:$0xff]   ;;  %v3177_v39 = vld [vmem:[#allocation2 + $0xa8] ss:$16 sps:$4 sm:$0xff]  }
  0x37   :  { %v3170_v32 = vld [vmem:[#allocation2 + $0x484] ss:$16 sps:$4 sm:$0xff]   ;;  %v3168_v34 = vld [vmem:[#allocation2 + $0x480] ss:$16 sps:$4 sm:$0xff]  }
  0x38   :  { %1672 = vmatpush1.bf16.msra.mxu1 %v3105_v41  ;;  %v3176_v36 = vld [vmem:[#allocation2 + $0x4a4] ss:$16 sps:$4 sm:$0xff]   ;;  %v3174_v38 = vld [vmem:[#allocation2 + $0x4a0] ss:$16 sps:$4 sm:$0xff]   ;;  %v3185_v41 = vld [vmem:[#allocation2 + $0xcc] ss:$16 sps:$4 sm:$0xff]  }
  0x39   :  { %1713 = vmatpush1.bf16.msra.mxu0 %v3106_v44  ;;  %1673 = vmatprep.subr.bf16.mxu1 %v3107_v45  ;;  %v3182_v40 = vld [vmem:[#allocation2 + $0x4c4] ss:$16 sps:$4 sm:$0xff]   ;;  %v3651_v44 = vrot.slane %v3647_v42, %v3628_v49  ;;  %v3180_v45 = vld [vmem:[#allocation2 + $0x4c0] ss:$16 sps:$4 sm:$0xff]  }
  0x3a   :  { %1714 = vmatprep.subr.bf16.mxu0 %v3109_v46  ;;  %v3183_v46 = vld [vmem:[#allocation2 + $0xc8] ss:$16 sps:$4 sm:$0xff]   ;;  %v3186_v52 = vld [vmem:[#allocation2 + $0x4e0] ss:$16 sps:$4 sm:$0xff]   ;;  %v3194_v54 = vld [vmem:[#allocation2 + $0x504] ss:$16 sps:$4 sm:$0xff]  }
  0x3b   :  { %v3198_v60 = vld [vmem:[#allocation2 + $0x520] ss:$16 sps:$4 sm:$0xff]  }
  0x3c   :  { %1674 = vmatpush1.bf16.msra.mxu1 %v3111_v47  ;;  %v77_v47 = vcombine.high %v3651_v44, %v3651_v44 }
  0x3d   :  { %1715 = vmatpush1.bf16.msra.mxu0 %v3112_v48  ;;  %1675 = vmatprep.subr.bf16.mxu1 %v3113_v50  ;;  %v3188_v48 = vld [vmem:[#allocation2 + $0x4e4] ss:$16 sps:$4 sm:$0xff]   ;;  %v3191_v50 = vld [vmem:[#allocation2 + $0xec] ss:$16 sps:$4 sm:$0xff]  }
  0x3e   :  { %1716 = vmatprep.subr.bf16.mxu0 %v3115_v51  ;;  %v3655_v51 = vpack.c.bf16 %v77_v47, %v77_v47  ;;  %v3264_v47 = vld [vmem:[#allocation2 + $0x680] ss:$16 sps:$4 sm:$0xff]  }
  0x40   :  { %1676 = vmatpush1.bf16.msra.mxu1 %v3117_v53  ;;  %v3189_v53 = vld [vmem:[#allocation2 + $0xe8] ss:$16 sps:$4 sm:$0xff]  }
  0x41   :  { %1717 = vmatpush1.bf16.msra.mxu0 %v3118_v56  ;;  %1677 = vmatprep.subr.bf16.mxu1 %v3119_v57  ;;  %v3192_v56 = vld [vmem:[#allocation2 + $0x500] ss:$16 sps:$4 sm:$0xff]   ;;  %v3195_v57 = vld [vmem:[#allocation2 + $0x108] ss:$16 sps:$4 sm:$0xff]  }
  0x42   :  { %1718 = vmatprep.subr.bf16.mxu0 %v3121_v58  ;;  %v3200_v58 = vld [vmem:[#allocation2 + $0x524] ss:$16 sps:$4 sm:$0xff]  }
  0x44   :  { %1678 = vmatpush1.bf16.msra.mxu1 %v3123_v61  ;;  %v3201_v61 = vld [vmem:[#allocation2 + $0x128] ss:$16 sps:$4 sm:$0xff]  }
  0x45   :  { %1719 = vmatpush1.bf16.msra.mxu0 %v3124_v0  ;;  %1679 = vmatprep.subr.bf16.mxu1 %v3125_v1  ;;  %v3204_v0 = vld [vmem:[#allocation2 + $0x540] ss:$16 sps:$4 sm:$0xff]   ;;  %v3207_v1 = vld [vmem:[#allocation2 + $0x148] ss:$16 sps:$4 sm:$0xff]  }
  0x46   :  { %1720 = vmatprep.subr.bf16.mxu0 %v3127_v2  ;;  %v3212_v2 = vld [vmem:[#allocation2 + $0x564] ss:$16 sps:$4 sm:$0xff]  }
  0x48   :  { %1680 = vmatpush1.bf16.msra.mxu1 %v3129_v4  ;;  %v3215_v4 = vld [vmem:[#allocation2 + $0x16c] ss:$16 sps:$4 sm:$0xff]  }
  0x49   :  { %1721 = vmatpush1.bf16.msra.mxu0 %v3130_v5  ;;  %1681 = vmatprep.subr.bf16.mxu1 %v3131_v6  ;;  %v3210_v5 = vld [vmem:[#allocation2 + $0x560] ss:$16 sps:$4 sm:$0xff]   ;;  %v3213_v6 = vld [vmem:[#allocation2 + $0x168] ss:$16 sps:$4 sm:$0xff]  }
  0x4a   :  { %1722 = vmatprep.subr.bf16.mxu0 %v3133_v7  ;;  %v3218_v7 = vld [vmem:[#allocation2 + $0x584] ss:$16 sps:$4 sm:$0xff]  }
  0x4c   :  { %1682 = vmatpush1.bf16.msra.mxu1 %v3135_v8  ;;  %v3221_v8 = vld [vmem:[#allocation2 + $0x18c] ss:$16 sps:$4 sm:$0xff]  }
  0x4d   :  { %1723 = vmatpush1.bf16.msra.mxu0 %v3136_v9  ;;  %1683 = vmatprep.subr.bf16.mxu1 %v3137_v10  ;;  %v3216_v9 = vld [vmem:[#allocation2 + $0x580] ss:$16 sps:$4 sm:$0xff]   ;;  %v3219_v10 = vld [vmem:[#allocation2 + $0x188] ss:$16 sps:$4 sm:$0xff]  }
  0x4e   :  { %1724 = vmatprep.subr.bf16.mxu0 %v3139_v11  ;;  %v3224_v11 = vld [vmem:[#allocation2 + $0x5a4] ss:$16 sps:$4 sm:$0xff]  }
  0x50   :  { %1684 = vmatpush1.bf16.msra.mxu1 %v3141_v12  ;;  %v3227_v12 = vld [vmem:[#allocation2 + $0x1ac] ss:$16 sps:$4 sm:$0xff]  }
  0x51   :  { %1725 = vmatpush1.bf16.msra.mxu0 %v3142_v13  ;;  %1817 = vmatprep.subr.bf16.mxu1 %v3149_v15  ;;  %v3222_v13 = vld [vmem:[#allocation2 + $0x5a0] ss:$16 sps:$4 sm:$0xff]   ;;  %v3230_v15 = vld [vmem:[#allocation2 + $0x5c4] ss:$16 sps:$4 sm:$0xff]  }
  0x52   :  { %1735 = vmatprep.subr.bf16.mxu0 %v3146_v14  ;;  %v3225_v14 = vld [vmem:[#allocation2 + $0x1a8] ss:$16 sps:$4 sm:$0xff]  }
  0x53   :  { %1686 = vmatmul.mubr.bf16.vlgmr.msra.gmra.mrb[0].mxu1 %v3638_v16 }
  0x54   :  { %1727 = vmatmul.mubr.bf16.vlgmr.msra.gmra.mrb[0].mxu0 %v3640_v18  ;;  %1818 = vmatpush1.bf16.msra.mxu1 %v3147_v19  ;;  %v62_v19 = vcombine.high %v3647_v42, %v3647_v42  ;;  %v3258_v42 = vld [vmem:[#allocation2 + $0x660] ss:$16 sps:$4 sm:$0xff]  }
  0x55   :  { %1736 = vmatpush1.bf16.msra.mxu0 %v3144_v17  ;;  %1819 = vmatprep.subr.bf16.mxu1 %v3155_v21  ;;  %v3233_v17 = vld [vmem:[#allocation2 + $0x1cc] ss:$16 sps:$4 sm:$0xff]   ;;  %v3231_v21 = vld [vmem:[#allocation2 + $0x1c8] ss:$16 sps:$4 sm:$0xff]  }
  0x56   :  { %1737 = vmatprep.subr.bf16.mxu0 %v3152_v20  ;;  %1849 = vmatprep.mubr.bf16.mxu1 %v88_v62  ;;  %v3206_v62 = vld [vmem:[#allocation2 + $0x544] ss:$16 sps:$4 sm:$0xff]   ;;  %v3228_v20 = vld [vmem:[#allocation2 + $0x5c0] ss:$16 sps:$4 sm:$0xff]  }
  0x57   :  { %1767 = vmatprep.mubr.bf16.mxu0 %v3655_v51 }
  0x58   :  { %1820 = vmatpush1.bf16.msra.mxu1 %v3153_v23  ;;  %v3239_v23 = vld [vmem:[#allocation2 + $0x1ec] ss:$16 sps:$4 sm:$0xff]  }
  0x59   :  { %1738 = vmatpush1.bf16.msra.mxu0 %v3150_v22  ;;  %1821 = vmatprep.subr.bf16.mxu1 %v3161_v25  ;;  %v3236_v22 = vld [vmem:[#allocation2 + $0x5e4] ss:$16 sps:$4 sm:$0xff]   ;;  %v3234_v25 = vld [vmem:[#allocation2 + $0x5e0] ss:$16 sps:$4 sm:$0xff]  }
  0x5a   :  { %1739 = vmatprep.subr.bf16.mxu0 %v3158_v24  ;;  %v3661_v24 = vrot.slane %v62_v19, %v3628_v49  ;;  %v3243_v49 = vld [vmem:[#allocation2 + $0x208] ss:$16 sps:$4 sm:$0xff]   ;;  %v3312_v19 = vld [vmem:[#allocation2 + $0x780] ss:$16 sps:$4 sm:$0xff]  }
  0x5c   :  { %1822 = vmatpush1.bf16.msra.mxu1 %v3159_v27  ;;  %v3242_v27 = vld [vmem:[#allocation2 + $0x604] ss:$16 sps:$4 sm:$0xff]  }
  0x5d   :  { %1740 = vmatpush1.bf16.msra.mxu0 %v3156_v26  ;;  %1823 = vmatprep.subr.bf16.mxu1 %v3167_v29  ;;  %v3237_v26 = vld [vmem:[#allocation2 + $0x1e8] ss:$16 sps:$4 sm:$0xff]   ;;  %v78_v29 = vcombine.high %v3661_v24, %v3661_v24 }
  0x5e   :  { %1741 = vmatprep.subr.bf16.mxu0 %v3164_v28  ;;  %v3245_v28 = vld [vmem:[#allocation2 + $0x20c] ss:$16 sps:$4 sm:$0xff]  }
  0x60   :  { %1824 = vmatpush1.bf16.msra.mxu1 %v3165_v31  ;;  %v3240_v31 = vld [vmem:[#allocation2 + $0x600] ss:$16 sps:$4 sm:$0xff]  }
  0x61   :  { %1742 = vmatpush1.bf16.msra.mxu0 %v3162_v30  ;;  %1825 = vmatprep.subr.bf16.mxu1 %v3173_v33  ;;  %v3667_v30 = vpack.c.bf16 %v3651_v44, %v3651_v44  ;;  %v3251_v33 = vld [vmem:[#allocation2 + $0x22c] ss:$16 sps:$4 sm:$0xff]   ;;  %v3261_v44 = vld [vmem:[#allocation2 + $0x268] ss:$16 sps:$4 sm:$0xff]  }
  0x62   :  { %1743 = vmatprep.subr.bf16.mxu0 %v3170_v32  ;;  %v3248_v32 = vld [vmem:[#allocation2 + $0x624] ss:$16 sps:$4 sm:$0xff]  }
  0x64   :  { %1826 = vmatpush1.bf16.msra.mxu1 %v3171_v35  ;;  %v3246_v35 = vld [vmem:[#allocation2 + $0x620] ss:$16 sps:$4 sm:$0xff]  }
  0x65   :  { %1744 = vmatpush1.bf16.msra.mxu0 %v3168_v34  ;;  %1827 = vmatprep.subr.bf16.mxu1 %v3179_v37  ;;  %v3669_v34 = vpack.c.bf16 %v78_v29, %v78_v29  ;;  %v3254_v37 = vld [vmem:[#allocation2 + $0x644] ss:$16 sps:$4 sm:$0xff]   ;;  %v3327_v29 = vld [vmem:[#allocation2 + $0x3c8] ss:$16 sps:$4 sm:$0xff]  }
  0x66   :  { %1745 = vmatprep.subr.bf16.mxu0 %v3176_v36  ;;  %v3249_v36 = vld [vmem:[#allocation2 + $0x228] ss:$16 sps:$4 sm:$0xff]  }
  0x68   :  { %1828 = vmatpush1.bf16.msra.mxu1 %v3177_v39  ;;  %v3252_v39 = vld [vmem:[#allocation2 + $0x640] ss:$16 sps:$4 sm:$0xff]  }
  0x69   :  { %1746 = vmatpush1.bf16.msra.mxu0 %v3174_v38  ;;  %1829 = vmatprep.subr.bf16.mxu1 %v3185_v41  ;;  %v3257_v38 = vld [vmem:[#allocation2 + $0x24c] ss:$16 sps:$4 sm:$0xff]   ;;  %v3260_v41 = vld [vmem:[#allocation2 + $0x664] ss:$16 sps:$4 sm:$0xff]  }
  0x6a   :  { %1747 = vmatprep.subr.bf16.mxu0 %v3182_v40  ;;  %v3255_v40 = vld [vmem:[#allocation2 + $0x248] ss:$16 sps:$4 sm:$0xff]  }
  0x6c   :  { %1830 = vmatpush1.bf16.msra.mxu1 %v3183_v46  ;;  %v3269_v46 = vld [vmem:[#allocation2 + $0x28c] ss:$16 sps:$4 sm:$0xff]  }
  0x6d   :  { %1748 = vmatpush1.bf16.msra.mxu0 %v3180_v45  ;;  %1831 = vmatprep.subr.bf16.mxu1 %v3191_v50  ;;  %v3266_v45 = vld [vmem:[#allocation2 + $0x684] ss:$16 sps:$4 sm:$0xff]   ;;  %v3275_v50 = vld [vmem:[#allocation2 + $0x2ac] ss:$16 sps:$4 sm:$0xff]  }
  0x6e   :  { %1749 = vmatprep.subr.bf16.mxu0 %v3188_v48  ;;  %v3272_v48 = vld [vmem:[#allocation2 + $0x6a4] ss:$16 sps:$4 sm:$0xff]  }
  0x70   :  { %1832 = vmatpush1.bf16.msra.mxu1 %v3189_v53  ;;  %v3273_v53 = vld [vmem:[#allocation2 + $0x2a8] ss:$16 sps:$4 sm:$0xff]  }
  0x71   :  { %1750 = vmatpush1.bf16.msra.mxu0 %v3186_v52  ;;  %1833 = vmatprep.subr.bf16.mxu1 %v3197_v55  ;;  %v3270_v52 = vld [vmem:[#allocation2 + $0x6a0] ss:$16 sps:$4 sm:$0xff]   ;;  %v3281_v55 = vld [vmem:[#allocation2 + $0x2cc] ss:$16 sps:$4 sm:$0xff]  }
  0x72   :  { %1751 = vmatprep.subr.bf16.mxu0 %v3194_v54  ;;  %v3278_v54 = vld [vmem:[#allocation2 + $0x6c4] ss:$16 sps:$4 sm:$0xff]  }
  0x74   :  { %1834 = vmatpush1.bf16.msra.mxu1 %v3195_v57  ;;  %v3279_v57 = vld [vmem:[#allocation2 + $0x2c8] ss:$16 sps:$4 sm:$0xff]  }
  0x75   :  { %1752 = vmatpush1.bf16.msra.mxu0 %v3192_v56  ;;  %1835 = vmatprep.subr.bf16.mxu1 %v3203_v59  ;;  %v3276_v56 = vld [vmem:[#allocation2 + $0x6c0] ss:$16 sps:$4 sm:$0xff]   ;;  %v3287_v59 = vld [vmem:[#allocation2 + $0x2ec] ss:$16 sps:$4 sm:$0xff]  }
  0x76   :  { %1753 = vmatprep.subr.bf16.mxu0 %v3200_v58  ;;  %v3284_v58 = vld [vmem:[#allocation2 + $0x6e4] ss:$16 sps:$4 sm:$0xff]  }
  0x78   :  { %1836 = vmatpush1.bf16.msra.mxu1 %v3201_v61  ;;  %v3285_v61 = vld [vmem:[#allocation2 + $0x2e8] ss:$16 sps:$4 sm:$0xff]  }
  0x79   :  { %1754 = vmatpush1.bf16.msra.mxu0 %v3198_v60  ;;  %1837 = vmatprep.subr.bf16.mxu1 %v3209_v63  ;;  %v3282_v60 = vld [vmem:[#allocation2 + $0x6e0] ss:$16 sps:$4 sm:$0xff]   ;;  %v3293_v63 = vld [vmem:[#allocation2 + $0x30c] ss:$16 sps:$4 sm:$0xff]  }
  0x7a   :  { %1755 = vmatprep.subr.bf16.mxu0 %v3206_v62  ;;  %v3290_v62 = vld [vmem:[#allocation2 + $0x704] ss:$16 sps:$4 sm:$0xff]  }
  0x7c   :  { %1838 = vmatpush1.bf16.msra.mxu1 %v3207_v1  ;;  %v3291_v1 = vld [vmem:[#allocation2 + $0x308] ss:$16 sps:$4 sm:$0xff]  }
  0x7d   :  { %1756 = vmatpush1.bf16.msra.mxu0 %v3204_v0  ;;  %1839 = vmatprep.subr.bf16.mxu1 %v3215_v4  ;;  %v3288_v0 = vld [vmem:[#allocation2 + $0x700] ss:$16 sps:$4 sm:$0xff]   ;;  %v3299_v4 = vld [vmem:[#allocation2 + $0x32c] ss:$16 sps:$4 sm:$0xff]  }
  0x7e   :  { %1757 = vmatprep.subr.bf16.mxu0 %v3212_v2  ;;  %v3296_v2 = vld [vmem:[#allocation2 + $0x724] ss:$16 sps:$4 sm:$0xff]  }
  0x80   :  { %1840 = vmatpush1.bf16.msra.mxu1 %v3213_v6  ;;  %v3297_v6 = vld [vmem:[#allocation2 + $0x328] ss:$16 sps:$4 sm:$0xff]  }
  0x81   :  { %1758 = vmatpush1.bf16.msra.mxu0 %v3210_v5  ;;  %1841 = vmatprep.subr.bf16.mxu1 %v3221_v8  ;;  %v3294_v5 = vld [vmem:[#allocation2 + $0x720] ss:$16 sps:$4 sm:$0xff]   ;;  %v3305_v8 = vld [vmem:[#allocation2 + $0x34c] ss:$16 sps:$4 sm:$0xff]  }
  0x82   :  { %1759 = vmatprep.subr.bf16.mxu0 %v3218_v7  ;;  %v3302_v7 = vld [vmem:[#allocation2 + $0x744] ss:$16 sps:$4 sm:$0xff]  }
  0x84   :  { %1842 = vmatpush1.bf16.msra.mxu1 %v3219_v10  ;;  %v3303_v10 = vld [vmem:[#allocation2 + $0x348] ss:$16 sps:$4 sm:$0xff]  }
  0x85   :  { %1760 = vmatpush1.bf16.msra.mxu0 %v3216_v9  ;;  %1843 = vmatprep.subr.bf16.mxu1 %v3227_v12  ;;  %v3300_v9 = vld [vmem:[#allocation2 + $0x740] ss:$16 sps:$4 sm:$0xff]   ;;  %v3311_v12 = vld [vmem:[#allocation2 + $0x36c] ss:$16 sps:$4 sm:$0xff]  }
  0x86   :  { %1761 = vmatprep.subr.bf16.mxu0 %v3224_v11  ;;  %v3308_v11 = vld [vmem:[#allocation2 + $0x764] ss:$16 sps:$4 sm:$0xff]  }
  0x88   :  { %1844 = vmatpush1.bf16.msra.mxu1 %v3225_v14  ;;  %v3309_v14 = vld [vmem:[#allocation2 + $0x368] ss:$16 sps:$4 sm:$0xff]  }
  0x89   :  { %1762 = vmatpush1.bf16.msra.mxu0 %v3222_v13  ;;  %1845 = vmatprep.subr.bf16.mxu1 %v3233_v17  ;;  %v3306_v13 = vld [vmem:[#allocation2 + $0x760] ss:$16 sps:$4 sm:$0xff]   ;;  %v3317_v17 = vld [vmem:[#allocation2 + $0x38c] ss:$16 sps:$4 sm:$0xff]  }
  0x8a   :  { %1763 = vmatprep.subr.bf16.mxu0 %v3230_v15  ;;  %v3314_v15 = vld [vmem:[#allocation2 + $0x784] ss:$16 sps:$4 sm:$0xff]  }
  0x8c   :  { %1846 = vmatpush1.bf16.msra.mxu1 %v3231_v21  ;;  %v3320_v21 = vld [vmem:[#allocation2 + $0x7a4] ss:$16 sps:$4 sm:$0xff]  }
  0x8d   :  { %1764 = vmatpush1.bf16.msra.mxu0 %v3228_v20  ;;  %1847 = vmatprep.subr.bf16.mxu1 %v3239_v23  ;;  %v3315_v20 = vld [vmem:[#allocation2 + $0x388] ss:$16 sps:$4 sm:$0xff]   ;;  %v3318_v23 = vld [vmem:[#allocation2 + $0x7a0] ss:$16 sps:$4 sm:$0xff]  }
  0x8e   :  { %1765 = vmatprep.subr.bf16.mxu0 %v3236_v22  ;;  %v3323_v22 = vld [vmem:[#allocation2 + $0x3ac] ss:$16 sps:$4 sm:$0xff]  }
  0x90   :  { %1848 = vmatpush1.bf16.msra.mxu1 %v3237_v26  ;;  %v3326_v26 = vld [vmem:[#allocation2 + $0x7c4] ss:$16 sps:$4 sm:$0xff]  }
  0x91   :  { %1766 = vmatpush1.bf16.msra.mxu0 %v3234_v25  ;;  %1858 = vmatprep.subr.bf16.mxu1 %v3245_v28  ;;  %v3321_v25 = vld [vmem:[#allocation2 + $0x3a8] ss:$16 sps:$4 sm:$0xff]   ;;  %v3324_v28 = vld [vmem:[#allocation2 + $0x7c0] ss:$16 sps:$4 sm:$0xff]  }
  0x92   :  { %1776 = vmatprep.subr.bf16.mxu0 %v3242_v27  ;;  %v3329_v27 = vld [vmem:[#allocation2 + $0x3cc] ss:$16 sps:$4 sm:$0xff]  }
  0x93   :  { %1850 = vmatmul.mubr.bf16.vlgmr.msra.gmra.mrb[4].mxu1 %v3638_v16  ;;  %v3263_v16 = vld [vmem:[#allocation2 + $0x26c] ss:$16 sps:$4 sm:$0xff]  }
  0x94   :  { %1768 = vmatmul.mubr.bf16.vlgmr.msra.gmra.mrb[0].mxu0 %v3667_v30  ;;  %1859 = vmatpush1.bf16.msra.mxu1 %v3243_v49  ;;  %v3335_v49 = vld [vmem:[#allocation2 + $0x3ec] ss:$16 sps:$4 sm:$0xff]  }
  0x95   :  { %1777 = vmatpush1.bf16.msra.mxu0 %v3240_v31  ;;  %1860 = vmatprep.subr.bf16.mxu1 %v3251_v33  ;;  %v3332_v31 = vld [vmem:[#allocation2 + $0x7e4] ss:$16 sps:$4 sm:$0xff]   ;;  %v3333_v33 = vld [vmem:[#allocation2 + $0x3e8] ss:$16 sps:$4 sm:$0xff]  }
  0x96   :  { %1778 = vmatprep.subr.bf16.mxu0 %v3248_v32  ;;  %1808 = vmatprep.mubr.bf16.mxu0 %v3669_v34  ;;  %v3330_v32 = vld [vmem:[#allocation2 + $0x7e0] ss:$16 sps:$4 sm:$0xff]  }
  0x97   :  { %1890 = vmatprep.mubr.bf16.mxu1 %v3635_v3  ;;  %v3267_v3 = vld [vmem:[#allocation2 + $0x288] ss:$16 sps:$4 sm:$0xff]  }
  0x98   :  { %1861 = vmatpush1.bf16.msra.mxu1 %v3249_v36  ;;  %v3337_v36 = vld [vmem:[#allocation2 + $0x408] ss:$16 sps:$4 sm:$0xff]  }
  0x99   :  { %1779 = vmatpush1.bf16.msra.mxu0 %v3246_v35  ;;  %1862 = vmatprep.subr.bf16.mxu1 %v3257_v38  ;;  %v3339_v35 = vld [vmem:[#allocation2 + $0x40c] ss:$16 sps:$4 sm:$0xff]  }
  0x9a   :  { %1780 = vmatprep.subr.bf16.mxu0 %v3254_v37  ;;  %v3677_v37 = vpack.c.bf16 %v3661_v24, %v3661_v24  ;;  %v3342_v38 = vld [vmem:[#allocation2 + $0x42c] ss:$16 sps:$4 sm:$0xff]  }
  0x9b   :  { %v3438_v24 = vld [vmem:[%s3958_s3 + $0x14] ss:$8 sps:$4 sm:$0xff]  }
  0x9c   :  { %1863 = vmatpush1.bf16.msra.mxu1 %v3255_v40  ;;  %v3435_v40 = vld [vmem:[%s3958_s3 + $0x4] ss:$8 sps:$4 sm:$0xff]  }
  0x9d   :  { %1781 = vmatpush1.bf16.msra.mxu0 %v3252_v39  ;;  %1864 = vmatprep.subr.bf16.mxu1 %v3263_v16  ;;  %v3433_v39 = vld [vmem:[%s3958_s3] ss:$8 sps:$4 sm:$0xff]   ;;  %v3345_v16 = vld [vmem:[#allocation2 + $0x44c] ss:$16 sps:$4 sm:$0xff]  }
  0x9e   :  { %1782 = vmatprep.subr.bf16.mxu0 %v3260_v41  ;;  %v3340_v41 = vld [vmem:[#allocation2 + $0x428] ss:$16 sps:$4 sm:$0xff]  }
  0xa0   :  { %1865 = vmatpush1.bf16.msra.mxu1 %v3261_v44  ;;  %v3343_v44 = vld [vmem:[#allocation2 + $0x448] ss:$16 sps:$4 sm:$0xff]  }
  0xa1   :  { %1783 = vmatpush1.bf16.msra.mxu0 %v3258_v42  ;;  %1866 = vmatprep.subr.bf16.mxu1 %v3269_v46  ;;  %v3441_v42 = vld [vmem:[%s3958_s3 + $0x24] ss:$8 sps:$4 sm:$0xff]   ;;  %v3346_v46 = vld [vmem:[#allocation2 + $0x468] ss:$16 sps:$4 sm:$0xff]  }
  0xa2   :  { %1784 = vmatprep.subr.bf16.mxu0 %v3266_v45  ;;  %v3439_v45 = vld [vmem:[%s3958_s3 + $0x20] ss:$8 sps:$4 sm:$0xff]  }
  0xa4   :  { %1867 = vmatpush1.bf16.msra.mxu1 %v3267_v3  ;;  %v3444_v3 = vld [vmem:[%s3958_s3 + $0x34] ss:$8 sps:$4 sm:$0xff]  }
  0xa5   :  { %1785 = vmatpush1.bf16.msra.mxu0 %v3264_v47  ;;  %1868 = vmatprep.subr.bf16.mxu1 %v3275_v50  ;;  %v3351_v47 = vld [vmem:[#allocation2 + $0x48c] ss:$16 sps:$4 sm:$0xff]  }
  0xa6   :  { %1786 = vmatprep.subr.bf16.mxu0 %v3272_v48  ;;  %v3442_v48 = vld [vmem:[%s3958_s3 + $0x30] ss:$8 sps:$4 sm:$0xff]   ;;  %v3447_v50 = vld [vmem:[%s3958_s3 + $0x44] ss:$8 sps:$4 sm:$0xff]  }
  0xa8   :  { %1869 = vmatpush1.bf16.msra.mxu1 %v3273_v53  ;;  %v3354_v53 = vld [vmem:[#allocation2 + $0x4ac] ss:$16 sps:$4 sm:$0xff]  }
  0xa9   :  { %1787 = vmatpush1.bf16.msra.mxu0 %v3270_v52  ;;  %1870 = vmatprep.subr.bf16.mxu1 %v3281_v55  ;;  %v3349_v52 = vld [vmem:[#allocation2 + $0x488] ss:$16 sps:$4 sm:$0xff]   ;;  %v3450_v55 = vld [vmem:[%s3958_s3 + $0x54] ss:$8 sps:$4 sm:$0xff]  }
  0xaa   :  { %1788 = vmatprep.subr.bf16.mxu0 %v3278_v54  ;;  %v3445_v54 = vld [vmem:[%s3958_s3 + $0x40] ss:$8 sps:$4 sm:$0xff]  }
  0xac   :  { %1871 = vmatpush1.bf16.msra.mxu1 %v3279_v57  ;;  %v3357_v57 = vld [vmem:[#allocation2 + $0x4cc] ss:$16 sps:$4 sm:$0xff]  }
  0xad   :  { %1789 = vmatpush1.bf16.msra.mxu0 %v3276_v56  ;;  %1872 = vmatprep.subr.bf16.mxu1 %v3287_v59  ;;  %v3352_v56 = vld [vmem:[#allocation2 + $0x4a8] ss:$16 sps:$4 sm:$0xff]   ;;  %v3453_v59 = vld [vmem:[%s3958_s3 + $0x64] ss:$8 sps:$4 sm:$0xff]  }
  0xae   :  { %1790 = vmatprep.subr.bf16.mxu0 %v3284_v58  ;;  %v3448_v58 = vld [vmem:[%s3958_s3 + $0x50] ss:$8 sps:$4 sm:$0xff]  }
  0xb0   :  { %1873 = vmatpush1.bf16.msra.mxu1 %v3285_v61  ;;  %v3360_v61 = vld [vmem:[#allocation2 + $0x4ec] ss:$16 sps:$4 sm:$0xff]  }
  0xb1   :  { %1791 = vmatpush1.bf16.msra.mxu0 %v3282_v60  ;;  %1874 = vmatprep.subr.bf16.mxu1 %v3293_v63  ;;  %v3355_v60 = vld [vmem:[#allocation2 + $0x4c8] ss:$16 sps:$4 sm:$0xff]   ;;  %v3456_v63 = vld [vmem:[%s3958_s3 + $0x74] ss:$8 sps:$4 sm:$0xff]  }
  0xb2   :  { %1792 = vmatprep.subr.bf16.mxu0 %v3290_v62  ;;  %v3451_v62 = vld [vmem:[%s3958_s3 + $0x60] ss:$8 sps:$4 sm:$0xff]  }
  0xb4   :  { %1875 = vmatpush1.bf16.msra.mxu1 %v3291_v1  ;;  %v3363_v1 = vld [vmem:[#allocation2 + $0x50c] ss:$16 sps:$4 sm:$0xff]  }
  0xb5   :  { %1793 = vmatpush1.bf16.msra.mxu0 %v3288_v0  ;;  %1876 = vmatprep.subr.bf16.mxu1 %v3299_v4  ;;  %v3358_v0 = vld [vmem:[#allocation2 + $0x4e8] ss:$16 sps:$4 sm:$0xff]   ;;  %v3459_v4 = vld [vmem:[%s3958_s3 + $0x84] ss:$8 sps:$4 sm:$0xff]  }
  0xb6   :  { %1794 = vmatprep.subr.bf16.mxu0 %v3296_v2  ;;  %v3454_v2 = vld [vmem:[%s3958_s3 + $0x70] ss:$8 sps:$4 sm:$0xff]  }
  0xb8   :  { %1877 = vmatpush1.bf16.msra.mxu1 %v3297_v6  ;;  %v3366_v6 = vld [vmem:[#allocation2 + $0x52c] ss:$16 sps:$4 sm:$0xff]  }
  0xb9   :  { %1795 = vmatpush1.bf16.msra.mxu0 %v3294_v5  ;;  %1878 = vmatprep.subr.bf16.mxu1 %v3305_v8  ;;  %v3361_v5 = vld [vmem:[#allocation2 + $0x508] ss:$16 sps:$4 sm:$0xff]   ;;  %v3462_v8 = vld [vmem:[%s3958_s3 + $0x94] ss:$8 sps:$4 sm:$0xff]  }
  0xba   :  { %1796 = vmatprep.subr.bf16.mxu0 %v3302_v7  ;;  %v3457_v7 = vld [vmem:[%s3958_s3 + $0x80] ss:$8 sps:$4 sm:$0xff]  }
  0xbc   :  { %1879 = vmatpush1.bf16.msra.mxu1 %v3303_v10  ;;  %v3369_v10 = vld [vmem:[#allocation2 + $0x54c] ss:$16 sps:$4 sm:$0xff]  }
  0xbd   :  { %1797 = vmatpush1.bf16.msra.mxu0 %v3300_v9  ;;  %1880 = vmatprep.subr.bf16.mxu1 %v3311_v12  ;;  %v3364_v9 = vld [vmem:[#allocation2 + $0x528] ss:$16 sps:$4 sm:$0xff]   ;;  %v3465_v12 = vld [vmem:[%s3958_s3 + $0xa4] ss:$8 sps:$4 sm:$0xff]  }
  0xbe   :  { %1798 = vmatprep.subr.bf16.mxu0 %v3308_v11  ;;  %v3460_v11 = vld [vmem:[%s3958_s3 + $0x90] ss:$8 sps:$4 sm:$0xff]  }
  0xc0   :  { %1881 = vmatpush1.bf16.msra.mxu1 %v3309_v14  ;;  %v3372_v14 = vld [vmem:[#allocation2 + $0x56c] ss:$16 sps:$4 sm:$0xff]  }
  0xc1   :  { %1799 = vmatpush1.bf16.msra.mxu0 %v3306_v13  ;;  %1882 = vmatprep.subr.bf16.mxu1 %v3317_v17  ;;  %v3367_v13 = vld [vmem:[#allocation2 + $0x548] ss:$16 sps:$4 sm:$0xff]   ;;  %v3468_v17 = vld [vmem:[%s3958_s3 + $0xb4] ss:$8 sps:$4 sm:$0xff]  }
  0xc2   :  { %1800 = vmatprep.subr.bf16.mxu0 %v3314_v15  ;;  %v3463_v15 = vld [vmem:[%s3958_s3 + $0xa0] ss:$8 sps:$4 sm:$0xff]  }
  0xc4   :  { %1883 = vmatpush1.bf16.msra.mxu1 %v3315_v20  ;;  %v3375_v20 = vld [vmem:[#allocation2 + $0x58c] ss:$16 sps:$4 sm:$0xff]  }
  0xc5   :  { %1801 = vmatpush1.bf16.msra.mxu0 %v3312_v19  ;;  %1884 = vmatprep.subr.bf16.mxu1 %v3323_v22  ;;  %v3370_v19 = vld [vmem:[#allocation2 + $0x568] ss:$16 sps:$4 sm:$0xff]   ;;  %v3471_v22 = vld [vmem:[%s3958_s3 + $0xc4] ss:$8 sps:$4 sm:$0xff]  }
  0xc6   :  { %1802 = vmatprep.subr.bf16.mxu0 %v3320_v21  ;;  %v3466_v21 = vld [vmem:[%s3958_s3 + $0xb0] ss:$8 sps:$4 sm:$0xff]  }
  0xc8   :  { %1885 = vmatpush1.bf16.msra.mxu1 %v3321_v25  ;;  %v3378_v25 = vld [vmem:[#allocation2 + $0x5ac] ss:$16 sps:$4 sm:$0xff]  }
  0xc9   :  { %1803 = vmatpush1.bf16.msra.mxu0 %v3318_v23  ;;  %1886 = vmatprep.subr.bf16.mxu1 %v3329_v27  ;;  %v3373_v23 = vld [vmem:[#allocation2 + $0x588] ss:$16 sps:$4 sm:$0xff]   ;;  %v3474_v27 = vld [vmem:[%s3958_s3 + $0xd4] ss:$8 sps:$4 sm:$0xff]  }
  0xca   :  { %1804 = vmatprep.subr.bf16.mxu0 %v3326_v26  ;;  %v3469_v26 = vld [vmem:[%s3958_s3 + $0xc0] ss:$8 sps:$4 sm:$0xff]  }
  0xcc   :  { %1887 = vmatpush1.bf16.msra.mxu1 %v3327_v29  ;;  %v3381_v29 = vld [vmem:[#allocation2 + $0x5cc] ss:$16 sps:$4 sm:$0xff]  }
  0xcd   :  { %1805 = vmatpush1.bf16.msra.mxu0 %v3324_v28  ;;  %1888 = vmatprep.subr.bf16.mxu1 %v3335_v49  ;;  %v3376_v28 = vld [vmem:[#allocation2 + $0x5a8] ss:$16 sps:$4 sm:$0xff]  }
  0xce   :  { %1806 = vmatprep.subr.bf16.mxu0 %v3332_v31  ;;  %v3472_v31 = vld [vmem:[%s3958_s3 + $0xd0] ss:$8 sps:$4 sm:$0xff]  }
  0xcf   :  { %v3379_v49 = vld [vmem:[#allocation2 + $0x5c8] ss:$16 sps:$4 sm:$0xff]  }
  0xd0   :  { %1889 = vmatpush1.bf16.msra.mxu1 %v3333_v33  ;;  %v3382_v33 = vld [vmem:[#allocation2 + $0x5e8] ss:$16 sps:$4 sm:$0xff]  }
  0xd1   :  { %1807 = vmatpush1.bf16.msra.mxu0 %v3330_v32  ;;  %1899 = vmatprep.subr.bf16.mxu1 %v3339_v35  ;;  %v3384_v32 = vld [vmem:[#allocation2 + $0x5ec] ss:$16 sps:$4 sm:$0xff]  }
  0xd2   :  { %2385 = vmatprep.subr.bf16.mxu0 %v3435_v40  ;;  %v3387_v35 = vld [vmem:[#allocation2 + $0x60c] ss:$16 sps:$4 sm:$0xff]  }
  0xd3   :  { %1891 = vmatmul.mubr.bf16.vlgmr.msra.gmra.mrb[4].mxu1 %v3640_v18  ;;  %v3436_v18 = vld [vmem:[%s3958_s3 + $0x10] ss:$8 sps:$4 sm:$0xff]   ;;  %v3393_v40 = vld [vmem:[#allocation2 + $0x64c] ss:$16 sps:$4 sm:$0xff]  }
  0xd4   :  { %1809 = vmatmul.mubr.bf16.vlgmr.msra.gmra.mrb[0].mxu0 %v3677_v37  ;;  %1900 = vmatpush1.bf16.msra.mxu1 %v3337_v36  ;;  %v3385_v36 = vld [vmem:[#allocation2 + $0x608] ss:$16 sps:$4 sm:$0xff]  }
  0xd5   :  { %1931 = vmatprep.mubr.bf16.mxu1 %v3655_v51  ;;  %1901 = vmatprep.subr.bf16.mxu1 %v3342_v38  ;;  %v3348_v51 = vld [vmem:[#allocation2 + $0x46c] ss:$16 sps:$4 sm:$0xff]  }
  0xd6   :  { %2386 = vmatpush1.bf16.msra.mxu0 %v3433_v39  ;;  %v3390_v38 = vld [vmem:[#allocation2 + $0x62c] ss:$16 sps:$4 sm:$0xff]   ;;  %v3388_v39 = vld [vmem:[#allocation2 + $0x628] ss:$16 sps:$4 sm:$0xff]  }
  0xd7   :  { %2387 = vmatprep.subr.bf16.mxu0 %v3438_v24  ;;  %v3396_v24 = vld [vmem:[#allocation2 + $0x66c] ss:$16 sps:$4 sm:$0xff]  }
  0xd8   :  { %1902 = vmatpush1.bf16.msra.mxu1 %v3340_v41  ;;  %v3391_v41 = vld [vmem:[#allocation2 + $0x648] ss:$16 sps:$4 sm:$0xff]  }
  0xd9   :  { %1903 = vmatprep.subr.bf16.mxu1 %v3345_v16  ;;  %v3394_v16 = vld [vmem:[#allocation2 + $0x668] ss:$16 sps:$4 sm:$0xff]  }
  0xda   :  { %2388 = vmatpush1.bf16.msra.mxu0 %v3436_v18  ;;  %v3399_v18 = vld [vmem:[#allocation2 + $0x68c] ss:$16 sps:$4 sm:$0xff]  }
  0xdb   :  { %2389 = vmatprep.subr.bf16.mxu0 %v3441_v42  ;;  %v3397_v42 = vld [vmem:[#allocation2 + $0x688] ss:$16 sps:$4 sm:$0xff]  }
  0xdc   :  { %1904 = vmatpush1.bf16.msra.mxu1 %v3343_v44  ;;  %v3402_v44 = vld [vmem:[#allocation2 + $0x6ac] ss:$16 sps:$4 sm:$0xff]  }
  0xdd   :  { %1905 = vmatprep.subr.bf16.mxu1 %v3348_v51  ;;  %v3405_v51 = vld [vmem:[#allocation2 + $0x6cc] ss:$16 sps:$4 sm:$0xff]  }
  0xde   :  { %2390 = vmatpush1.bf16.msra.mxu0 %v3439_v45 }
  0xdf   :  { %2391 = vmatprep.subr.bf16.mxu0 %v3444_v3 }
  0xe0   :  { %1906 = vmatpush1.bf16.msra.mxu1 %v3346_v46  ;;  %v3475_v46 = vld [vmem:[%s3958_s3 + $0xe0] ss:$8 sps:$4 sm:$0xff]  }
  0xe1   :  { %1907 = vmatprep.subr.bf16.mxu1 %v3351_v47 }
  0xe2   :  { %2392 = vmatpush1.bf16.msra.mxu0 %v3442_v48  ;;  %v3403_v48 = vld [vmem:[#allocation2 + $0x6c8] ss:$16 sps:$4 sm:$0xff]  }
  0xe3   :  { %2393 = vmatprep.subr.bf16.mxu0 %v3447_v50 }
  0xe4   :  { %1908 = vmatpush1.bf16.msra.mxu1 %v3349_v52  ;;  %v3408_v52 = vld [vmem:[#allocation2 + $0x6ec] ss:$16 sps:$4 sm:$0xff]  }
  0xe5   :  { %1909 = vmatprep.subr.bf16.mxu1 %v3354_v53  ;;  %v3480_v53 = vld [vmem:[%s3958_s3 + $0xf4] ss:$8 sps:$4 sm:$0xff]  }
  0xe6   :  { %2394 = vmatpush1.bf16.msra.mxu0 %v3445_v54  ;;  %v3478_v54 = vld [vmem:[%s3958_s3 + $0xf0] ss:$8 sps:$4 sm:$0xff]  }
  0xe7   :  { %2395 = vmatprep.subr.bf16.mxu0 %v3450_v55  ;;  %v3406_v55 = vld [vmem:[#allocation2 + $0x6e8] ss:$16 sps:$4 sm:$0xff]  }
  0xe8   :  { %1910 = vmatpush1.bf16.msra.mxu1 %v3352_v56  ;;  %v3411_v56 = vld [vmem:[#allocation2 + $0x70c] ss:$16 sps:$4 sm:$0xff]  }
  0xe9   :  { %1911 = vmatprep.subr.bf16.mxu1 %v3357_v57  ;;  %v3483_v57 = vld [vmem:[%s3958_s3 + $0x104] ss:$8 sps:$4 sm:$0xff]  }
  0xea   :  { %2396 = vmatpush1.bf16.msra.mxu0 %v3448_v58  ;;  %v3409_v58 = vld [vmem:[#allocation2 + $0x708] ss:$16 sps:$4 sm:$0xff]  }
  0xeb   :  { %2397 = vmatprep.subr.bf16.mxu0 %v3453_v59  ;;  %v3414_v59 = vld [vmem:[#allocation2 + $0x72c] ss:$16 sps:$4 sm:$0xff]  }
  0xec   :  { %1912 = vmatpush1.bf16.msra.mxu1 %v3355_v60  ;;  %v3412_v60 = vld [vmem:[#allocation2 + $0x728] ss:$16 sps:$4 sm:$0xff]  }
  0xed   :  { %1913 = vmatprep.subr.bf16.mxu1 %v3360_v61  ;;  %v3417_v61 = vld [vmem:[#allocation2 + $0x74c] ss:$16 sps:$4 sm:$0xff]  }
  0xee   :  { %2398 = vmatpush1.bf16.msra.mxu0 %v3451_v62  ;;  %v3415_v62 = vld [vmem:[#allocation2 + $0x748] ss:$16 sps:$4 sm:$0xff]  }
  0xef   :  { %2399 = vmatprep.subr.bf16.mxu0 %v3456_v63  ;;  %v3420_v63 = vld [vmem:[#allocation2 + $0x76c] ss:$16 sps:$4 sm:$0xff]  }
  0xf0   :  { %1914 = vmatpush1.bf16.msra.mxu1 %v3358_v0  ;;  %v3418_v0 = vld [vmem:[#allocation2 + $0x768] ss:$16 sps:$4 sm:$0xff]  }
  0xf1   :  { %1915 = vmatprep.subr.bf16.mxu1 %v3363_v1  ;;  %v3423_v1 = vld [vmem:[#allocation2 + $0x78c] ss:$16 sps:$4 sm:$0xff]  }
  0xf2   :  { %2400 = vmatpush1.bf16.msra.mxu0 %v3454_v2  ;;  %v3421_v2 = vld [vmem:[#allocation2 + $0x788] ss:$16 sps:$4 sm:$0xff]  }
  0xf3   :  { %2401 = vmatprep.subr.bf16.mxu0 %v3459_v4  ;;  %v3426_v4 = vld [vmem:[#allocation2 + $0x7ac] ss:$16 sps:$4 sm:$0xff]  }
  0xf4   :  { %1916 = vmatpush1.bf16.msra.mxu1 %v3361_v5  ;;  %v3424_v5 = vld [vmem:[#allocation2 + $0x7a8] ss:$16 sps:$4 sm:$0xff]  }
  0xf5   :  { %1917 = vmatprep.subr.bf16.mxu1 %v3366_v6  ;;  %v3429_v6 = vld [vmem:[#allocation2 + $0x7cc] ss:$16 sps:$4 sm:$0xff]  }
  0xf6   :  { %2402 = vmatpush1.bf16.msra.mxu0 %v3457_v7  ;;  %v3427_v7 = vld [vmem:[#allocation2 + $0x7c8] ss:$16 sps:$4 sm:$0xff]  }
  0xf7   :  { %2403 = vmatprep.subr.bf16.mxu0 %v3462_v8  ;;  %v3432_v8 = vld [vmem:[#allocation2 + $0x7ec] ss:$16 sps:$4 sm:$0xff]  }
  0xf8   :  { %1918 = vmatpush1.bf16.msra.mxu1 %v3364_v9  ;;  %v3430_v9 = vld [vmem:[#allocation2 + $0x7e8] ss:$16 sps:$4 sm:$0xff]  }
  0xf9   :  { %1919 = vmatprep.subr.bf16.mxu1 %v3369_v10  ;;  %v355_v10 = vsub.s32 0, %v3625_v43 }
  0xfa   :  { %2404 = vmatpush1.bf16.msra.mxu0 %v3460_v11  ;;  %v3788_v11 = vld [vmem:[%s3957_s2] sm:$0xf] }
  0xfb   :  { %2405 = vmatprep.subr.bf16.mxu0 %v3465_v12  ;;  %v359_v12 = vsub.s32 1, %v3625_v43 }
  0xfc   :  { %1920 = vmatpush1.bf16.msra.mxu1 %v3367_v13  ;;  %v356_v13 = vrot.slane %v3788_v11, %v355_v10 }
  0xfd   :  { %1921 = vmatprep.subr.bf16.mxu1 %v3372_v14  ;;  %v360_v14 = vrot.slane %v3788_v11, %v359_v12 }
  0xfe   :  { %2406 = vmatpush1.bf16.msra.mxu0 %v3463_v15 }
  0xff   :  { %2407 = vmatprep.subr.bf16.mxu0 %v3468_v17 }
 0x100   :  { %1922 = vmatpush1.bf16.msra.mxu1 %v3370_v19 }
 0x101   :  { %1923 = vmatprep.subr.bf16.mxu1 %v3375_v20 }
 0x102   :  { %2408 = vmatpush1.bf16.msra.mxu0 %v3466_v21 }
 0x103   :  { %2409 = vmatprep.subr.bf16.mxu0 %v3471_v22 }
 0x104   :  { %1924 = vmatpush1.bf16.msra.mxu1 %v3373_v23 }
 0x105   :  { %1925 = vmatprep.subr.bf16.mxu1 %v3378_v25 }
 0x106   :  { %2410 = vmatpush1.bf16.msra.mxu0 %v3469_v26 }
 0x107   :  { %2411 = vmatprep.subr.bf16.mxu0 %v3474_v27 }
 0x108   :  { %1926 = vmatpush1.bf16.msra.mxu1 %v3376_v28  ;;  %v3481_v28 = vld [vmem:[%s3958_s3 + $0x100] ss:$8 sps:$4 sm:$0xff]  }
 0x109   :  { %1927 = vmatprep.subr.bf16.mxu1 %v3381_v29 }
 0x10a   :  { %2412 = vmatpush1.bf16.msra.mxu0 %v3472_v31  ;;  %v3486_v31 = vld [vmem:[%s3958_s3 + $0x114] ss:$8 sps:$4 sm:$0xff]  }
 0x10c   :  { %1928 = vmatpush1.bf16.msra.mxu1 %v3379_v49  ;;  %v3529_v49 = vld [vmem:[%s3960_s5 + $0x40] sm:$0xff]  }
 0x10d   :  { %1929 = vmatprep.subr.bf16.mxu1 %v3384_v32  ;;  %v3530_v32 = vld [vmem:[%s3960_s5] sm:$0xff]  }
 0x110   :  { %1930 = vmatpush1.bf16.msra.mxu1 %v3382_v33  ;;  %v3531_v33 = vld [vmem:[%s3960_s5 + $0x48] sm:$0xff]  }
 0x111   :  { %1940 = vmatprep.subr.bf16.mxu1 %v3387_v35  ;;  %v3484_v35 = vld [vmem:[%s3958_s3 + $0x110] ss:$8 sps:$4 sm:$0xff]  }
 0x113   :  { %1932 = vmatmul.mubr.bf16.vlgmr.msra.gmra.mrb[4].mxu1 %v3667_v30  ;;  %v3400_v30 = vld [vmem:[#allocation2 + $0x6a8] ss:$16 sps:$4 sm:$0xff]  }
 0x114   :  { %1941 = vmatpush1.bf16.msra.mxu1 %v3385_v36  ;;  %1972 = vmatprep.mubr.bf16.mxu1 %v3669_v34  ;;  %v3477_v34 = vld [vmem:[%s3958_s3 + $0xe4] ss:$8 sps:$4 sm:$0xff]  }
 0x115   :  { %1942 = vmatprep.subr.bf16.mxu1 %v3390_v38  ;;  %2413 = vmatprep.subr.bf16.mxu0 %v3477_v34  ;;  %v3489_v36 = vld [vmem:[%s3958_s3 + $0x124] ss:$8 sps:$4 sm:$0xff]   ;;  %v3498_v34 = vld [vmem:[%s3958_s3 + $0x154] ss:$8 sps:$4 sm:$0xff]  }
 0x116   :  { %2414 = vmatpush1.bf16.msra.mxu0 %v3475_v46  ;;  %v3532_v38 = vld [vmem:[%s3960_s5 + $0x8] sm:$0xff]  }
 0x117   :  { %2415 = vmatprep.subr.bf16.mxu0 %v3480_v53  ;;  %v3539_v46 = vld [vmem:[%s3960_s5 + $0x68] sm:$0xff]   ;;  %v3502_v53 = vld [vmem:[%s3958_s3 + $0x170] ss:$8 sps:$4 sm:$0xff]  }
 0x118   :  { %1943 = vmatpush1.bf16.msra.mxu1 %v3388_v39  ;;  %v3533_v39 = vld [vmem:[%s3960_s5 + $0x50] sm:$0xff]  }
 0x119   :  { %1944 = vmatprep.subr.bf16.mxu1 %v3393_v40  ;;  %v3487_v40 = vld [vmem:[%s3958_s3 + $0x120] ss:$8 sps:$4 sm:$0xff]  }
 0x11a   :  { %2416 = vmatpush1.bf16.msra.mxu0 %v3478_v54  ;;  %v3507_v54 = vld [vmem:[%s3958_s3 + $0x184] ss:$8 sps:$4 sm:$0xff]  }
 0x11b   :  { %2426 = vmatprep.subr.bf16.mxu0 %v3483_v57  ;;  %v3508_v57 = vld [vmem:[%s3958_s3 + $0x190] ss:$8 sps:$4 sm:$0xff]  }
 0x11c   :  { %1945 = vmatpush1.bf16.msra.mxu1 %v3391_v41  ;;  %v3492_v41 = vld [vmem:[%s3958_s3 + $0x134] ss:$8 sps:$4 sm:$0xff]  }
 0x11d   :  { %1946 = vmatprep.subr.bf16.mxu1 %v3396_v24  ;;  %v3534_v24 = vld [vmem:[%s3960_s5 + $0x10] sm:$0xff]  }
 0x120   :  { %1947 = vmatpush1.bf16.msra.mxu1 %v3394_v16  ;;  %v3535_v16 = vld [vmem:[%s3960_s5 + $0x58] sm:$0xff]  }
 0x121   :  { %1948 = vmatprep.subr.bf16.mxu1 %v3399_v18  ;;  %v3490_v18 = vld [vmem:[%s3958_s3 + $0x130] ss:$8 sps:$4 sm:$0xff]  }
 0x124   :  { %1949 = vmatpush1.bf16.msra.mxu1 %v3397_v42  ;;  %v3495_v42 = vld [vmem:[%s3958_s3 + $0x144] ss:$8 sps:$4 sm:$0xff]  }
 0x125   :  { %1950 = vmatprep.subr.bf16.mxu1 %v3402_v44  ;;  %v3536_v44 = vld [vmem:[%s3960_s5 + $0x18] sm:$0xff]  }
 0x126   :  { %v1687_v45 = vpop.f32.mrb[0].mxu1 }
 0x127   :  { %v1689_v47 = vpop.f32.mrb[1].mxu1  ;;  %v1688_v15 = vadd.f32 %v1687_v45, %v356_v13  ;;  %v3538_v45 = vld [vmem:[%s3960_s5 + $0x20] sm:$0xff]  }
 0x128   :  { %v1691_v3 = vpop.f32.mrb[2].mxu1  ;;  %1951 = vmatpush1.bf16.msra.mxu1 %v3400_v30  ;;  %v1690_v17 = vadd.f32 %v1689_v47, %v360_v14  ;;  %v3537_v30 = vld [vmem:[%s3960_s5 + $0x60] sm:$0xff]   ;;  %v3496_v47 = vld [vmem:[%s3958_s3 + $0x150] ss:$8 sps:$4 sm:$0xff]  }
 0x129   :  { %v1692_v50 = vpop.f32.mrb[3].mxu1  ;;  %1952 = vmatprep.subr.bf16.mxu1 %v3405_v51  ;;  %v3493_v51 = vld [vmem:[%s3958_s3 + $0x140] ss:$8 sps:$4 sm:$0xff]   ;;  %v3501_v3 = vld [vmem:[%s3958_s3 + $0x164] ss:$8 sps:$4 sm:$0xff]  }
 0x12a   :  { %v3499_v50 = vld [vmem:[%s3958_s3 + $0x160] ss:$8 sps:$4 sm:$0xff]  }
 0x12c   :  { %1953 = vmatpush1.bf16.msra.mxu1 %v3403_v48  ;;  %v3540_v48 = vld [vmem:[%s3960_s5 + $0x28] sm:$0xff]  }
 0x12d   :  { %1954 = vmatprep.subr.bf16.mxu1 %v3408_v52  ;;  %v3504_v52 = vld [vmem:[%s3958_s3 + $0x174] ss:$8 sps:$4 sm:$0xff]  }
 0x130   :  { %1955 = vmatpush1.bf16.msra.mxu1 %v3406_v55  ;;  %v3505_v55 = vld [vmem:[%s3958_s3 + $0x180] ss:$8 sps:$4 sm:$0xff]  }
 0x131   :  { %1956 = vmatprep.subr.bf16.mxu1 %v3411_v56  ;;  %v3510_v56 = vld [vmem:[%s3958_s3 + $0x194] ss:$8 sps:$4 sm:$0xff]  }
 0x134   :  { %1957 = vmatpush1.bf16.msra.mxu1 %v3409_v58  ;;  %v3513_v58 = vld [vmem:[%s3958_s3 + $0x1a4] ss:$8 sps:$4 sm:$0xff]  }
 0x135   :  { %1958 = vmatprep.subr.bf16.mxu1 %v3414_v59  ;;  %v3511_v59 = vld [vmem:[%s3958_s3 + $0x1a0] ss:$8 sps:$4 sm:$0xff]  }
 0x138   :  { %1959 = vmatpush1.bf16.msra.mxu1 %v3412_v60  ;;  %v3516_v60 = vld [vmem:[%s3958_s3 + $0x1b4] ss:$8 sps:$4 sm:$0xff]  }
 0x139   :  { %1960 = vmatprep.subr.bf16.mxu1 %v3417_v61  ;;  %v3514_v61 = vld [vmem:[%s3958_s3 + $0x1b0] ss:$8 sps:$4 sm:$0xff]  }
 0x13c   :  { %1961 = vmatpush1.bf16.msra.mxu1 %v3415_v62  ;;  %v3519_v62 = vld [vmem:[%s3958_s3 + $0x1c4] ss:$8 sps:$4 sm:$0xff]  }
 0x13d   :  { %1962 = vmatprep.subr.bf16.mxu1 %v3420_v63  ;;  %v3517_v63 = vld [vmem:[%s3958_s3 + $0x1c0] ss:$8 sps:$4 sm:$0xff]  }
 0x140   :  { %1963 = vmatpush1.bf16.msra.mxu1 %v3418_v0  ;;  %v3522_v0 = vld [vmem:[%s3958_s3 + $0x1d4] ss:$8 sps:$4 sm:$0xff]  }
 0x141   :  { %1964 = vmatprep.subr.bf16.mxu1 %v3423_v1  ;;  %v3520_v1 = vld [vmem:[%s3958_s3 + $0x1d0] ss:$8 sps:$4 sm:$0xff]  }
 0x144   :  { %1965 = vmatpush1.bf16.msra.mxu1 %v3421_v2  ;;  %v3525_v2 = vld [vmem:[%s3958_s3 + $0x1e4] ss:$8 sps:$4 sm:$0xff]  }
 0x145   :  { %1966 = vmatprep.subr.bf16.mxu1 %v3426_v4  ;;  %v3523_v4 = vld [vmem:[%s3958_s3 + $0x1e0] ss:$8 sps:$4 sm:$0xff]  }
 0x148   :  { %1967 = vmatpush1.bf16.msra.mxu1 %v3424_v5  ;;  %v3528_v5 = vld [vmem:[%s3958_s3 + $0x1f4] ss:$8 sps:$4 sm:$0xff]  }
 0x149   :  { %1968 = vmatprep.subr.bf16.mxu1 %v3429_v6  ;;  %v3526_v6 = vld [vmem:[%s3958_s3 + $0x1f0] ss:$8 sps:$4 sm:$0xff]  }
 0x14c   :  { %1969 = vmatpush1.bf16.msra.mxu1 %v3427_v7  ;;  %v363_v7 = vsub.s32 2, %v3625_v43 }
 0x14d   :  { %1970 = vmatprep.subr.bf16.mxu1 %v3432_v8  ;;  %v367_v8 = vsub.s32 3, %v3625_v43 }
 0x14f   :  { %v368_v13 = vrot.slane %v3788_v11, %v367_v8 }
 0x150   :  { %1971 = vmatpush1.bf16.msra.mxu1 %v3430_v9  ;;  %v364_v9 = vrot.slane %v3788_v11, %v363_v7  ;;  %v3542_v11 = vld [vmem:[%s3960_s5 + $0x30] sm:$0xff]  }
 0x151   :  { %2989 = vmatprep.subr.bf16.mxu1 %v3529_v49 }
 0x153   :  { %1973 = vmatmul.mubr.bf16.vlgmr.msra.gmra.mrb[4].mxu1 %v3677_v37 }
 0x154   :  { %2990 = vmatpush3.bf16.msra.mxu1 %v3530_v32 }
 0x155   :  { %2991 = vmatprep.subr.bf16.mxu1 %v3531_v33 }
 0x158   :  { %2992 = vmatpush3.bf16.msra.mxu1 %v3532_v38 }
 0x159   :  { %2993 = vmatprep.subr.bf16.mxu1 %v3533_v39 }
 0x15c   :  { %2994 = vmatpush3.bf16.msra.mxu1 %v3534_v24 }
 0x15d   :  { %2995 = vmatprep.subr.bf16.mxu1 %v3535_v16 }
 0x160   :  { %2996 = vmatpush3.bf16.msra.mxu1 %v3536_v44 }
 0x161   :  { %2997 = vmatprep.subr.bf16.mxu1 %v3537_v30 }
 0x164   :  { %2998 = vmatpush3.bf16.msra.mxu1 %v3538_v45 }
 0x165   :  { %2999 = vmatprep.subr.bf16.mxu1 %v3539_v46 }
 0x168   :  { %3000 = vmatpush3.bf16.msra.mxu1 %v3540_v48 }
 0x1a7   :  { %v1810_v37 = vpop.f32.mrb[0].mxu0 }
 0x1a8   :  { %v3012_v19 = vadd.f32 %v1810_v37, %v1688_v15  ;;  %v1812_v20 = vpop.f32.mrb[1].mxu0 }
 0x1a9   :  { %v3014_v21 = vadd.f32 %v1812_v20, %v1690_v17  ;;  %v1814_v22 = vpop.f32.mrb[2].mxu0 }
 0x1aa   :  { %v1981_v23 = vmax.f32 %v3012_v19, 0.0  ;;  %v1815_v25 = vpop.f32.mrb[3].mxu0 }
 0x1ab   :  { %v1982_v26 = vmax.f32 %v3014_v21, 0.0 }
 0x1ac   :  { %v1985_v29 = vpack.c.bf16 %v1981_v23, %v1981_v23 }
 0x1ad   :  { %v1986_v27 = vpack.c.bf16 %v1982_v26, %v1982_v26  ;;  %v3541_v26 = vld [vmem:[%s3960_s5 + $0x70] sm:$0xff]  }
 0x1ae   :  { %3001 = vmatprep.subr.bf16.mxu1 %v3541_v26 }
 0x1af   :  { %2417 = vmatprep.mubr.bf16.mxu0 %v1986_v27  ;;  %3002 = vmatpush3.bf16.msra.mxu1 %v3542_v11  ;;  %v3543_v27 = vld [vmem:[%s3960_s5 + $0x78] sm:$0xff]  }
 0x1b0   :  { %2418 = vmatmul.mubr.bf16.vlgmr.msra.gmra.mrb[4].mxu0 %v1985_v29  ;;  %3003 = vmatprep.subr.bf16.mxu1 %v3543_v27  ;;  %v2053_v29 = vld [vmem:[%s3959_s4] sm:$0x3] }
 0x1b1   :  { %2427 = vmatpush1.bf16.msra.mxu0 %v3481_v28  ;;  %v3544_v28 = vld [vmem:[%s3960_s5 + $0x38] sm:$0xff]   ;;  %v2062_v49 = vrot.slane %v2053_v29, %v359_v12 }
 0x1b2   :  { %2428 = vmatprep.subr.bf16.mxu0 %v3486_v31  ;;  %v2058_v31 = vrot.slane %v2053_v29, %v355_v10  ;;  %v2972_v10 = vld [vmem:[%s3961_s6] ss:$0 sm:$0xff] }
 0x1b3   :  { %3004 = vmatpush3.bf16.msra.mxu1 %v3544_v28 }
 0x1b5   :  { %2429 = vmatpush1.bf16.msra.mxu0 %v3484_v35 }
 0x1b6   :  { %2430 = vmatprep.subr.bf16.mxu0 %v3489_v36 }
 0x1b9   :  { %2431 = vmatpush1.bf16.msra.mxu0 %v3487_v40 }
 0x1ba   :  { %2432 = vmatprep.subr.bf16.mxu0 %v3492_v41 }
 0x1bd   :  { %2433 = vmatpush1.bf16.msra.mxu0 %v3490_v18 }
 0x1be   :  { %2434 = vmatprep.subr.bf16.mxu0 %v3495_v42 }
 0x1c1   :  { %2435 = vmatpush1.bf16.msra.mxu0 %v3493_v51 }
 0x1c2   :  { %2436 = vmatprep.subr.bf16.mxu0 %v3498_v34 }
 0x1c5   :  { %2437 = vmatpush1.bf16.msra.mxu0 %v3496_v47 }
 0x1c6   :  { %2438 = vmatprep.subr.bf16.mxu0 %v3501_v3 }
 0x1c9   :  { %2439 = vmatpush1.bf16.msra.mxu0 %v3499_v50 }
 0x1ca   :  { %2440 = vmatprep.subr.bf16.mxu0 %v3504_v52 }
 0x1cd   :  { %2441 = vmatpush1.bf16.msra.mxu0 %v3502_v53 }
 0x1ce   :  { %2442 = vmatprep.subr.bf16.mxu0 %v3507_v54 }
 0x1d1   :  { %2443 = vmatpush1.bf16.msra.mxu0 %v3505_v55 }
 0x1d2   :  { %2444 = vmatprep.subr.bf16.mxu0 %v3510_v56 }
 0x1d5   :  { %2445 = vmatpush1.bf16.msra.mxu0 %v3508_v57 }
 0x1d6   :  { %2446 = vmatprep.subr.bf16.mxu0 %v3513_v58 }
 0x1d9   :  { %2447 = vmatpush1.bf16.msra.mxu0 %v3511_v59 }
 0x1da   :  { %2448 = vmatprep.subr.bf16.mxu0 %v3516_v60 }
 0x1dd   :  { %2449 = vmatpush1.bf16.msra.mxu0 %v3514_v61 }
 0x1de   :  { %2450 = vmatprep.subr.bf16.mxu0 %v3519_v62 }
 0x1e1   :  { %2451 = vmatpush1.bf16.msra.mxu0 %v3517_v63 }
 0x1e2   :  { %2452 = vmatprep.subr.bf16.mxu0 %v3522_v0 }
 0x1e5   :  { %2453 = vmatpush1.bf16.msra.mxu0 %v3520_v1 }
 0x1e6   :  { %2454 = vmatprep.subr.bf16.mxu0 %v3525_v2 }
 0x1e9   :  { %2455 = vmatpush1.bf16.msra.mxu0 %v3523_v4 }
 0x1ea   :  { %2456 = vmatprep.subr.bf16.mxu0 %v3528_v5 }
 0x1ed   :  { %2457 = vmatpush1.bf16.msra.mxu0 %v3526_v6 }
 0x226   :  { %v1974_v14 = vpop.f32.mrb[4].mxu1 }
 0x227   :  { %v3015_v15 = vadd.f32 %v1974_v14, %v364_v9  ;;  %v1976_v17 = vpop.f32.mrb[5].mxu1 }
 0x228   :  { %v3016_v37 = vadd.f32 %v1976_v17, %v368_v13  ;;  %v1978_v19 = vpop.f32.mrb[6].mxu1 }
 0x229   :  { %v1983_v20 = vmax.f32 %v3015_v15, 0.0  ;;  %v1979_v21 = vpop.f32.mrb[7].mxu1 }
 0x22a   :  { %v1984_v22 = vmax.f32 %v3016_v37, 0.0 }
 0x22b   :  { %v1987_v25 = vpack.c.bf16 %v1983_v20, %v1983_v20 }
 0x22c   :  { %v1988_v23 = vpack.c.bf16 %v1984_v22, %v1984_v22 }
 0x22e   :  { %2458 = vmatprep.mubr.bf16.mxu0 %v1988_v23 }
 0x22f   :  { %2459 = vmatmul.mubr.bf16.vlgmr.msra.gmra.mrb[4].mxu0 %v1987_v25 }
 0x302   :  { %v2460_v32 = vpop.f32.mrb[4].mxu0 }
 0x303   :  { %v3017_v33 = vadd.f32 %v2460_v32, %v2058_v31  ;;  %v2462_v35 = vpop.f32.mrb[5].mxu0 }
 0x304   :  { %v3018_v36 = vadd.f32 %v2462_v35, %v2062_v49  ;;  %v2464_v38 = vpop.f32.mrb[6].mxu0 }
 0x305   :  { %v2467_v39 = vmax.f32 %v3017_v33, 0.0  ;;  %v2465_v40 = vpop.f32.mrb[7].mxu0 }
 0x306   :  { %v2468_v41 = vmax.f32 %v3018_v36, 0.0 }
 0x307   :  { %v2469_v16 = vpack.c.bf16 %v2467_v39, %v2467_v39 }
 0x308   :  { %v2470_v24 = vpack.c.bf16 %v2468_v41, %v2468_v41 }
 0x30a   :  { %2638 = vmatprep.mubr.bf16.mxu1 %v2470_v24 }
 0x30b   :  { %2639 = vmatmul.mubr.bf16.vlgmr.msra.gmra.mrb[8].mxu1 %v2469_v16 }
 0x3de   :  { %v3005_v18 = vpop.f32.mrb[8].mxu1 }
 0x3df   :  { %v3006_v42 = vpop.f32.mrb[9].mxu1 }
 0x3e0   :  { %v3007_v43 = vadd.f32 %v3006_v42, %v3005_v18  ;;  %v3008_v12 = vpop.f32.mrb[10].mxu1 }
 0x3e1   :  { %v3009_v44 = vpop.f32.mrb[11].mxu1 }
 0x3e2   :  { %v2641_v30 = vadd.f32 %v3007_v43, %v2972_v10 }
 0x3e4   :  { %2646 = vst [vmem:[%s3962_s7] sm:$0x3] %v2641_v30 }
 0x3e5   :  { %2651 = vsyncpa [#allocation3], 1 }

</bundles_post_ra>
